<compile_context>
chip_gen: v5e
topology: v5e:2x2
jax: 0.10.0
libtpu: 0.0.40
codegen_flags: <defaults>
</compile_context>

<pallas_src>
import functools

import numpy as np

import jax
import jax.numpy as jnp
from jax.experimental import pallas as pl
from jax.experimental.pallas import tpu as pltpu

EPS = 1e-5
K = 3          # conv kernel size of the Basic block
VMEM_LIMIT = 32 * 1024 * 1024   # fits v5e/v6e (128 MiB) and v7x (64 MiB)


# ----------------------------- small helpers ------------------------------- #

def _round_up(x, m):
    return ((x + m - 1) // m) * m


def _pick_row_tile(rows, target=512):
    """Largest multiple-of-8 divisor of `rows` that is <= target (else rows)."""
    if rows <= target:
        return rows
    t = (target // 8) * 8
    while t >= 8:
        if rows % t == 0:
            return t
        t -= 8
    return rows


# ----------------------- kernel 1: BN batch statistics --------------------- #

def _bn_stats_kernel(x_ref, stat_ref):
    """Accumulate per-column sum / sum-of-squares across row tiles."""
    @pl.when(pl.program_id(0) == 0)
    def _init():
        stat_ref[...] = jnp.zeros(stat_ref.shape, stat_ref.dtype)

    x = x_ref[...]
    stat_ref[0:1, :] = stat_ref[0:1, :] + jnp.sum(x, axis=0, keepdims=True)
    stat_ref[1:2, :] = stat_ref[1:2, :] + jnp.sum(x * x, axis=0, keepdims=True)


def _column_sums(x2d):
    rows, cols = x2d.shape
    tm = _pick_row_tile(rows, target=512)
    return pl.pallas_call(
        _bn_stats_kernel,
        out_shape=jax.ShapeDtypeStruct((2, cols), jnp.float32),
        grid=(rows // tm,),
        in_specs=[pl.BlockSpec((tm, cols), lambda i: (i, 0))],
        out_specs=pl.BlockSpec((2, cols), lambda i: (0, 0)),
        compiler_params=pltpu.CompilerParams(
            dimension_semantics=("arbitrary",),     # cross-tile accumulation
            vmem_limit_bytes=VMEM_LIMIT),
    )(x2d)


def _bn1_stats(x_rows):
    """Per-channel (sum, sumsq) of a channel-last (M, C) view.  Uses a
    lane-dense (rows, 128) view when possible for full 128-lane utilization."""
    M, C = x_rows.shape
    if (M * C) % 128 == 0 and 128 % C == 0:
        rows = (M * C) // 128
        s = _column_sums(x_rows.reshape(rows, 128))          # (2, 128)
        s = s.reshape(2, 128 // C, C).sum(axis=1)            # channel = lane % C
    else:
        s = _column_sums(x_rows)
    return s                                                  # (2, C)


def _bn_affine(stat, count, gamma, beta):
    mean = stat[0] / count
    # clamp: E[x^2]-E[x]^2 can go slightly negative from cancellation
    var = jnp.maximum(stat[1] / count - mean * mean, 0.0)
    scale = gamma.astype(jnp.float32) * jax.lax.rsqrt(var + EPS)
    shift = beta.astype(jnp.float32) - mean * scale
    return scale.reshape(1, -1), shift.reshape(1, -1)


# -------- kernel 2: bn1-apply + relu1 + conv1 + bn2 stats + shortcut -------- #

def _make_conv1_kernel(H, W, Ci, Co, s, Ho, Wo, slab_rows, zp_rows,
                       with_shortcut):
    Wp = W + 2
    RA = Ho * Wp            # junk-padded accumulator rows (row m = i*Wp + j)

    def compute(x_ref, m_ref, sc_ref, sh_ref, w_ref, wsc_ref,
                y_ref, st_ref, res_ref, zp_ref, slab_ref, acc_ref):
        sc = sc_ref[...]
        sh = sh_ref[...]

        # scatter relu(bn1(x)) into the zero-padded flat scratch.  Only the
        # pad borders are zeroed (the interior is fully overwritten).
        zp_ref[0:Wp + 1, :] = jnp.zeros((Wp + 1, Ci), jnp.float32)
        for h in range(H):
            zrow = jnp.maximum(x_ref[0, h * W:(h + 1) * W, :] * sc + sh, 0.0)
            d = (h + 1) * Wp + 1
            zp_ref[d:d + W, :] = zrow
            zp_ref[d + W:d + W + 2, :] = jnp.zeros((2, Ci), jnp.float32)
        bot = (H + 1) * Wp + 1
        zp_ref[bot:zp_rows, :] = jnp.zeros((zp_rows - bot, Ci), jnp.float32)

        # kw-folded staging slab: slab[r, t*Ci:(t+1)*Ci] = zp[r + t]
        for t in range(K):
            slab_ref[:, t * Ci:(t + 1) * Ci] = zp_ref[t:t + slab_rows, :]

        # conv1 = 3 accumulating MXU matmuls with a 3*Ci contraction; the
        # accumulator lives in VMEM (no vreg spills, MRB-friendly on v7x).
        for kh in range(K):
            if s == 1:
                tap = slab_ref[kh * Wp:kh * Wp + RA, :]
            else:
                tap = slab_ref[pl.ds(kh * Wp, RA, stride=s), :]
            prod = jnp.dot(tap.astype(jnp.bfloat16), w_ref[kh],
                           preferred_element_type=jnp.float32)
            if kh == 0:
                acc_ref[...] = prod
            else:
                acc_ref[...] += prod

        # one bulk store of y in the junk-padded layout; bn2 partial stats via
        # one masked reduction (mask zeroes the j >= Wo junk columns).
        y_ref[0] = acc_ref[...]
        mk = m_ref[...]
        st_ref[0, 0:1, :] = jnp.sum(acc_ref[...] * mk, axis=0, keepdims=True)
        mq = acc_ref[...] * mk
        st_ref[0, 1:2, :] = jnp.sum(mq * mq, axis=0, keepdims=True)

        if with_shortcut:
            # 1x1 stride-s shortcut on relu(bn1(x)); same junk-padded layout.
            if s == 1:
                zsub = zp_ref[Wp + 1:Wp + 1 + RA, :]
            else:
                zsub = zp_ref[pl.ds(Wp + 1, RA, stride=s), :]
            res_ref[0] = jnp.dot(zsub.astype(jnp.bfloat16), wsc_ref[...],
                                 preferred_element_type=jnp.float32)

    if with_shortcut:
        def kernel(x_ref, m_ref, sc_ref, sh_ref, w_ref, wsc_ref,
                   y_ref, st_ref, res_ref, zp_ref, slab_ref, acc_ref):
            compute(x_ref, m_ref, sc_ref, sh_ref, w_ref, wsc_ref,
                    y_ref, st_ref, res_ref, zp_ref, slab_ref, acc_ref)
    else:
        def kernel(x_ref, m_ref, sc_ref, sh_ref, w_ref,
                   y_ref, st_ref, zp_ref, slab_ref, acc_ref):
            compute(x_ref, m_ref, sc_ref, sh_ref, w_ref, None,
                    y_ref, st_ref, None, zp_ref, slab_ref, acc_ref)
    return kernel


# ------------------ kernel 3: bn2-apply + relu2 + conv2 --------------------- #

def _make_conv2_kernel(Ho, Wo, Co, Wp_in, slab_rows, zp_rows):
    Wp = Wo + 2
    RA = Ho * Wp

    def kernel(y_ref, sc_ref, sh_ref, w_ref, o_ref, zp_ref, slab_ref, acc_ref):
        sc = sc_ref[...]
        sh = sh_ref[...]

        zp_ref[0:Wp + 1, :] = jnp.zeros((Wp + 1, Co), jnp.float32)
        for i in range(Ho):
            # only the valid columns of the junk-padded y are ever read.
            yrow = jnp.maximum(
                y_ref[0, i * Wp_in:i * Wp_in + Wo, :] * sc + sh, 0.0)
            d = (i + 1) * Wp + 1
            zp_ref[d:d + Wo, :] = yrow
            zp_ref[d + Wo:d + Wo + 2, :] = jnp.zeros((2, Co), jnp.float32)
        bot = (Ho + 1) * Wp + 1
        zp_ref[bot:zp_rows, :] = jnp.zeros((zp_rows - bot, Co), jnp.float32)

        for t in range(K):
            slab_ref[:, t * Co:(t + 1) * Co] = zp_ref[t:t + slab_rows, :]

        for kh in range(K):
            tap = slab_ref[kh * Wp:kh * Wp + RA, :]
            prod = jnp.dot(tap.astype(jnp.bfloat16), w_ref[kh],
                           preferred_element_type=jnp.float32)
            if kh == 0:
                acc_ref[...] = prod
            else:
                acc_ref[...] += prod

        o_ref[0] = acc_ref[...]            # one bulk store (junk cols kept)

    return kernel


# ------------------------------- wrapper ------------------------------------ #

def prepare_params(params):
    """One-time weight layout transforms (hoisted out of the forward path)."""
    w1, w2, w_sc, g1, b1, g2, b2 = params
    co, ci = w1.shape[0], w1.shape[1]
    # kw-folded layouts: w[kh, kw*C + c, co]
    w1f = jnp.transpose(w1, (2, 3, 1, 0)).reshape(K, K * ci, co).astype(jnp.bfloat16)
    w2f = jnp.transpose(w2, (2, 3, 1, 0)).reshape(K, K * co, co).astype(jnp.bfloat16)
    wscp = (w_sc.reshape(co, ci).T.astype(jnp.bfloat16)
            if w_sc is not None else None)
    return (w1f, w2f, wscp,
            g1.astype(jnp.float32), b1.astype(jnp.float32),
            g2.astype(jnp.float32), b2.astype(jnp.float32))


@functools.partial(jax.jit, static_argnums=(2,))
def basic_block(x_nchw, packed_params, stride):
    w1f, w2f, wscp, g1, b1, g2, b2 = packed_params
    N, Ci, H, W = x_nchw.shape
    Co = w1f.shape[2]
    s = stride
    Ho = (H - 1) // s + 1
    Wo = (W - 1) // s + 1
    HW = H * W
    Wp1, Wp2 = W + 2, Wo + 2
    RA1, RA2 = Ho * Wp1, Ho * Wp2
    with_sc = wscp is not None

    # TODO(synk): fold this NCHW->NHWC transpose into the conv1 kernel (in-VMEM
    # XLU transpose of the NCHW block) to save one HBM round trip of x.
    x_rows = jnp.transpose(x_nchw, (0, 2, 3, 1)).astype(jnp.float32).reshape(N, HW, Ci)

    # ---- pass 1: bn1 batch statistics (lane-dense, cross-tile accumulation) - #
    st1 = _bn1_stats(x_rows.reshape(N * HW, Ci))
    scale1, shift1 = _bn_affine(st1, N * HW, g1, b1)

    # static 0/1 column mask zeroing junk (j >= Wo) rows of the flat padded
    # accumulator layout (row m = i*Wp1 + j); passed as a tiny kernel input.
    mask1 = jnp.asarray((np.arange(RA1) % Wp1 < Wo).astype(np.float32)
                        ).reshape(RA1, 1)

    slab1 = _round_up((K - 1) * Wp1 + s * (RA1 - 1) + 1, 8)
    zp1 = _round_up(max(slab1 + K - 1, (H + 2) * Wp1), 8)

    # ---- pass 2: conv1 fused with bn1-apply/relu1, bn2 partials, shortcut --- #
    in_specs = [pl.BlockSpec((1, HW, Ci), lambda n: (n, 0, 0)),
                pl.BlockSpec((RA1, 1), lambda n: (0, 0)),
                pl.BlockSpec((1, Ci), lambda n: (0, 0)),
                pl.BlockSpec((1, Ci), lambda n: (0, 0)),
                pl.BlockSpec((K, K * Ci, Co), lambda n: (0, 0, 0))]
    out_shape = [jax.ShapeDtypeStruct((N, RA1, Co), jnp.float32),
                 jax.ShapeDtypeStruct((N, 2, Co), jnp.float32)]
    out_specs = [pl.BlockSpec((1, RA1, Co), lambda n: (n, 0, 0)),
                 pl.BlockSpec((1, 2, Co), lambda n: (n, 0, 0))]
    args = [x_rows, mask1, scale1, shift1, w1f]
    if with_sc:
        in_specs.append(pl.BlockSpec((Ci, Co), lambda n: (0, 0)))
        out_shape.append(jax.ShapeDtypeStruct((N, RA1, Co), jnp.float32))
        out_specs.append(pl.BlockSpec((1, RA1, Co), lambda n: (n, 0, 0)))
        args.append(wscp)

    outs = pl.pallas_call(
        _make_conv1_kernel(H, W, Ci, Co, s, Ho, Wo, slab1, zp1, with_sc),
        out_shape=tuple(out_shape),
        grid=(N,),
        in_specs=in_specs,
        out_specs=tuple(out_specs),
        scratch_shapes=[pltpu.VMEM((zp1, Ci), jnp.float32),
                        pltpu.VMEM((slab1, K * Ci), jnp.float32),
                        pltpu.VMEM((RA1, Co), jnp.float32)],
        compiler_params=pltpu.CompilerParams(
            dimension_semantics=("parallel",),
            vmem_limit_bytes=VMEM_LIMIT),
    )(*args)
    if with_sc:
        y_pad, st2p, res_pad = outs
    else:
        y_pad, st2p = outs

    st2 = jnp.sum(st2p, axis=0)                        # fold per-image partials
    scale2, shift2 = _bn_affine(st2, N * Ho * Wo, g2, b2)

    # ---- pass 3: conv2 fused with bn2-apply/relu2 --------------------------- #
    slab2 = _round_up((K - 1) * Wp2 + (RA2 - 1) + 1, 8)
    zp2 = _round_up(max(slab2 + K - 1, (Ho + 2) * Wp2), 8)

    out_pad = pl.pallas_call(
        _make_conv2_kernel(Ho, Wo, Co, Wp1, slab2, zp2),
        out_shape=jax.ShapeDtypeStruct((N, RA2, Co), jnp.float32),
        grid=(N,),
        in_specs=[pl.BlockSpec((1, RA1, Co), lambda n: (n, 0, 0)),
                  pl.BlockSpec((1, Co), lambda n: (0, 0)),
                  pl.BlockSpec((1, Co), lambda n: (0, 0)),
                  pl.BlockSpec((K, K * Co, Co), lambda n: (0, 0, 0))],
        out_specs=pl.BlockSpec((1, RA2, Co), lambda n: (n, 0, 0)),
        scratch_shapes=[pltpu.VMEM((zp2, Co), jnp.float32),
                        pltpu.VMEM((slab2, K * Co), jnp.float32),
                        pltpu.VMEM((RA2, Co), jnp.float32)],
        compiler_params=pltpu.CompilerParams(
            dimension_semantics=("parallel",),
            vmem_limit_bytes=VMEM_LIMIT),
    )(y_pad, scale2, shift2, w2f)

    # ---- epilogue: XLA fuses valid-col slice + NHWC->NCHW + residual add ---- #
    out = jnp.transpose(out_pad.reshape(N, Ho, Wp2, Co)[:, :, :Wo, :],
                        (0, 3, 1, 2))
    if with_sc:
        res = jnp.transpose(res_pad.reshape(N, Ho, Wp1, Co)[:, :, :Wo, :],
                            (0, 3, 1, 2))
    else:
        assert Ci == Co and s == 1, "identity shortcut needs ci == co and s == 1"
        res = x_nchw.astype(jnp.float32)
    return out + res


# ------------------------ pure-JAX reference check -------------------------- #

def _ref_forward(x, params, stride):
    w1, w2, w_sc, g1, b1, g2, b2 = params

    def bn(x, g, b):   # training-mode batch stats, NCHW
        m = x.mean(axis=(0, 2, 3), keepdims=True)
        v = ((x - m) ** 2).mean(axis=(0, 2, 3), keepdims=True)
        return ((x - m) / jnp.sqrt(v + EPS) * g.reshape(1, -1, 1, 1)
                + b.reshape(1, -1, 1, 1))

    def conv(x, w, s, p):
        return jax.lax.conv_general_dilated(
            x, w, (s, s), [(p, p), (p, p)],
            dimension_numbers=('NCHW', 'OIHW', 'NCHW'))

    z = jax.nn.relu(bn(x, g1, b1))
    xr = conv(z, w_sc, stride, 0) if w_sc is not None else x
    z = conv(z, w1, stride, 1)
    z = jax.nn.relu(bn(z, g2, b2))
    z = conv(z, w2, 1, 1)
    return xr + z


# ---------------------------------- main ------------------------------------ #

def _make_params(key, ci, co, with_shortcut):
    ks = jax.random.split(key, 7)
    w1 = 0.1 * jax.random.normal(ks[0], (co, ci, 3, 3), jnp.float32)
    w2 = 0.1 * jax.random.normal(ks[1], (co, co, 3, 3), jnp.float32)
    w_sc = (0.1 * jax.random.normal(ks[2], (co, ci, 1, 1), jnp.float32)
            if with_shortcut else None)
    g1 = 1.0 + 0.1 * jax.random.normal(ks[3], (ci,), jnp.float32)
    b1 = 0.1 * jax.random.normal(ks[4], (ci,), jnp.float32)
    g2 = 1.0 + 0.1 * jax.random.normal(ks[5], (co,), jnp.float32)
    b2 = 0.1 * jax.random.normal(ks[6], (co,), jnp.float32)
    return (w1, w2, w_sc, g1, b1, g2, b2)


if __name__ == "__main__":
    key = jax.random.PRNGKey(0)
    k_a, k_b, k_xa, k_xb = jax.random.split(key, 4)

    # case 1: channel-changing, strided block (uses the 1x1 shortcut conv)
    N, ci, co, s, H, W = 2, 4, 8, 2, 16, 16
    params_a = _make_params(k_a, ci, co, with_shortcut=True)
    x_a = jax.random.normal(k_xa, (N, ci, H, W), jnp.float32)
    out_a = jax.block_until_ready(basic_block(x_a, prepare_params(params_a), s))
    ref_a = jax.block_until_ready(_ref_forward(x_a, params_a, s))
    assert out_a.shape == (N, co, H // s, W // s), out_a.shape
    assert jnp.allclose(out_a, ref_a, atol=5e-2, rtol=5e-2), \
        float(jnp.max(jnp.abs(out_a - ref_a)))

    # case 2: identity shortcut (ci == co, stride 1)
    ci2 = co2 = 8
    params_b = _make_params(k_b, ci2, co2, with_shortcut=False)
    x_b = jax.random.normal(k_xb, (N, ci2, H, W), jnp.float32)
    out_b = jax.block_until_ready(basic_block(x_b, prepare_params(params_b), 1))
    ref_b = jax.block_until_ready(_ref_forward(x_b, params_b, 1))
    assert out_b.shape == (N, co2, H, W), out_b.shape
    assert jnp.allclose(out_b, ref_b, atol=5e-2, rtol=5e-2), \
        float(jnp.max(jnp.abs(out_b - ref_b)))

    print("KERNEL_OK")
</pallas_src>

<mosaic_0001>
module attributes {stable_mosaic.version = 11 : i64} {
  func.func @_bn_stats_kernel(%arg0: i32, %arg1: memref<16x128xf32, #tpu.memory_space<vmem>>, %arg2: memref<2x128xf32, #tpu.memory_space<vmem>>) attributes {dimension_semantics = [#tpu.dimension_semantics<arbitrary>], iteration_bounds = array<i64: 1>, scalar_prefetch = 0 : i64, scratch_operands = 0 : i64, tpu.core_type = #tpu.core_type<tc>, window_params = [{transform_indices = @transform_0, window_bounds = array<i64: 16, 128>}, {pipeline_mode = #tpu.pipeline_mode<synchronous>, transform_indices = @transform_1, window_bounds = array<i64: 2, 128>}]} {
    %c0_i32 = arith.constant 0 : i32
    %0 = arith.cmpi eq, %arg0, %c0_i32 : i32
    %1 = arith.extui %0 : i1 to i32
    %c0_i32_0 = arith.constant 0 : i32
    %2 = arith.cmpi ne, %1, %c0_i32_0 : i32
    scf.if %2 {
      %cst_10 = arith.constant 0.000000e+00 : f32
      %15 = vector.broadcast %cst_10 : f32 to vector<2x128xf32>
      %c0_11 = arith.constant 0 : index
      %c0_12 = arith.constant 0 : index
      %16 = vector.load %arg2[%c0_11, %c0_12] : memref<2x128xf32, #tpu.memory_space<vmem>>, vector<2x128xf32>
      tpu.vector_store %arg2[%c0_11, %c0_12], %15 {strides = array<i32>} : memref<2x128xf32, #tpu.memory_space<vmem>>, vector<2x128xf32>,
    } else {
    }
    %c0 = arith.constant 0 : index
    %c0_1 = arith.constant 0 : index
    %3 = vector.load %arg1[%c0, %c0_1] : memref<16x128xf32, #tpu.memory_space<vmem>>, vector<16x128xf32>
    %c0_2 = arith.constant 0 : index
    %c0_3 = arith.constant 0 : index
    %4 = vector.load %arg2[%c0_2, %c0_3] : memref<2x128xf32, #tpu.memory_space<vmem>>, vector<1x128xf32>
    %cst = arith.constant dense<0.000000e+00> : vector<128xf32>
    %5 = vector.multi_reduction <add>, %3, %cst [0] : vector<16x128xf32> to vector<128xf32>
    %6 = vector.shape_cast %5 : vector<128xf32> to vector<1x128xf32>
    %7 = arith.addf %4, %6 : vector<1x128xf32>
    %c0_4 = arith.constant 0 : index
    %c0_5 = arith.constant 0 : index
    %8 = vector.load %arg2[%c0_4, %c0_5] : memref<2x128xf32, #tpu.memory_space<vmem>>, vector<1x128xf32>
    tpu.vector_store %arg2[%c0_4, %c0_5], %7 {strides = array<i32>} : memref<2x128xf32, #tpu.memory_space<vmem>>, vector<1x128xf32>,
    %c1 = arith.constant 1 : index
    %c0_6 = arith.constant 0 : index
    %9 = vector.load %arg2[%c1, %c0_6] : memref<2x128xf32, #tpu.memory_space<vmem>>, vector<1x128xf32>
    %10 = arith.mulf %3, %3 : vector<16x128xf32>
    %cst_7 = arith.constant dense<0.000000e+00> : vector<128xf32>
    %11 = vector.multi_reduction <add>, %10, %cst_7 [0] : vector<16x128xf32> to vector<128xf32>
    %12 = vector.shape_cast %11 : vector<128xf32> to vector<1x128xf32>
    %13 = arith.addf %9, %12 : vector<1x128xf32>
    %c1_8 = arith.constant 1 : index
    %c0_9 = arith.constant 0 : index
    %14 = vector.load %arg2[%c1_8, %c0_9] : memref<2x128xf32, #tpu.memory_space<vmem>>, vector<1x128xf32>
    tpu.vector_store %arg2[%c1_8, %c0_9], %13 {strides = array<i32>} : memref<2x128xf32, #tpu.memory_space<vmem>>, vector<1x128xf32>,
    return
  }
  func.func @transform_0(%arg0: i32) -> (i32, i32) {
    %c0_i32 = arith.constant 0 : i32
    %c0_i32_0 = arith.constant 0 : i32
    return %arg0, %c0_i32 : i32, i32
  }
  func.func @transform_1(%arg0: i32) -> (i32, i32) {
    %c0_i32 = arith.constant 0 : i32
    %c0_i32_0 = arith.constant 0 : i32
    %c0_i32_1 = arith.constant 0 : i32
    return %c0_i32, %c0_i32_0 : i32, i32
  }
}

module attributes {stable_mosaic.version = 11 : i64} {
  func.func @kernel(%arg0: i32, %arg1: memref<1x144x8xf32, #tpu.memory_space<vmem>>, %arg2: memref<1x8xf32, #tpu.memory_space<vmem>>, %arg3: memref<1x8xf32, #tpu.memory_space<vmem>>, %arg4: memref<3x24x8xbf16, #tpu.memory_space<vmem>>, %arg5: memref<1x80x8xf32, #tpu.memory_space<vmem>>, %arg6: memref<112x8xf32, #tpu.memory_space<vmem>>, %arg7: memref<104x24xf32, #tpu.memory_space<vmem>>, %arg8: memref<80x8xf32, #tpu.memory_space<vmem>>) attributes {dimension_semantics = [#tpu.dimension_semantics<parallel>], iteration_bounds = array<i64: 2>, scalar_prefetch = 0 : i64, scratch_operands = 3 : i64, tpu.core_type = #tpu.core_type<tc>, window_params = [{transform_indices = @transform_0, window_bounds = array<i64: 1, 144, 8>}, {pipeline_mode = #tpu.pipeline_mode<synchronous>, transform_indices = @transform_1, window_bounds = array<i64: 1, 8>}, {pipeline_mode = #tpu.pipeline_mode<synchronous>, transform_indices = @transform_2, window_bounds = array<i64: 1, 8>}, {pipeline_mode = #tpu.pipeline_mode<synchronous>, transform_indices = @transform_3, window_bounds = array<i64: 3, 24, 8>}, {transform_indices = @transform_4, window_bounds = array<i64: 1, 80, 8>}]} {
    %c0 = arith.constant 0 : index
    %c0_0 = arith.constant 0 : index
    %0 = vector.load %arg2[%c0, %c0_0] : memref<1x8xf32, #tpu.memory_space<vmem>>, vector<1x8xf32>
    %c0_1 = arith.constant 0 : index
    %c0_2 = arith.constant 0 : index
    %1 = vector.load %arg3[%c0_1, %c0_2] : memref<1x8xf32, #tpu.memory_space<vmem>>, vector<1x8xf32>
    %cst = arith.constant 0.000000e+00 : f32
    %2 = vector.broadcast %cst : f32 to vector<11x8xf32>
    %c0_3 = arith.constant 0 : index
    %c0_4 = arith.constant 0 : index
    %3 = vector.load %arg6[%c0_3, %c0_4] : memref<112x8xf32, #tpu.memory_space<vmem>>, vector<11x8xf32>
    tpu.vector_store %arg6[%c0_3, %c0_4], %2 {strides = array<i32>} : memref<112x8xf32, #tpu.memory_space<vmem>>, vector<11x8xf32>,
    %c0_5 = arith.constant 0 : index
    %c0_6 = arith.constant 0 : index
    %c0_7 = arith.constant 0 : index
    %4 = vector.load %arg1[%c0_5, %c0_6, %c0_7] : memref<1x144x8xf32, #tpu.memory_space<vmem>>, vector<1x8x8xf32>
    %5 = vector.shape_cast %4 : vector<1x8x8xf32> to vector<8x8xf32>
    %6 = vector.broadcast %0 : vector<1x8xf32> to vector<8x8xf32>
    %7 = arith.mulf %5, %6 : vector<8x8xf32>
    %8 = vector.broadcast %1 : vector<1x8xf32> to vector<8x8xf32>
    %9 = arith.addf %7, %8 : vector<8x8xf32>
    %cst_8 = arith.constant 0.000000e+00 : f32
    %10 = vector.broadcast %cst_8 : f32 to vector<8x8xf32>
    %11 = arith.maximumf %9, %10 : vector<8x8xf32>
    %c11 = arith.constant 11 : index
    %c0_9 = arith.constant 0 : index
    %12 = vector.load %arg6[%c11, %c0_9] : memref<112x8xf32, #tpu.memory_space<vmem>>, vector<8x8xf32>
    tpu.vector_store %arg6[%c11, %c0_9], %11 {strides = array<i32>} : memref<112x8xf32, #tpu.memory_space<vmem>>, vector<8x8xf32>,
    %cst_10 = arith.constant 0.000000e+00 : f32
    %13 = vector.broadcast %cst_10 : f32 to vector<2x8xf32>
    %c19 = arith.constant 19 : index
    %c0_11 = arith.constant 0 : index
    %14 = vector.load %arg6[%c19, %c0_11] : memref<112x8xf32, #tpu.memory_space<vmem>>, vector<2x8xf32>
    tpu.vector_store %arg6[%c19, %c0_11], %13 {strides = array<i32>} : memref<112x8xf32, #tpu.memory_space<vmem>>, vector<2x8xf32>,
    %c0_12 = arith.constant 0 : index
    %c18 = arith.constant 18 : index
    %c0_13 = arith.constant 0 : index
    %15 = vector.load %arg1[%c0_12, %c18, %c0_13] : memref<1x144x8xf32, #tpu.memory_space<vmem>>, vector<1x8x8xf32>
    %16 = vector.shape_cast %15 : vector<1x8x8xf32> to vector<8x8xf32>
    %17 = vector.broadcast %0 : vector<1x8xf32> to vector<8x8xf32>
    %18 = arith.mulf %16, %17 : vector<8x8xf32>
    %19 = vector.broadcast %1 : vector<1x8xf32> to vector<8x8xf32>
    %20 = arith.addf %18, %19 : vector<8x8xf32>
    %cst_14 = arith.constant 0.000000e+00 : f32
    %21 = vector.broadcast %cst_14 : f32 to vector<8x8xf32>
    %22 = arith.maximumf %20, %21 : vector<8x8xf32>
    %c21 = arith.constant 21 : index
    %c0_15 = arith.constant 0 : index
    %23 = vector.load %arg6[%c21, %c0_15] : memref<112x8xf32, #tpu.memory_space<vmem>>, vector<8x8xf32>
    tpu.vector_store %arg6[%c21, %c0_15], %22 {strides = array<i32>} : memref<112x8xf32, #tpu.memory_space<vmem>>, vector<8x8xf32>,
    %cst_16 = arith.constant 0.000000e+00 : f32
    %24 = vector.broadcast %cst_16 : f32 to vector<2x8xf32>
    %c29 = arith.constant 29 : index
    %c0_17 = arith.constant 0 : index
    %25 = vector.load %arg6[%c29, %c0_17] : memref<112x8xf32, #tpu.memory_space<vmem>>, vector<2x8xf32>
    tpu.vector_store %arg6[%c29, %c0_17], %24 {strides = array<i32>} : memref<112x8xf32, #tpu.memory_space<vmem>>, vector<2x8xf32>,
    %c0_18 = arith.constant 0 : index
    %c36 = arith.constant 36 : index
    %c0_19 = arith.constant 0 : index
    %26 = vector.load %arg1[%c0_18, %c36, %c0_19] : memref<1x144x8xf32, #tpu.memory_space<vmem>>, vector<1x8x8xf32>
    %27 = vector.shape_cast %26 : vector<1x8x8xf32> to vector<8x8xf32>
    %28 = vector.broadcast %0 : vector<1x8xf32> to vector<8x8xf32>
    %29 = arith.mulf %27, %28 : vector<8x8xf32>
    %30 = vector.broadcast %1 : vector<1x8xf32> to vector<8x8xf32>
    %31 = arith.addf %29, %30 : vector<8x8xf32>
    %cst_20 = arith.constant 0.000000e+00 : f32
    %32 = vector.broadcast %cst_20 : f32 to vector<8x8xf32>
    %33 = arith.maximumf %31, %32 : vector<8x8xf32>
    %c31 = arith.constant 31 : index
    %c0_21 = arith.constant 0 : index
    %34 = vector.load %arg6[%c31, %c0_21] : memref<112x8xf32, #tpu.memory_space<vmem>>, vector<8x8xf32>
    tpu.vector_store %arg6[%c31, %c0_21], %33 {strides = array<i32>} : memref<112x8xf32, #tpu.memory_space<vmem>>, vector<8x8xf32>,
    %cst_22 = arith.constant 0.000000e+00 : f32
    %35 = vector.broadcast %cst_22 : f32 to vector<2x8xf32>
    %c39 = arith.constant 39 : index
    %c0_23 = arith.constant 0 : index
    %36 = vector.load %arg6[%c39, %c0_23] : memref<112x8xf32, #tpu.memory_space<vmem>>, vector<2x8xf32>
    tpu.vector_store %arg6[%c39, %c0_23], %35 {strides = array<i32>} : memref<112x8xf32, #tpu.memory_space<vmem>>, vector<2x8xf32>,
    %c0_24 = arith.constant 0 : index
    %c54 = arith.constant 54 : index
    %c0_25 = arith.constant 0 : index
    %37 = vector.load %arg1[%c0_24, %c54, %c0_25] : memref<1x144x8xf32, #tpu.memory_space<vmem>>, vector<1x8x8xf32>
    %38 = vector.shape_cast %37 : vector<1x8x8xf32> to vector<8x8xf32>
    %39 = vector.broadcast %0 : vector<1x8xf32> to vector<8x8xf32>
    %40 = arith.mulf %38, %39 : vector<8x8xf32>
    %41 = vector.broadcast %1 : vector<1x8xf32> to vector<8x8xf32>
    %42 = arith.addf %40, %41 : vector<8x8xf32>
    %cst_26 = arith.constant 0.000000e+00 : f32
    %43 = vector.broadcast %cst_26 : f32 to vector<8x8xf32>
    %44 = arith.maximumf %42, %43 : vector<8x8xf32>
    %c41 = arith.constant 41 : index
    %c0_27 = arith.constant 0 : index
    %45 = vector.load %arg6[%c41, %c0_27] : memref<112x8xf32, #tpu.memory_space<vmem>>, vector<8x8xf32>
    tpu.vector_store %arg6[%c41, %c0_27], %44 {strides = array<i32>} : memref<112x8xf32, #tpu.memory_space<vmem>>, vector<8x8xf32>,
    %cst_28 = arith.constant 0.000000e+00 : f32
    %46 = vector.broadcast %cst_28 : f32 to vector<2x8xf32>
    %c49 = arith.constant 49 : index
    %c0_29 = arith.constant 0 : index
    %47 = vector.load %arg6[%c49, %c0_29] : memref<112x8xf32, #tpu.memory_space<vmem>>, vector<2x8xf32>
    tpu.vector_store %arg6[%c49, %c0_29], %46 {strides = array<i32>} : memref<112x8xf32, #tpu.memory_space<vmem>>, vector<2x8xf32>,
    %c0_30 = arith.constant 0 : index
    %c72 = arith.constant 72 : index
    %c0_31 = arith.constant 0 : index
    %48 = vector.load %arg1[%c0_30, %c72, %c0_31] : memref<1x144x8xf32, #tpu.memory_space<vmem>>, vector<1x8x8xf32>
    %49 = vector.shape_cast %48 : vector<1x8x8xf32> to vector<8x8xf32>
    %50 = vector.broadcast %0 : vector<1x8xf32> to vector<8x8xf32>
    %51 = arith.mulf %49, %50 : vector<8x8xf32>
    %52 = vector.broadcast %1 : vector<1x8xf32> to vector<8x8xf32>
    %53 = arith.addf %51, %52 : vector<8x8xf32>
    %cst_32 = arith.constant 0.000000e+00 : f32
    %54 = vector.broadcast %cst_32 : f32 to vector<8x8xf32>
    %55 = arith.maximumf %53, %54 : vector<8x8xf32>
    %c51 = arith.constant 51 : index
    %c0_33 = arith.constant 0 : index
    %56 = vector.load %arg6[%c51, %c0_33] : memref<112x8xf32, #tpu.memory_space<vmem>>, vector<8x8xf32>
    tpu.vector_store %arg6[%c51, %c0_33], %55 {strides = array<i32>} : memref<112x8xf32, #tpu.memory_space<vmem>>, vector<8x8xf32>,
    %cst_34 = arith.constant 0.000000e+00 : f32
    %57 = vector.broadcast %cst_34 : f32 to vector<2x8xf32>
    %c59 = arith.constant 59 : index
    %c0_35 = arith.constant 0 : index
    %58 = vector.load %arg6[%c59, %c0_35] : memref<112x8xf32, #tpu.memory_space<vmem>>, vector<2x8xf32>
    tpu.vector_store %arg6[%c59, %c0_35], %57 {strides = array<i32>} : memref<112x8xf32, #tpu.memory_space<vmem>>, vector<2x8xf32>,
    %c0_36 = arith.constant 0 : index
    %c90 = arith.constant 90 : index
    %c0_37 = arith.constant 0 : index
    %59 = vector.load %arg1[%c0_36, %c90, %c0_37] : memref<1x144x8xf32, #tpu.memory_space<vmem>>, vector<1x8x8xf32>
    %60 = vector.shape_cast %59 : vector<1x8x8xf32> to vector<8x8xf32>
    %61 = vector.broadcast %0 : vector<1x8xf32> to vector<8x8xf32>
    %62 = arith.mulf %60, %61 : vector<8x8xf32>
    %63 = vector.broadcast %1 : vector<1x8xf32> to vector<8x8xf32>
    %64 = arith.addf %62, %63 : vector<8x8xf32>
    %cst_38 = arith.constant 0.000000e+00 : f32
    %65 = vector.broadcast %cst_38 : f32 to vector<8x8xf32>
    %66 = arith.maximumf %64, %65 : vector<8x8xf32>
    %c61 = arith.constant 61 : index
    %c0_39 = arith.constant 0 : index
    %67 = vector.load %arg6[%c61, %c0_39] : memref<112x8xf32, #tpu.memory_space<vmem>>, vector<8x8xf32>
    tpu.vector_store %arg6[%c61, %c0_39], %66 {strides = array<i32>} : memref<112x8xf32, #tpu.memory_space<vmem>>, vector<8x8xf32>,
    %cst_40 = arith.constant 0.000000e+00 : f32
    %68 = vector.broadcast %cst_40 : f32 to vector<2x8xf32>
    %c69 = arith.constant 69 : index
    %c0_41 = arith.constant 0 : index
    %69 = vector.load %arg6[%c69, %c0_41] : memref<112x8xf32, #tpu.memory_space<vmem>>, vector<2x8xf32>
    tpu.vector_store %arg6[%c69, %c0_41], %68 {strides = array<i32>} : memref<112x8xf32, #tpu.memory_space<vmem>>, vector<2x8xf32>,
    %c0_42 = arith.constant 0 : index
    %c108 = arith.constant 108 : index
    %c0_43 = arith.constant 0 : index
    %70 = vector.load %arg1[%c0_42, %c108, %c0_43] : memref<1x144x8xf32, #tpu.memory_space<vmem>>, vector<1x8x8xf32>
    %71 = vector.shape_cast %70 : vector<1x8x8xf32> to vector<8x8xf32>
    %72 = vector.broadcast %0 : vector<1x8xf32> to vector<8x8xf32>
    %73 = arith.mulf %71, %72 : vector<8x8xf32>
    %74 = vector.broadcast %1 : vector<1x8xf32> to vector<8x8xf32>
    %75 = arith.addf %73, %74 : vector<8x8xf32>
    %cst_44 = arith.constant 0.000000e+00 : f32
    %76 = vector.broadcast %cst_44 : f32 to vector<8x8xf32>
    %77 = arith.maximumf %75, %76 : vector<8x8xf32>
    %c71 = arith.constant 71 : index
    %c0_45 = arith.constant 0 : index
    %78 = vector.load %arg6[%c71, %c0_45] : memref<112x8xf32, #tpu.memory_space<vmem>>, vector<8x8xf32>
    tpu.vector_store %arg6[%c71, %c0_45], %77 {strides = array<i32>} : memref<112x8xf32, #tpu.memory_space<vmem>>, vector<8x8xf32>,
    %cst_46 = arith.constant 0.000000e+00 : f32
    %79 = vector.broadcast %cst_46 : f32 to vector<2x8xf32>
    %c79 = arith.constant 79 : index
    %c0_47 = arith.constant 0 : index
    %80 = vector.load %arg6[%c79, %c0_47] : memref<112x8xf32, #tpu.memory_space<vmem>>, vector<2x8xf32>
    tpu.vector_store %arg6[%c79, %c0_47], %79 {strides = array<i32>} : memref<112x8xf32, #tpu.memory_space<vmem>>, vector<2x8xf32>,
    %c0_48 = arith.constant 0 : index
    %c126 = arith.constant 126 : index
    %c0_49 = arith.constant 0 : index
    %81 = vector.load %arg1[%c0_48, %c126, %c0_49] : memref<1x144x8xf32, #tpu.memory_space<vmem>>, vector<1x8x8xf32>
    %82 = vector.shape_cast %81 : vector<1x8x8xf32> to vector<8x8xf32>
    %83 = vector.broadcast %0 : vector<1x8xf32> to vector<8x8xf32>
    %84 = arith.mulf %82, %83 : vector<8x8xf32>
    %85 = vector.broadcast %1 : vector<1x8xf32> to vector<8x8xf32>
    %86 = arith.addf %84, %85 : vector<8x8xf32>
    %cst_50 = arith.constant 0.000000e+00 : f32
    %87 = vector.broadcast %cst_50 : f32 to vector<8x8xf32>
    %88 = arith.maximumf %86, %87 : vector<8x8xf32>
    %c81 = arith.constant 81 : index
    %c0_51 = arith.constant 0 : index
    %89 = vector.load %arg6[%c81, %c0_51] : memref<112x8xf32, #tpu.memory_space<vmem>>, vector<8x8xf32>
    tpu.vector_store %arg6[%c81, %c0_51], %88 {strides = array<i32>} : memref<112x8xf32, #tpu.memory_space<vmem>>, vector<8x8xf32>,
    %cst_52 = arith.constant 0.000000e+00 : f32
    %90 = vector.broadcast %cst_52 : f32 to vector<2x8xf32>
    %c89 = arith.constant 89 : index
    %c0_53 = arith.constant 0 : index
    %91 = vector.load %arg6[%c89, %c0_53] : memref<112x8xf32, #tpu.memory_space<vmem>>, vector<2x8xf32>
    tpu.vector_store %arg6[%c89, %c0_53], %90 {strides = array<i32>} : memref<112x8xf32, #tpu.memory_space<vmem>>, vector<2x8xf32>,
    %cst_54 = arith.constant 0.000000e+00 : f32
    %92 = vector.broadcast %cst_54 : f32 to vector<21x8xf32>
    %c91 = arith.constant 91 : index
    %c0_55 = arith.constant 0 : index
    %93 = vector.load %arg6[%c91, %c0_55] : memref<112x8xf32, #tpu.memory_space<vmem>>, vector<21x8xf32>
    tpu.vector_store %arg6[%c91, %c0_55], %92 {strides = array<i32>} : memref<112x8xf32, #tpu.memory_space<vmem>>, vector<21x8xf32>,
    %c0_56 = arith.constant 0 : index
    %c0_57 = arith.constant 0 : index
    %94 = vector.load %arg6[%c0_56, %c0_57] : memref<112x8xf32, #tpu.memory_space<vmem>>, vector<104x8xf32>
    %c0_58 = arith.constant 0 : index
    %c0_59 = arith.constant 0 : index
    %95 = vector.load %arg7[%c0_58, %c0_59] : memref<104x24xf32, #tpu.memory_space<vmem>>, vector<104x8xf32>
    tpu.vector_store %arg7[%c0_58, %c0_59], %94 {strides = array<i32>} : memref<104x24xf32, #tpu.memory_space<vmem>>, vector<104x8xf32>,
    %c1 = arith.constant 1 : index
    %c0_60 = arith.constant 0 : index
    %96 = vector.load %arg6[%c1, %c0_60] : memref<112x8xf32, #tpu.memory_space<vmem>>, vector<104x8xf32>
    %c0_61 = arith.constant 0 : index
    %c8 = arith.constant 8 : index
    %97 = vector.load %arg7[%c0_61, %c8] : memref<104x24xf32, #tpu.memory_space<vmem>>, vector<104x8xf32>
    tpu.vector_store %arg7[%c0_61, %c8], %96 {strides = array<i32>} : memref<104x24xf32, #tpu.memory_space<vmem>>, vector<104x8xf32>,
    %c2 = arith.constant 2 : index
    %c0_62 = arith.constant 0 : index
    %98 = vector.load %arg6[%c2, %c0_62] : memref<112x8xf32, #tpu.memory_space<vmem>>, vector<104x8xf32>
    %c0_63 = arith.constant 0 : index
    %c16 = arith.constant 16 : index
    %99 = vector.load %arg7[%c0_63, %c16] : memref<104x24xf32, #tpu.memory_space<vmem>>, vector<104x8xf32>
    tpu.vector_store %arg7[%c0_63, %c16], %98 {strides = array<i32>} : memref<104x24xf32, #tpu.memory_space<vmem>>, vector<104x8xf32>,
    %c0_64 = arith.constant 0 : index
    %c0_65 = arith.constant 0 : index
    %100 = vector.load %arg7[%c0_64, %c0_65] : memref<104x24xf32, #tpu.memory_space<vmem>>, vector<80x24xf32>
    %101 = arith.truncf %100 : vector<80x24xf32> to vector<80x24xbf16>
    %c0_66 = arith.constant 0 : index
    %c0_67 = arith.constant 0 : index
    %c0_68 = arith.constant 0 : index
    %102 = vector.load %arg4[%c0_66, %c0_67, %c0_68] : memref<3x24x8xbf16, #tpu.memory_space<vmem>>, vector<1x24x8xbf16>
    %103 = vector.shape_cast %102 : vector<1x24x8xbf16> to vector<24x8xbf16>
    %cst_69 = arith.constant dense<0.000000e+00> : vector<80x8xf32>
    %104 = tpu.matmul %101, %103, %cst_69 {dimension_numbers = #tpu.dot_dimension_numbers<[1], [0], [0], [1], [0, 0, 1, 1], [], []>} : vector<80x24xbf16>, vector<24x8xbf16>, vector<80x8xf32> -> vector<80x8xf32>
    %c0_70 = arith.constant 0 : index
    %c0_71 = arith.constant 0 : index
    %105 = vector.load %arg8[%c0_70, %c0_71] : memref<80x8xf32, #tpu.memory_space<vmem>>, vector<80x8xf32>
    tpu.vector_store %arg8[%c0_70, %c0_71], %104 {strides = array<i32>} : memref<80x8xf32, #tpu.memory_space<vmem>>, vector<80x8xf32>,
    %c10 = arith.constant 10 : index
    %c0_72 = arith.constant 0 : index
    %106 = vector.load %arg7[%c10, %c0_72] : memref<104x24xf32, #tpu.memory_space<vmem>>, vector<80x24xf32>
    %107 = arith.truncf %106 : vector<80x24xf32> to vector<80x24xbf16>
    %c1_73 = arith.constant 1 : index
    %c0_74 = arith.constant 0 : index
    %c0_75 = arith.constant 0 : index
    %108 = vector.load %arg4[%c1_73, %c0_74, %c0_75] : memref<3x24x8xbf16, #tpu.memory_space<vmem>>, vector<1x24x8xbf16>
    %109 = vector.shape_cast %108 : vector<1x24x8xbf16> to vector<24x8xbf16>
    %cst_76 = arith.constant dense<0.000000e+00> : vector<80x8xf32>
    %110 = tpu.matmul %107, %109, %cst_76 {dimension_numbers = #tpu.dot_dimension_numbers<[1], [0], [0], [1], [0, 0, 1, 1], [], []>} : vector<80x24xbf16>, vector<24x8xbf16>, vector<80x8xf32> -> vector<80x8xf32>
    %c0_77 = arith.constant 0 : index
    %c0_78 = arith.constant 0 : index
    %111 = vector.load %arg8[%c0_77, %c0_78] : memref<80x8xf32, #tpu.memory_space<vmem>>, vector<80x8xf32>
    %112 = arith.addf %111, %110 : vector<80x8xf32>
    %c0_79 = arith.constant 0 : index
    %c0_80 = arith.constant 0 : index
    %113 = vector.load %arg8[%c0_79, %c0_80] : memref<80x8xf32, #tpu.memory_space<vmem>>, vector<80x8xf32>
    tpu.vector_store %arg8[%c0_79, %c0_80], %112 {strides = array<i32>} : memref<80x8xf32, #tpu.memory_space<vmem>>, vector<80x8xf32>,
    %c20 = arith.constant 20 : index
    %c0_81 = arith.constant 0 : index
    %114 = vector.load %arg7[%c20, %c0_81] : memref<104x24xf32, #tpu.memory_space<vmem>>, vector<80x24xf32>
    %115 = arith.truncf %114 : vector<80x24xf32> to vector<80x24xbf16>
    %c2_82 = arith.constant 2 : index
    %c0_83 = arith.constant 0 : index
    %c0_84 = arith.constant 0 : index
    %116 = vector.load %arg4[%c2_82, %c0_83, %c0_84] : memref<3x24x8xbf16, #tpu.memory_space<vmem>>, vector<1x24x8xbf16>
    %117 = vector.shape_cast %116 : vector<1x24x8xbf16> to vector<24x8xbf16>
    %cst_85 = arith.constant dense<0.000000e+00> : vector<80x8xf32>
    %118 = tpu.matmul %115, %117, %cst_85 {dimension_numbers = #tpu.dot_dimension_numbers<[1], [0], [0], [1], [0, 0, 1, 1], [], []>} : vector<80x24xbf16>, vector<24x8xbf16>, vector<80x8xf32> -> vector<80x8xf32>
    %c0_86 = arith.constant 0 : index
    %c0_87 = arith.constant 0 : index
    %119 = vector.load %arg8[%c0_86, %c0_87] : memref<80x8xf32, #tpu.memory_space<vmem>>, vector<80x8xf32>
    %120 = arith.addf %119, %118 : vector<80x8xf32>
    %c0_88 = arith.constant 0 : index
    %c0_89 = arith.constant 0 : index
    %121 = vector.load %arg8[%c0_88, %c0_89] : memref<80x8xf32, #tpu.memory_space<vmem>>, vector<80x8xf32>
    tpu.vector_store %arg8[%c0_88, %c0_89], %120 {strides = array<i32>} : memref<80x8xf32, #tpu.memory_space<vmem>>, vector<80x8xf32>,
    %c0_90 = arith.constant 0 : index
    %c0_91 = arith.constant 0 : index
    %122 = vector.load %arg8[%c0_90, %c0_91] : memref<80x8xf32, #tpu.memory_space<vmem>>, vector<80x8xf32>
    %c0_92 = arith.constant 0 : index
    %c0_93 = arith.constant 0 : index
    %c0_94 = arith.constant 0 : index
    %123 = vector.load %arg5[%c0_92, %c0_93, %c0_94] : memref<1x80x8xf32, #tpu.memory_space<vmem>>, vector<1x80x8xf32>
    %124 = vector.shape_cast %123 : vector<1x80x8xf32> to vector<80x8xf32>
    %125 = vector.shape_cast %122 : vector<80x8xf32> to vector<1x80x8xf32>
    tpu.vector_store %arg5[%c0_92, %c0_93, %c0_94], %125 {strides = array<i32>} : memref<1x80x8xf32, #tpu.memory_space<vmem>>, vector<1x80x8xf32>,
    return
  }
  func.func @transform_0(%arg0: i32) -> (i32, i32, i32) {
    %c0_i32 = arith.constant 0 : i32
    %c0_i32_0 = arith.constant 0 : i32
    %c0_i32_1 = arith.constant 0 : i32
    return %arg0, %c0_i32, %c0_i32_0 : i32, i32, i32
  }
  func.func @transform_1(%arg0: i32) -> (i32, i32) {
    %c0_i32 = arith.constant 0 : i32
    %c0_i32_0 = arith.constant 0 : i32
    %c0_i32_1 = arith.constant 0 : i32
    return %c0_i32, %c0_i32_0 : i32, i32
  }
  func.func @transform_2(%arg0: i32) -> (i32, i32) {
    %c0_i32 = arith.constant 0 : i32
    %c0_i32_0 = arith.constant 0 : i32
    %c0_i32_1 = arith.constant 0 : i32
    return %c0_i32, %c0_i32_0 : i32, i32
  }
  func.func @transform_3(%arg0: i32) -> (i32, i32, i32) {
    %c0_i32 = arith.constant 0 : i32
    %c0_i32_0 = arith.constant 0 : i32
    %c0_i32_1 = arith.constant 0 : i32
    %c0_i32_2 = arith.constant 0 : i32
    return %c0_i32, %c0_i32_0, %c0_i32_1 : i32, i32, i32
  }
  func.func @transform_4(%arg0: i32) -> (i32, i32, i32) {
    %c0_i32 = arith.constant 0 : i32
    %c0_i32_0 = arith.constant 0 : i32
    %c0_i32_1 = arith.constant 0 : i32
    return %arg0, %c0_i32, %c0_i32_0 : i32, i32, i32
  }
}

module attributes {stable_mosaic.version = 11 : i64} {
  func.func @kernel(%arg0: i32, %arg1: memref<1x256x4xf32, #tpu.memory_space<vmem>>, %arg2: memref<144x1xf32, #tpu.memory_space<vmem>>, %arg3: memref<1x4xf32, #tpu.memory_space<vmem>>, %arg4: memref<1x4xf32, #tpu.memory_space<vmem>>, %arg5: memref<3x12x8xbf16, #tpu.memory_space<vmem>>, %arg6: memref<4x8xbf16, #tpu.memory_space<vmem>>, %arg7: memref<1x144x8xf32, #tpu.memory_space<vmem>>, %arg8: memref<1x2x8xf32, #tpu.memory_space<vmem>>, %arg9: memref<1x144x8xf32, #tpu.memory_space<vmem>>, %arg10: memref<336x4xf32, #tpu.memory_space<vmem>>, %arg11: memref<328x12xf32, #tpu.memory_space<vmem>>, %arg12: memref<144x8xf32, #tpu.memory_space<vmem>>) attributes {dimension_semantics = [#tpu.dimension_semantics<parallel>], iteration_bounds = array<i64: 2>, scalar_prefetch = 0 : i64, scratch_operands = 3 : i64, tpu.core_type = #tpu.core_type<tc>, window_params = [{transform_indices = @transform_0, window_bounds = array<i64: 1, 256, 4>}, {pipeline_mode = #tpu.pipeline_mode<synchronous>, transform_indices = @transform_1, window_bounds = array<i64: 144, 1>}, {pipeline_mode = #tpu.pipeline_mode<synchronous>, transform_indices = @transform_2, window_bounds = array<i64: 1, 4>}, {pipeline_mode = #tpu.pipeline_mode<synchronous>, transform_indices = @transform_3, window_bounds = array<i64: 1, 4>}, {pipeline_mode = #tpu.pipeline_mode<synchronous>, transform_indices = @transform_4, window_bounds = array<i64: 3, 12, 8>}, {pipeline_mode = #tpu.pipeline_mode<synchronous>, transform_indices = @transform_5, window_bounds = array<i64: 4, 8>}, {transform_indices = @transform_6, window_bounds = array<i64: 1, 144, 8>}, {transform_indices = @transform_7, window_bounds = array<i64: 1, 2, 8>}, {transform_indices = @transform_8, window_bounds = array<i64: 1, 144, 8>}]} {
    %c0 = arith.constant 0 : index
    %c0_0 = arith.constant 0 : index
    %0 = vector.load %arg3[%c0, %c0_0] : memref<1x4xf32, #tpu.memory_space<vmem>>, vector<1x4xf32>
    %c0_1 = arith.constant 0 : index
    %c0_2 = arith.constant 0 : index
    %1 = vector.load %arg4[%c0_1, %c0_2] : memref<1x4xf32, #tpu.memory_space<vmem>>, vector<1x4xf32>
    %cst = arith.constant 0.000000e+00 : f32
    %2 = vector.broadcast %cst : f32 to vector<19x4xf32>
    %c0_3 = arith.constant 0 : index
    %c0_4 = arith.constant 0 : index
    %3 = vector.load %arg10[%c0_3, %c0_4] : memref<336x4xf32, #tpu.memory_space<vmem>>, vector<19x4xf32>
    tpu.vector_store %arg10[%c0_3, %c0_4], %2 {strides = array<i32>} : memref<336x4xf32, #tpu.memory_space<vmem>>, vector<19x4xf32>,
    %c0_5 = arith.constant 0 : index
    %c0_6 = arith.constant 0 : index
    %c0_7 = arith.constant 0 : index
    %4 = vector.load %arg1[%c0_5, %c0_6, %c0_7] : memref<1x256x4xf32, #tpu.memory_space<vmem>>, vector<1x16x4xf32>
    %5 = vector.shape_cast %4 : vector<1x16x4xf32> to vector<16x4xf32>
    %6 = vector.broadcast %0 : vector<1x4xf32> to vector<16x4xf32>
    %7 = arith.mulf %5, %6 : vector<16x4xf32>
    %8 = vector.broadcast %1 : vector<1x4xf32> to vector<16x4xf32>
    %9 = arith.addf %7, %8 : vector<16x4xf32>
    %cst_8 = arith.constant 0.000000e+00 : f32
    %10 = vector.broadcast %cst_8 : f32 to vector<16x4xf32>
    %11 = arith.maximumf %9, %10 : vector<16x4xf32>
    %c19 = arith.constant 19 : index
    %c0_9 = arith.constant 0 : index
    %12 = vector.load %arg10[%c19, %c0_9] : memref<336x4xf32, #tpu.memory_space<vmem>>, vector<16x4xf32>
    tpu.vector_store %arg10[%c19, %c0_9], %11 {strides = array<i32>} : memref<336x4xf32, #tpu.memory_space<vmem>>, vector<16x4xf32>,
    %cst_10 = arith.constant 0.000000e+00 : f32
    %13 = vector.broadcast %cst_10 : f32 to vector<2x4xf32>
    %c35 = arith.constant 35 : index
    %c0_11 = arith.constant 0 : index
    %14 = vector.load %arg10[%c35, %c0_11] : memref<336x4xf32, #tpu.memory_space<vmem>>, vector<2x4xf32>
    tpu.vector_store %arg10[%c35, %c0_11], %13 {strides = array<i32>} : memref<336x4xf32, #tpu.memory_space<vmem>>, vector<2x4xf32>,
    %c0_12 = arith.constant 0 : index
    %c16 = arith.constant 16 : index
    %c0_13 = arith.constant 0 : index
    %15 = vector.load %arg1[%c0_12, %c16, %c0_13] : memref<1x256x4xf32, #tpu.memory_space<vmem>>, vector<1x16x4xf32>
    %16 = vector.shape_cast %15 : vector<1x16x4xf32> to vector<16x4xf32>
    %17 = vector.broadcast %0 : vector<1x4xf32> to vector<16x4xf32>
    %18 = arith.mulf %16, %17 : vector<16x4xf32>
    %19 = vector.broadcast %1 : vector<1x4xf32> to vector<16x4xf32>
    %20 = arith.addf %18, %19 : vector<16x4xf32>
    %cst_14 = arith.constant 0.000000e+00 : f32
    %21 = vector.broadcast %cst_14 : f32 to vector<16x4xf32>
    %22 = arith.maximumf %20, %21 : vector<16x4xf32>
    %c37 = arith.constant 37 : index
    %c0_15 = arith.constant 0 : index
    %23 = vector.load %arg10[%c37, %c0_15] : memref<336x4xf32, #tpu.memory_space<vmem>>, vector<16x4xf32>
    tpu.vector_store %arg10[%c37, %c0_15], %22 {strides = array<i32>} : memref<336x4xf32, #tpu.memory_space<vmem>>, vector<16x4xf32>,
    %cst_16 = arith.constant 0.000000e+00 : f32
    %24 = vector.broadcast %cst_16 : f32 to vector<2x4xf32>
    %c53 = arith.constant 53 : index
    %c0_17 = arith.constant 0 : index
    %25 = vector.load %arg10[%c53, %c0_17] : memref<336x4xf32, #tpu.memory_space<vmem>>, vector<2x4xf32>
    tpu.vector_store %arg10[%c53, %c0_17], %24 {strides = array<i32>} : memref<336x4xf32, #tpu.memory_space<vmem>>, vector<2x4xf32>,
    %c0_18 = arith.constant 0 : index
    %c32 = arith.constant 32 : index
    %c0_19 = arith.constant 0 : index
    %26 = vector.load %arg1[%c0_18, %c32, %c0_19] : memref<1x256x4xf32, #tpu.memory_space<vmem>>, vector<1x16x4xf32>
    %27 = vector.shape_cast %26 : vector<1x16x4xf32> to vector<16x4xf32>
    %28 = vector.broadcast %0 : vector<1x4xf32> to vector<16x4xf32>
    %29 = arith.mulf %27, %28 : vector<16x4xf32>
    %30 = vector.broadcast %1 : vector<1x4xf32> to vector<16x4xf32>
    %31 = arith.addf %29, %30 : vector<16x4xf32>
    %cst_20 = arith.constant 0.000000e+00 : f32
    %32 = vector.broadcast %cst_20 : f32 to vector<16x4xf32>
    %33 = arith.maximumf %31, %32 : vector<16x4xf32>
    %c55 = arith.constant 55 : index
    %c0_21 = arith.constant 0 : index
    %34 = vector.load %arg10[%c55, %c0_21] : memref<336x4xf32, #tpu.memory_space<vmem>>, vector<16x4xf32>
    tpu.vector_store %arg10[%c55, %c0_21], %33 {strides = array<i32>} : memref<336x4xf32, #tpu.memory_space<vmem>>, vector<16x4xf32>,
    %cst_22 = arith.constant 0.000000e+00 : f32
    %35 = vector.broadcast %cst_22 : f32 to vector<2x4xf32>
    %c71 = arith.constant 71 : index
    %c0_23 = arith.constant 0 : index
    %36 = vector.load %arg10[%c71, %c0_23] : memref<336x4xf32, #tpu.memory_space<vmem>>, vector<2x4xf32>
    tpu.vector_store %arg10[%c71, %c0_23], %35 {strides = array<i32>} : memref<336x4xf32, #tpu.memory_space<vmem>>, vector<2x4xf32>,
    %c0_24 = arith.constant 0 : index
    %c48 = arith.constant 48 : index
    %c0_25 = arith.constant 0 : index
    %37 = vector.load %arg1[%c0_24, %c48, %c0_25] : memref<1x256x4xf32, #tpu.memory_space<vmem>>, vector<1x16x4xf32>
    %38 = vector.shape_cast %37 : vector<1x16x4xf32> to vector<16x4xf32>
    %39 = vector.broadcast %0 : vector<1x4xf32> to vector<16x4xf32>
    %40 = arith.mulf %38, %39 : vector<16x4xf32>
    %41 = vector.broadcast %1 : vector<1x4xf32> to vector<16x4xf32>
    %42 = arith.addf %40, %41 : vector<16x4xf32>
    %cst_26 = arith.constant 0.000000e+00 : f32
    %43 = vector.broadcast %cst_26 : f32 to vector<16x4xf32>
    %44 = arith.maximumf %42, %43 : vector<16x4xf32>
    %c73 = arith.constant 73 : index
    %c0_27 = arith.constant 0 : index
    %45 = vector.load %arg10[%c73, %c0_27] : memref<336x4xf32, #tpu.memory_space<vmem>>, vector<16x4xf32>
    tpu.vector_store %arg10[%c73, %c0_27], %44 {strides = array<i32>} : memref<336x4xf32, #tpu.memory_space<vmem>>, vector<16x4xf32>,
    %cst_28 = arith.constant 0.000000e+00 : f32
    %46 = vector.broadcast %cst_28 : f32 to vector<2x4xf32>
    %c89 = arith.constant 89 : index
    %c0_29 = arith.constant 0 : index
    %47 = vector.load %arg10[%c89, %c0_29] : memref<336x4xf32, #tpu.memory_space<vmem>>, vector<2x4xf32>
    tpu.vector_store %arg10[%c89, %c0_29], %46 {strides = array<i32>} : memref<336x4xf32, #tpu.memory_space<vmem>>, vector<2x4xf32>,
    %c0_30 = arith.constant 0 : index
    %c64 = arith.constant 64 : index
    %c0_31 = arith.constant 0 : index
    %48 = vector.load %arg1[%c0_30, %c64, %c0_31] : memref<1x256x4xf32, #tpu.memory_space<vmem>>, vector<1x16x4xf32>
    %49 = vector.shape_cast %48 : vector<1x16x4xf32> to vector<16x4xf32>
    %50 = vector.broadcast %0 : vector<1x4xf32> to vector<16x4xf32>
    %51 = arith.mulf %49, %50 : vector<16x4xf32>
    %52 = vector.broadcast %1 : vector<1x4xf32> to vector<16x4xf32>
    %53 = arith.addf %51, %52 : vector<16x4xf32>
    %cst_32 = arith.constant 0.000000e+00 : f32
    %54 = vector.broadcast %cst_32 : f32 to vector<16x4xf32>
    %55 = arith.maximumf %53, %54 : vector<16x4xf32>
    %c91 = arith.constant 91 : index
    %c0_33 = arith.constant 0 : index
    %56 = vector.load %arg10[%c91, %c0_33] : memref<336x4xf32, #tpu.memory_space<vmem>>, vector<16x4xf32>
    tpu.vector_store %arg10[%c91, %c0_33], %55 {strides = array<i32>} : memref<336x4xf32, #tpu.memory_space<vmem>>, vector<16x4xf32>,
    %cst_34 = arith.constant 0.000000e+00 : f32
    %57 = vector.broadcast %cst_34 : f32 to vector<2x4xf32>
    %c107 = arith.constant 107 : index
    %c0_35 = arith.constant 0 : index
    %58 = vector.load %arg10[%c107, %c0_35] : memref<336x4xf32, #tpu.memory_space<vmem>>, vector<2x4xf32>
    tpu.vector_store %arg10[%c107, %c0_35], %57 {strides = array<i32>} : memref<336x4xf32, #tpu.memory_space<vmem>>, vector<2x4xf32>,
    %c0_36 = arith.constant 0 : index
    %c80 = arith.constant 80 : index
    %c0_37 = arith.constant 0 : index
    %59 = vector.load %arg1[%c0_36, %c80, %c0_37] : memref<1x256x4xf32, #tpu.memory_space<vmem>>, vector<1x16x4xf32>
    %60 = vector.shape_cast %59 : vector<1x16x4xf32> to vector<16x4xf32>
    %61 = vector.broadcast %0 : vector<1x4xf32> to vector<16x4xf32>
    %62 = arith.mulf %60, %61 : vector<16x4xf32>
    %63 = vector.broadcast %1 : vector<1x4xf32> to vector<16x4xf32>
    %64 = arith.addf %62, %63 : vector<16x4xf32>
    %cst_38 = arith.constant 0.000000e+00 : f32
    %65 = vector.broadcast %cst_38 : f32 to vector<16x4xf32>
    %66 = arith.maximumf %64, %65 : vector<16x4xf32>
    %c109 = arith.constant 109 : index
    %c0_39 = arith.constant 0 : index
    %67 = vector.load %arg10[%c109, %c0_39] : memref<336x4xf32, #tpu.memory_space<vmem>>, vector<16x4xf32>
    tpu.vector_store %arg10[%c109, %c0_39], %66 {strides = array<i32>} : memref<336x4xf32, #tpu.memory_space<vmem>>, vector<16x4xf32>,
    %cst_40 = arith.constant 0.000000e+00 : f32
    %68 = vector.broadcast %cst_40 : f32 to vector<2x4xf32>
    %c125 = arith.constant 125 : index
    %c0_41 = arith.constant 0 : index
    %69 = vector.load %arg10[%c125, %c0_41] : memref<336x4xf32, #tpu.memory_space<vmem>>, vector<2x4xf32>
    tpu.vector_store %arg10[%c125, %c0_41], %68 {strides = array<i32>} : memref<336x4xf32, #tpu.memory_space<vmem>>, vector<2x4xf32>,
    %c0_42 = arith.constant 0 : index
    %c96 = arith.constant 96 : index
    %c0_43 = arith.constant 0 : index
    %70 = vector.load %arg1[%c0_42, %c96, %c0_43] : memref<1x256x4xf32, #tpu.memory_space<vmem>>, vector<1x16x4xf32>
    %71 = vector.shape_cast %70 : vector<1x16x4xf32> to vector<16x4xf32>
    %72 = vector.broadcast %0 : vector<1x4xf32> to vector<16x4xf32>
    %73 = arith.mulf %71, %72 : vector<16x4xf32>
    %74 = vector.broadcast %1 : vector<1x4xf32> to vector<16x4xf32>
    %75 = arith.addf %73, %74 : vector<16x4xf32>
    %cst_44 = arith.constant 0.000000e+00 : f32
    %76 = vector.broadcast %cst_44 : f32 to vector<16x4xf32>
    %77 = arith.maximumf %75, %76 : vector<16x4xf32>
    %c127 = arith.constant 127 : index
    %c0_45 = arith.constant 0 : index
    %78 = vector.load %arg10[%c127, %c0_45] : memref<336x4xf32, #tpu.memory_space<vmem>>, vector<16x4xf32>
    tpu.vector_store %arg10[%c127, %c0_45], %77 {strides = array<i32>} : memref<336x4xf32, #tpu.memory_space<vmem>>, vector<16x4xf32>,
    %cst_46 = arith.constant 0.000000e+00 : f32
    %79 = vector.broadcast %cst_46 : f32 to vector<2x4xf32>
    %c143 = arith.constant 143 : index
    %c0_47 = arith.constant 0 : index
    %80 = vector.load %arg10[%c143, %c0_47] : memref<336x4xf32, #tpu.memory_space<vmem>>, vector<2x4xf32>
    tpu.vector_store %arg10[%c143, %c0_47], %79 {strides = array<i32>} : memref<336x4xf32, #tpu.memory_space<vmem>>, vector<2x4xf32>,
    %c0_48 = arith.constant 0 : index
    %c112 = arith.constant 112 : index
    %c0_49 = arith.constant 0 : index
    %81 = vector.load %arg1[%c0_48, %c112, %c0_49] : memref<1x256x4xf32, #tpu.memory_space<vmem>>, vector<1x16x4xf32>
    %82 = vector.shape_cast %81 : vector<1x16x4xf32> to vector<16x4xf32>
    %83 = vector.broadcast %0 : vector<1x4xf32> to vector<16x4xf32>
    %84 = arith.mulf %82, %83 : vector<16x4xf32>
    %85 = vector.broadcast %1 : vector<1x4xf32> to vector<16x4xf32>
    %86 = arith.addf %84, %85 : vector<16x4xf32>
    %cst_50 = arith.constant 0.000000e+00 : f32
    %87 = vector.broadcast %cst_50 : f32 to vector<16x4xf32>
    %88 = arith.maximumf %86, %87 : vector<16x4xf32>
    %c145 = arith.constant 145 : index
    %c0_51 = arith.constant 0 : index
    %89 = vector.load %arg10[%c145, %c0_51] : memref<336x4xf32, #tpu.memory_space<vmem>>, vector<16x4xf32>
    tpu.vector_store %arg10[%c145, %c0_51], %88 {strides = array<i32>} : memref<336x4xf32, #tpu.memory_space<vmem>>, vector<16x4xf32>,
    %cst_52 = arith.constant 0.000000e+00 : f32
    %90 = vector.broadcast %cst_52 : f32 to vector<2x4xf32>
    %c161 = arith.constant 161 : index
    %c0_53 = arith.constant 0 : index
    %91 = vector.load %arg10[%c161, %c0_53] : memref<336x4xf32, #tpu.memory_space<vmem>>, vector<2x4xf32>
    tpu.vector_store %arg10[%c161, %c0_53], %90 {strides = array<i32>} : memref<336x4xf32, #tpu.memory_space<vmem>>, vector<2x4xf32>,
    %c0_54 = arith.constant 0 : index
    %c128 = arith.constant 128 : index
    %c0_55 = arith.constant 0 : index
    %92 = vector.load %arg1[%c0_54, %c128, %c0_55] : memref<1x256x4xf32, #tpu.memory_space<vmem>>, vector<1x16x4xf32>
    %93 = vector.shape_cast %92 : vector<1x16x4xf32> to vector<16x4xf32>
    %94 = vector.broadcast %0 : vector<1x4xf32> to vector<16x4xf32>
    %95 = arith.mulf %93, %94 : vector<16x4xf32>
    %96 = vector.broadcast %1 : vector<1x4xf32> to vector<16x4xf32>
    %97 = arith.addf %95, %96 : vector<16x4xf32>
    %cst_56 = arith.constant 0.000000e+00 : f32
    %98 = vector.broadcast %cst_56 : f32 to vector<16x4xf32>
    %99 = arith.maximumf %97, %98 : vector<16x4xf32>
    %c163 = arith.constant 163 : index
    %c0_57 = arith.constant 0 : index
    %100 = vector.load %arg10[%c163, %c0_57] : memref<336x4xf32, #tpu.memory_space<vmem>>, vector<16x4xf32>
    tpu.vector_store %arg10[%c163, %c0_57], %99 {strides = array<i32>} : memref<336x4xf32, #tpu.memory_space<vmem>>, vector<16x4xf32>,
    %cst_58 = arith.constant 0.000000e+00 : f32
    %101 = vector.broadcast %cst_58 : f32 to vector<2x4xf32>
    %c179 = arith.constant 179 : index
    %c0_59 = arith.constant 0 : index
    %102 = vector.load %arg10[%c179, %c0_59] : memref<336x4xf32, #tpu.memory_space<vmem>>, vector<2x4xf32>
    tpu.vector_store %arg10[%c179, %c0_59], %101 {strides = array<i32>} : memref<336x4xf32, #tpu.memory_space<vmem>>, vector<2x4xf32>,
    %c0_60 = arith.constant 0 : index
    %c144 = arith.constant 144 : index
    %c0_61 = arith.constant 0 : index
    %103 = vector.load %arg1[%c0_60, %c144, %c0_61] : memref<1x256x4xf32, #tpu.memory_space<vmem>>, vector<1x16x4xf32>
    %104 = vector.shape_cast %103 : vector<1x16x4xf32> to vector<16x4xf32>
    %105 = vector.broadcast %0 : vector<1x4xf32> to vector<16x4xf32>
    %106 = arith.mulf %104, %105 : vector<16x4xf32>
    %107 = vector.broadcast %1 : vector<1x4xf32> to vector<16x4xf32>
    %108 = arith.addf %106, %107 : vector<16x4xf32>
    %cst_62 = arith.constant 0.000000e+00 : f32
    %109 = vector.broadcast %cst_62 : f32 to vector<16x4xf32>
    %110 = arith.maximumf %108, %109 : vector<16x4xf32>
    %c181 = arith.constant 181 : index
    %c0_63 = arith.constant 0 : index
    %111 = vector.load %arg10[%c181, %c0_63] : memref<336x4xf32, #tpu.memory_space<vmem>>, vector<16x4xf32>
    tpu.vector_store %arg10[%c181, %c0_63], %110 {strides = array<i32>} : memref<336x4xf32, #tpu.memory_space<vmem>>, vector<16x4xf32>,
    %cst_64 = arith.constant 0.000000e+00 : f32
    %112 = vector.broadcast %cst_64 : f32 to vector<2x4xf32>
    %c197 = arith.constant 197 : index
    %c0_65 = arith.constant 0 : index
    %113 = vector.load %arg10[%c197, %c0_65] : memref<336x4xf32, #tpu.memory_space<vmem>>, vector<2x4xf32>
    tpu.vector_store %arg10[%c197, %c0_65], %112 {strides = array<i32>} : memref<336x4xf32, #tpu.memory_space<vmem>>, vector<2x4xf32>,
    %c0_66 = arith.constant 0 : index
    %c160 = arith.constant 160 : index
    %c0_67 = arith.constant 0 : index
    %114 = vector.load %arg1[%c0_66, %c160, %c0_67] : memref<1x256x4xf32, #tpu.memory_space<vmem>>, vector<1x16x4xf32>
    %115 = vector.shape_cast %114 : vector<1x16x4xf32> to vector<16x4xf32>
    %116 = vector.broadcast %0 : vector<1x4xf32> to vector<16x4xf32>
    %117 = arith.mulf %115, %116 : vector<16x4xf32>
    %118 = vector.broadcast %1 : vector<1x4xf32> to vector<16x4xf32>
    %119 = arith.addf %117, %118 : vector<16x4xf32>
    %cst_68 = arith.constant 0.000000e+00 : f32
    %120 = vector.broadcast %cst_68 : f32 to vector<16x4xf32>
    %121 = arith.maximumf %119, %120 : vector<16x4xf32>
    %c199 = arith.constant 199 : index
    %c0_69 = arith.constant 0 : index
    %122 = vector.load %arg10[%c199, %c0_69] : memref<336x4xf32, #tpu.memory_space<vmem>>, vector<16x4xf32>
    tpu.vector_store %arg10[%c199, %c0_69], %121 {strides = array<i32>} : memref<336x4xf32, #tpu.memory_space<vmem>>, vector<16x4xf32>,
    %cst_70 = arith.constant 0.000000e+00 : f32
    %123 = vector.broadcast %cst_70 : f32 to vector<2x4xf32>
    %c215 = arith.constant 215 : index
    %c0_71 = arith.constant 0 : index
    %124 = vector.load %arg10[%c215, %c0_71] : memref<336x4xf32, #tpu.memory_space<vmem>>, vector<2x4xf32>
    tpu.vector_store %arg10[%c215, %c0_71], %123 {strides = array<i32>} : memref<336x4xf32, #tpu.memory_space<vmem>>, vector<2x4xf32>,
    %c0_72 = arith.constant 0 : index
    %c176 = arith.constant 176 : index
    %c0_73 = arith.constant 0 : index
    %125 = vector.load %arg1[%c0_72, %c176, %c0_73] : memref<1x256x4xf32, #tpu.memory_space<vmem>>, vector<1x16x4xf32>
    %126 = vector.shape_cast %125 : vector<1x16x4xf32> to vector<16x4xf32>
    %127 = vector.broadcast %0 : vector<1x4xf32> to vector<16x4xf32>
    %128 = arith.mulf %126, %127 : vector<16x4xf32>
    %129 = vector.broadcast %1 : vector<1x4xf32> to vector<16x4xf32>
    %130 = arith.addf %128, %129 : vector<16x4xf32>
    %cst_74 = arith.constant 0.000000e+00 : f32
    %131 = vector.broadcast %cst_74 : f32 to vector<16x4xf32>
    %132 = arith.maximumf %130, %131 : vector<16x4xf32>
    %c217 = arith.constant 217 : index
    %c0_75 = arith.constant 0 : index
    %133 = vector.load %arg10[%c217, %c0_75] : memref<336x4xf32, #tpu.memory_space<vmem>>, vector<16x4xf32>
    tpu.vector_store %arg10[%c217, %c0_75], %132 {strides = array<i32>} : memref<336x4xf32, #tpu.memory_space<vmem>>, vector<16x4xf32>,
    %cst_76 = arith.constant 0.000000e+00 : f32
    %134 = vector.broadcast %cst_76 : f32 to vector<2x4xf32>
    %c233 = arith.constant 233 : index
    %c0_77 = arith.constant 0 : index
    %135 = vector.load %arg10[%c233, %c0_77] : memref<336x4xf32, #tpu.memory_space<vmem>>, vector<2x4xf32>
    tpu.vector_store %arg10[%c233, %c0_77], %134 {strides = array<i32>} : memref<336x4xf32, #tpu.memory_space<vmem>>, vector<2x4xf32>,
    %c0_78 = arith.constant 0 : index
    %c192 = arith.constant 192 : index
    %c0_79 = arith.constant 0 : index
    %136 = vector.load %arg1[%c0_78, %c192, %c0_79] : memref<1x256x4xf32, #tpu.memory_space<vmem>>, vector<1x16x4xf32>
    %137 = vector.shape_cast %136 : vector<1x16x4xf32> to vector<16x4xf32>
    %138 = vector.broadcast %0 : vector<1x4xf32> to vector<16x4xf32>
    %139 = arith.mulf %137, %138 : vector<16x4xf32>
    %140 = vector.broadcast %1 : vector<1x4xf32> to vector<16x4xf32>
    %141 = arith.addf %139, %140 : vector<16x4xf32>
    %cst_80 = arith.constant 0.000000e+00 : f32
    %142 = vector.broadcast %cst_80 : f32 to vector<16x4xf32>
    %143 = arith.maximumf %141, %142 : vector<16x4xf32>
    %c235 = arith.constant 235 : index
    %c0_81 = arith.constant 0 : index
    %144 = vector.load %arg10[%c235, %c0_81] : memref<336x4xf32, #tpu.memory_space<vmem>>, vector<16x4xf32>
    tpu.vector_store %arg10[%c235, %c0_81], %143 {strides = array<i32>} : memref<336x4xf32, #tpu.memory_space<vmem>>, vector<16x4xf32>,
    %cst_82 = arith.constant 0.000000e+00 : f32
    %145 = vector.broadcast %cst_82 : f32 to vector<2x4xf32>
    %c251 = arith.constant 251 : index
    %c0_83 = arith.constant 0 : index
    %146 = vector.load %arg10[%c251, %c0_83] : memref<336x4xf32, #tpu.memory_space<vmem>>, vector<2x4xf32>
    tpu.vector_store %arg10[%c251, %c0_83], %145 {strides = array<i32>} : memref<336x4xf32, #tpu.memory_space<vmem>>, vector<2x4xf32>,
    %c0_84 = arith.constant 0 : index
    %c208 = arith.constant 208 : index
    %c0_85 = arith.constant 0 : index
    %147 = vector.load %arg1[%c0_84, %c208, %c0_85] : memref<1x256x4xf32, #tpu.memory_space<vmem>>, vector<1x16x4xf32>
    %148 = vector.shape_cast %147 : vector<1x16x4xf32> to vector<16x4xf32>
    %149 = vector.broadcast %0 : vector<1x4xf32> to vector<16x4xf32>
    %150 = arith.mulf %148, %149 : vector<16x4xf32>
    %151 = vector.broadcast %1 : vector<1x4xf32> to vector<16x4xf32>
    %152 = arith.addf %150, %151 : vector<16x4xf32>
    %cst_86 = arith.constant 0.000000e+00 : f32
    %153 = vector.broadcast %cst_86 : f32 to vector<16x4xf32>
    %154 = arith.maximumf %152, %153 : vector<16x4xf32>
    %c253 = arith.constant 253 : index
    %c0_87 = arith.constant 0 : index
    %155 = vector.load %arg10[%c253, %c0_87] : memref<336x4xf32, #tpu.memory_space<vmem>>, vector<16x4xf32>
    tpu.vector_store %arg10[%c253, %c0_87], %154 {strides = array<i32>} : memref<336x4xf32, #tpu.memory_space<vmem>>, vector<16x4xf32>,
    %cst_88 = arith.constant 0.000000e+00 : f32
    %156 = vector.broadcast %cst_88 : f32 to vector<2x4xf32>
    %c269 = arith.constant 269 : index
    %c0_89 = arith.constant 0 : index
    %157 = vector.load %arg10[%c269, %c0_89] : memref<336x4xf32, #tpu.memory_space<vmem>>, vector<2x4xf32>
    tpu.vector_store %arg10[%c269, %c0_89], %156 {strides = array<i32>} : memref<336x4xf32, #tpu.memory_space<vmem>>, vector<2x4xf32>,
    %c0_90 = arith.constant 0 : index
    %c224 = arith.constant 224 : index
    %c0_91 = arith.constant 0 : index
    %158 = vector.load %arg1[%c0_90, %c224, %c0_91] : memref<1x256x4xf32, #tpu.memory_space<vmem>>, vector<1x16x4xf32>
    %159 = vector.shape_cast %158 : vector<1x16x4xf32> to vector<16x4xf32>
    %160 = vector.broadcast %0 : vector<1x4xf32> to vector<16x4xf32>
    %161 = arith.mulf %159, %160 : vector<16x4xf32>
    %162 = vector.broadcast %1 : vector<1x4xf32> to vector<16x4xf32>
    %163 = arith.addf %161, %162 : vector<16x4xf32>
    %cst_92 = arith.constant 0.000000e+00 : f32
    %164 = vector.broadcast %cst_92 : f32 to vector<16x4xf32>
    %165 = arith.maximumf %163, %164 : vector<16x4xf32>
    %c271 = arith.constant 271 : index
    %c0_93 = arith.constant 0 : index
    %166 = vector.load %arg10[%c271, %c0_93] : memref<336x4xf32, #tpu.memory_space<vmem>>, vector<16x4xf32>
    tpu.vector_store %arg10[%c271, %c0_93], %165 {strides = array<i32>} : memref<336x4xf32, #tpu.memory_space<vmem>>, vector<16x4xf32>,
    %cst_94 = arith.constant 0.000000e+00 : f32
    %167 = vector.broadcast %cst_94 : f32 to vector<2x4xf32>
    %c287 = arith.constant 287 : index
    %c0_95 = arith.constant 0 : index
    %168 = vector.load %arg10[%c287, %c0_95] : memref<336x4xf32, #tpu.memory_space<vmem>>, vector<2x4xf32>
    tpu.vector_store %arg10[%c287, %c0_95], %167 {strides = array<i32>} : memref<336x4xf32, #tpu.memory_space<vmem>>, vector<2x4xf32>,
    %c0_96 = arith.constant 0 : index
    %c240 = arith.constant 240 : index
    %c0_97 = arith.constant 0 : index
    %169 = vector.load %arg1[%c0_96, %c240, %c0_97] : memref<1x256x4xf32, #tpu.memory_space<vmem>>, vector<1x16x4xf32>
    %170 = vector.shape_cast %169 : vector<1x16x4xf32> to vector<16x4xf32>
    %171 = vector.broadcast %0 : vector<1x4xf32> to vector<16x4xf32>
    %172 = arith.mulf %170, %171 : vector<16x4xf32>
    %173 = vector.broadcast %1 : vector<1x4xf32> to vector<16x4xf32>
    %174 = arith.addf %172, %173 : vector<16x4xf32>
    %cst_98 = arith.constant 0.000000e+00 : f32
    %175 = vector.broadcast %cst_98 : f32 to vector<16x4xf32>
    %176 = arith.maximumf %174, %175 : vector<16x4xf32>
    %c289 = arith.constant 289 : index
    %c0_99 = arith.constant 0 : index
    %177 = vector.load %arg10[%c289, %c0_99] : memref<336x4xf32, #tpu.memory_space<vmem>>, vector<16x4xf32>
    tpu.vector_store %arg10[%c289, %c0_99], %176 {strides = array<i32>} : memref<336x4xf32, #tpu.memory_space<vmem>>, vector<16x4xf32>,
    %cst_100 = arith.constant 0.000000e+00 : f32
    %178 = vector.broadcast %cst_100 : f32 to vector<2x4xf32>
    %c305 = arith.constant 305 : index
    %c0_101 = arith.constant 0 : index
    %179 = vector.load %arg10[%c305, %c0_101] : memref<336x4xf32, #tpu.memory_space<vmem>>, vector<2x4xf32>
    tpu.vector_store %arg10[%c305, %c0_101], %178 {strides = array<i32>} : memref<336x4xf32, #tpu.memory_space<vmem>>, vector<2x4xf32>,
    %cst_102 = arith.constant 0.000000e+00 : f32
    %180 = vector.broadcast %cst_102 : f32 to vector<29x4xf32>
    %c307 = arith.constant 307 : index
    %c0_103 = arith.constant 0 : index
    %181 = vector.load %arg10[%c307, %c0_103] : memref<336x4xf32, #tpu.memory_space<vmem>>, vector<29x4xf32>
    tpu.vector_store %arg10[%c307, %c0_103], %180 {strides = array<i32>} : memref<336x4xf32, #tpu.memory_space<vmem>>, vector<29x4xf32>,
    %c0_104 = arith.constant 0 : index
    %c0_105 = arith.constant 0 : index
    %182 = vector.load %arg10[%c0_104, %c0_105] : memref<336x4xf32, #tpu.memory_space<vmem>>, vector<328x4xf32>
    %c0_106 = arith.constant 0 : index
    %c0_107 = arith.constant 0 : index
    %183 = vector.load %arg11[%c0_106, %c0_107] : memref<328x12xf32, #tpu.memory_space<vmem>>, vector<328x4xf32>
    tpu.vector_store %arg11[%c0_106, %c0_107], %182 {strides = array<i32>} : memref<328x12xf32, #tpu.memory_space<vmem>>, vector<328x4xf32>,
    %c1 = arith.constant 1 : index
    %c0_108 = arith.constant 0 : index
    %184 = vector.load %arg10[%c1, %c0_108] : memref<336x4xf32, #tpu.memory_space<vmem>>, vector<328x4xf32>
    %c0_109 = arith.constant 0 : index
    %c4 = arith.constant 4 : index
    %185 = vector.load %arg11[%c0_109, %c4] : memref<328x12xf32, #tpu.memory_space<vmem>>, vector<328x4xf32>
    tpu.vector_store %arg11[%c0_109, %c4], %184 {strides = array<i32>} : memref<328x12xf32, #tpu.memory_space<vmem>>, vector<328x4xf32>,
    %c2 = arith.constant 2 : index
    %c0_110 = arith.constant 0 : index
    %186 = vector.load %arg10[%c2, %c0_110] : memref<336x4xf32, #tpu.memory_space<vmem>>, vector<328x4xf32>
    %c0_111 = arith.constant 0 : index
    %c8 = arith.constant 8 : index
    %187 = vector.load %arg11[%c0_111, %c8] : memref<328x12xf32, #tpu.memory_space<vmem>>, vector<328x4xf32>
    tpu.vector_store %arg11[%c0_111, %c8], %186 {strides = array<i32>} : memref<328x12xf32, #tpu.memory_space<vmem>>, vector<328x4xf32>,
    %c0_112 = arith.constant 0 : index
    %c0_113 = arith.constant 0 : index
    %188 = tpu.strided_load %arg11[%c0_112, %c0_113] {strides = array<i32: 2, 1>} : memref<328x12xf32, #tpu.memory_space<vmem>>, vector<144x12xf32>
    %189 = arith.truncf %188 : vector<144x12xf32> to vector<144x12xbf16>
    %c0_114 = arith.constant 0 : index
    %c0_115 = arith.constant 0 : index
    %c0_116 = arith.constant 0 : index
    %190 = vector.load %arg5[%c0_114, %c0_115, %c0_116] : memref<3x12x8xbf16, #tpu.memory_space<vmem>>, vector<1x12x8xbf16>
    %191 = vector.shape_cast %190 : vector<1x12x8xbf16> to vector<12x8xbf16>
    %cst_117 = arith.constant dense<0.000000e+00> : vector<144x8xf32>
    %192 = tpu.matmul %189, %191, %cst_117 {dimension_numbers = #tpu.dot_dimension_numbers<[1], [0], [0], [1], [0, 0, 1, 1], [], []>} : vector<144x12xbf16>, vector<12x8xbf16>, vector<144x8xf32> -> vector<144x8xf32>
    %c0_118 = arith.constant 0 : index
    %c0_119 = arith.constant 0 : index
    %193 = vector.load %arg12[%c0_118, %c0_119] : memref<144x8xf32, #tpu.memory_space<vmem>>, vector<144x8xf32>
    tpu.vector_store %arg12[%c0_118, %c0_119], %192 {strides = array<i32>} : memref<144x8xf32, #tpu.memory_space<vmem>>, vector<144x8xf32>,
    %c18 = arith.constant 18 : index
    %c0_120 = arith.constant 0 : index
    %194 = tpu.strided_load %arg11[%c18, %c0_120] {strides = array<i32: 2, 1>} : memref<328x12xf32, #tpu.memory_space<vmem>>, vector<144x12xf32>
    %195 = arith.truncf %194 : vector<144x12xf32> to vector<144x12xbf16>
    %c1_121 = arith.constant 1 : index
    %c0_122 = arith.constant 0 : index
    %c0_123 = arith.constant 0 : index
    %196 = vector.load %arg5[%c1_121, %c0_122, %c0_123] : memref<3x12x8xbf16, #tpu.memory_space<vmem>>, vector<1x12x8xbf16>
    %197 = vector.shape_cast %196 : vector<1x12x8xbf16> to vector<12x8xbf16>
    %cst_124 = arith.constant dense<0.000000e+00> : vector<144x8xf32>
    %198 = tpu.matmul %195, %197, %cst_124 {dimension_numbers = #tpu.dot_dimension_numbers<[1], [0], [0], [1], [0, 0, 1, 1], [], []>} : vector<144x12xbf16>, vector<12x8xbf16>, vector<144x8xf32> -> vector<144x8xf32>
    %c0_125 = arith.constant 0 : index
    %c0_126 = arith.constant 0 : index
    %199 = vector.load %arg12[%c0_125, %c0_126] : memref<144x8xf32, #tpu.memory_space<vmem>>, vector<144x8xf32>
    %200 = arith.addf %199, %198 : vector<144x8xf32>
    %c0_127 = arith.constant 0 : index
    %c0_128 = arith.constant 0 : index
    %201 = vector.load %arg12[%c0_127, %c0_128] : memref<144x8xf32, #tpu.memory_space<vmem>>, vector<144x8xf32>
    tpu.vector_store %arg12[%c0_127, %c0_128], %200 {strides = array<i32>} : memref<144x8xf32, #tpu.memory_space<vmem>>, vector<144x8xf32>,
    %c36 = arith.constant 36 : index
    %c0_129 = arith.constant 0 : index
    %202 = tpu.strided_load %arg11[%c36, %c0_129] {strides = array<i32: 2, 1>} : memref<328x12xf32, #tpu.memory_space<vmem>>, vector<144x12xf32>
    %203 = arith.truncf %202 : vector<144x12xf32> to vector<144x12xbf16>
    %c2_130 = arith.constant 2 : index
    %c0_131 = arith.constant 0 : index
    %c0_132 = arith.constant 0 : index
    %204 = vector.load %arg5[%c2_130, %c0_131, %c0_132] : memref<3x12x8xbf16, #tpu.memory_space<vmem>>, vector<1x12x8xbf16>
    %205 = vector.shape_cast %204 : vector<1x12x8xbf16> to vector<12x8xbf16>
    %cst_133 = arith.constant dense<0.000000e+00> : vector<144x8xf32>
    %206 = tpu.matmul %203, %205, %cst_133 {dimension_numbers = #tpu.dot_dimension_numbers<[1], [0], [0], [1], [0, 0, 1, 1], [], []>} : vector<144x12xbf16>, vector<12x8xbf16>, vector<144x8xf32> -> vector<144x8xf32>
    %c0_134 = arith.constant 0 : index
    %c0_135 = arith.constant 0 : index
    %207 = vector.load %arg12[%c0_134, %c0_135] : memref<144x8xf32, #tpu.memory_space<vmem>>, vector<144x8xf32>
    %208 = arith.addf %207, %206 : vector<144x8xf32>
    %c0_136 = arith.constant 0 : index
    %c0_137 = arith.constant 0 : index
    %209 = vector.load %arg12[%c0_136, %c0_137] : memref<144x8xf32, #tpu.memory_space<vmem>>, vector<144x8xf32>
    tpu.vector_store %arg12[%c0_136, %c0_137], %208 {strides = array<i32>} : memref<144x8xf32, #tpu.memory_space<vmem>>, vector<144x8xf32>,
    %c0_138 = arith.constant 0 : index
    %c0_139 = arith.constant 0 : index
    %210 = vector.load %arg12[%c0_138, %c0_139] : memref<144x8xf32, #tpu.memory_space<vmem>>, vector<144x8xf32>
    %c0_140 = arith.constant 0 : index
    %c0_141 = arith.constant 0 : index
    %c0_142 = arith.constant 0 : index
    %211 = vector.load %arg7[%c0_140, %c0_141, %c0_142] : memref<1x144x8xf32, #tpu.memory_space<vmem>>, vector<1x144x8xf32>
    %212 = vector.shape_cast %211 : vector<1x144x8xf32> to vector<144x8xf32>
    %213 = vector.shape_cast %210 : vector<144x8xf32> to vector<1x144x8xf32>
    tpu.vector_store %arg7[%c0_140, %c0_141, %c0_142], %213 {strides = array<i32>} : memref<1x144x8xf32, #tpu.memory_space<vmem>>, vector<1x144x8xf32>,
    %c0_143 = arith.constant 0 : index
    %c0_144 = arith.constant 0 : index
    %214 = vector.load %arg2[%c0_143, %c0_144] : memref<144x1xf32, #tpu.memory_space<vmem>>, vector<144x1xf32>
    %c0_145 = arith.constant 0 : index
    %c0_146 = arith.constant 0 : index
    %215 = vector.load %arg12[%c0_145, %c0_146] : memref<144x8xf32, #tpu.memory_space<vmem>>, vector<144x8xf32>
    %216 = vector.broadcast %214 : vector<144x1xf32> to vector<144x8xf32>
    %217 = arith.mulf %215, %216 : vector<144x8xf32>
    %cst_147 = arith.constant dense<0.000000e+00> : vector<8xf32>
    %218 = vector.multi_reduction <add>, %217, %cst_147 [0] : vector<144x8xf32> to vector<8xf32>
    %219 = vector.shape_cast %218 : vector<8xf32> to vector<1x8xf32>
    %c0_148 = arith.constant 0 : index
    %c0_149 = arith.constant 0 : index
    %c0_150 = arith.constant 0 : index
    %220 = vector.load %arg8[%c0_148, %c0_149, %c0_150] : memref<1x2x8xf32, #tpu.memory_space<vmem>>, vector<1x1x8xf32>
    %221 = vector.shape_cast %220 : vector<1x1x8xf32> to vector<1x8xf32>
    %222 = vector.shape_cast %219 : vector<1x8xf32> to vector<1x1x8xf32>
    tpu.vector_store %arg8[%c0_148, %c0_149, %c0_150], %222 {strides = array<i32>} : memref<1x2x8xf32, #tpu.memory_space<vmem>>, vector<1x1x8xf32>,
    %c0_151 = arith.constant 0 : index
    %c0_152 = arith.constant 0 : index
    %223 = vector.load %arg12[%c0_151, %c0_152] : memref<144x8xf32, #tpu.memory_space<vmem>>, vector<144x8xf32>
    %224 = vector.broadcast %214 : vector<144x1xf32> to vector<144x8xf32>
    %225 = arith.mulf %223, %224 : vector<144x8xf32>
    %226 = arith.mulf %225, %225 : vector<144x8xf32>
    %cst_153 = arith.constant dense<0.000000e+00> : vector<8xf32>
    %227 = vector.multi_reduction <add>, %226, %cst_153 [0] : vector<144x8xf32> to vector<8xf32>
    %228 = vector.shape_cast %227 : vector<8xf32> to vector<1x8xf32>
    %c0_154 = arith.constant 0 : index
    %c1_155 = arith.constant 1 : index
    %c0_156 = arith.constant 0 : index
    %229 = vector.load %arg8[%c0_154, %c1_155, %c0_156] : memref<1x2x8xf32, #tpu.memory_space<vmem>>, vector<1x1x8xf32>
    %230 = vector.shape_cast %229 : vector<1x1x8xf32> to vector<1x8xf32>
    %231 = vector.shape_cast %228 : vector<1x8xf32> to vector<1x1x8xf32>
    tpu.vector_store %arg8[%c0_154, %c1_155, %c0_156], %231 {strides = array<i32>} : memref<1x2x8xf32, #tpu.memory_space<vmem>>, vector<1x1x8xf32>,
    %c19_157 = arith.constant 19 : index
    %c0_158 = arith.constant 0 : index
    %232 = tpu.strided_load %arg10[%c19_157, %c0_158] {strides = array<i32: 2, 1>} : memref<336x4xf32, #tpu.memory_space<vmem>>, vector<144x4xf32>
    %233 = arith.truncf %232 : vector<144x4xf32> to vector<144x4xbf16>
    %c0_159 = arith.constant 0 : index
    %c0_160 = arith.constant 0 : index
    %234 = vector.load %arg6[%c0_159, %c0_160] : memref<4x8xbf16, #tpu.memory_space<vmem>>, vector<4x8xbf16>
    %cst_161 = arith.constant dense<0.000000e+00> : vector<144x8xf32>
    %235 = tpu.matmul %233, %234, %cst_161 {dimension_numbers = #tpu.dot_dimension_numbers<[1], [0], [0], [1], [0, 0, 1, 1], [], []>} : vector<144x4xbf16>, vector<4x8xbf16>, vector<144x8xf32> -> vector<144x8xf32>
    %c0_162 = arith.constant 0 : index
    %c0_163 = arith.constant 0 : index
    %c0_164 = arith.constant 0 : index
    %236 = vector.load %arg9[%c0_162, %c0_163, %c0_164] : memref<1x144x8xf32, #tpu.memory_space<vmem>>, vector<1x144x8xf32>
    %237 = vector.shape_cast %236 : vector<1x144x8xf32> to vector<144x8xf32>
    %238 = vector.shape_cast %235 : vector<144x8xf32> to vector<1x144x8xf32>
    tpu.vector_store %arg9[%c0_162, %c0_163, %c0_164], %238 {strides = array<i32>} : memref<1x144x8xf32, #tpu.memory_space<vmem>>, vector<1x144x8xf32>,
    return
  }
  func.func @transform_0(%arg0: i32) -> (i32, i32, i32) {
    %c0_i32 = arith.constant 0 : i32
    %c0_i32_0 = arith.constant 0 : i32
    %c0_i32_1 = arith.constant 0 : i32
    return %arg0, %c0_i32, %c0_i32_0 : i32, i32, i32
  }
  func.func @transform_1(%arg0: i32) -> (i32, i32) {
    %c0_i32 = arith.constant 0 : i32
    %c0_i32_0 = arith.constant 0 : i32
    %c0_i32_1 = arith.constant 0 : i32
    return %c0_i32, %c0_i32_0 : i32, i32
  }
  func.func @transform_2(%arg0: i32) -> (i32, i32) {
    %c0_i32 = arith.constant 0 : i32
    %c0_i32_0 = arith.constant 0 : i32
    %c0_i32_1 = arith.constant 0 : i32
    return %c0_i32, %c0_i32_0 : i32, i32
  }
  func.func @transform_3(%arg0: i32) -> (i32, i32) {
    %c0_i32 = arith.constant 0 : i32
    %c0_i32_0 = arith.constant 0 : i32
    %c0_i32_1 = arith.constant 0 : i32
    return %c0_i32, %c0_i32_0 : i32, i32
  }
  func.func @transform_4(%arg0: i32) -> (i32, i32, i32) {
    %c0_i32 = arith.constant 0 : i32
    %c0_i32_0 = arith.constant 0 : i32
    %c0_i32_1 = arith.constant 0 : i32
    %c0_i32_2 = arith.constant 0 : i32
    return %c0_i32, %c0_i32_0, %c0_i32_1 : i32, i32, i32
  }
  func.func @transform_5(%arg0: i32) -> (i32, i32) {
    %c0_i32 = arith.constant 0 : i32
    %c0_i32_0 = arith.constant 0 : i32
    %c0_i32_1 = arith.constant 0 : i32
    return %c0_i32, %c0_i32_0 : i32, i32
  }
  func.func @transform_6(%arg0: i32) -> (i32, i32, i32) {
    %c0_i32 = arith.constant 0 : i32
    %c0_i32_0 = arith.constant 0 : i32
    %c0_i32_1 = arith.constant 0 : i32
    return %arg0, %c0_i32, %c0_i32_0 : i32, i32, i32
  }
  func.func @transform_7(%arg0: i32) -> (i32, i32, i32) {
    %c0_i32 = arith.constant 0 : i32
    %c0_i32_0 = arith.constant 0 : i32
    %c0_i32_1 = arith.constant 0 : i32
    return %arg0, %c0_i32, %c0_i32_0 : i32, i32, i32
  }
  func.func @transform_8(%arg0: i32) -> (i32, i32, i32) {
    %c0_i32 = arith.constant 0 : i32
    %c0_i32_0 = arith.constant 0 : i32
    %c0_i32_1 = arith.constant 0 : i32
    return %arg0, %c0_i32, %c0_i32_0 : i32, i32, i32
  }
}

</mosaic_0001>

<bundles_post_ra>
// kernel: basic_block.3
= control target key start
LH: loop header
LB: loop body
LE: loop exit
PB: predicated region body
PF: predicated region fallthrough
CT: control target
= control target key end

     0   :  { %v42_v0 = vmov 0.0   ;;  %s74_s1 = inlined_call_operand.vmem [shape: f32[2,128], index: 1, kind: output, shape index: {}]   ;;  %s75_s0 = inlined_call_operand.vmem [shape: f32[16,128], index: 0, kind: input, shape index: {}]  }
   0x1   :  { %12 = vst [vmem:[%s74_s1] sm:$0x3] %v42_v0  ;;  %v13_v1 = vld [vmem:[%s75_s0] sm:$0xff]  ;;  %v14_v2 = vld [vmem:[%s75_s0 + $0x8] sm:$0xff] }
   0x2   :  { %v16_v3 = vadd.f32 %v14_v2, %v13_v1  ;;  %v26_v4 = vmul.f32 %v13_v1, %v13_v1  ;;  %v27_v5 = vmul.f32 %v14_v2, %v14_v2 }
   0x4   :  { %v17_v6 = vrot.slane %v16_v3, 4  ;;  %v28_v7 = vadd.f32 %v27_v5, %v26_v4 }
   0x6   :  { %v18_v8 = vadd.f32 %v17_v6, %v16_v3  ;;  %v29_v9 = vrot.slane %v28_v7, 4 }
   0x8   :  { %v19_v10 = vrot.slane %v18_v8, 2  ;;  %v30_v11 = vadd.f32 %v29_v9, %v28_v7  ;;  %v15_v16 = vld [vmem:[%s74_s1] sm:$0x1]  ;;  %v25_v19 = vld [vmem:[%s74_s1 + $0x1] sm:$0x1] }
   0xa   :  { %v20_v12 = vadd.f32 %v19_v10, %v18_v8  ;;  %v31_v13 = vrot.slane %v30_v11, 2 }
   0xc   :  { %v21_v14 = vrot.slane %v20_v12, 1  ;;  %v32_v15 = vadd.f32 %v31_v13, %v30_v11 }
   0xe   :  { %v22_v17 = vadd.f32 %v21_v14, %v20_v12  ;;  %v33_v18 = vrot.slane %v32_v15, 1 }
  0x10   :  { %v23_v20 = vadd.f32 %v22_v17, %v15_v16  ;;  %v34_v21 = vadd.f32 %v33_v18, %v32_v15 }
  0x12   :  { %24 = vst [vmem:[%s74_s1] sm:$0x1] %v23_v20  ;;  %v35_v22 = vadd.f32 %v34_v21, %v25_v19 }
  0x14   :  { %36 = vst [vmem:[%s74_s1 + $0x1] sm:$0x1] %v35_v22 }

// kernel: basic_block.5
= control target key start
LH: loop header
LB: loop body
LE: loop exit
PB: predicated region body
PF: predicated region fallthrough
CT: control target
= control target key end

     0   :  { %s936_s15 = smov 0   ;;  %s1153_s0 = inlined_call_operand.vmem [shape: f32[2,144,8], index: 0, kind: input, shape index: {}]   ;;  %s1154_s1 = inlined_call_operand.vmem [shape: f32[1,8], index: 1, kind: input, shape index: {}]   ;;  %s1155_s2 = inlined_call_operand.vmem [shape: f32[1,8], index: 2, kind: input, shape index: {}]   ;;  %s1156_s3 = inlined_call_operand.vmem [shape: bf16[3,24,8], index: 3, kind: input, shape index: {}]   ;;  %s1157_s4 = inlined_call_operand.vmem [shape: f32[2,80,8], index: 4, kind: output, shape index: {}]  }
   0x1 LB: > { %s834_s16 = sadd.s32 4294967295, %s906_s15   ;;  %p838_p0 = scmp.ge.s32.totalorder %s906_s15, 1  ;;  %s906_s15 = sphi %s936_s15, %s14_s15  }
   0x2   : > { %p162_p1 = scmp.lt.s32.totalorder %s906_s15, 3 }
   0x4   : > { %p163_p2 = pnand %p838_p0, %p162_p1 }
   0x5   : > { %p188_p3 = scmp.lt.s32.totalorder (!%p163_p2), %s834_s16, 1  ;;  %s909_s25 = smov (!%p163_p2), 16  }
   0x6   : > { %166 = sbr.rel (%p163_p2) target bundleno = 385 (0x181), region = 36  ;;  %s910_s26 = smov (!%p163_p2), 8  }
   0xb   : > { %vm216_vm0 = vcmask 58368   ;;  %s1159_s16 = smov (!%p188_p3, %s834_s16), 1  ;;  %v908_v0 = vmov 0.0   ;;  %vm201_vm1 = vcmask 64512   ;;  %v898_v1 = vld [vmem:[%s1154_s1] ss:$0 sm:$0xff] }
   0xc   : > { %217 = vst.msk [vmem:[#allocation2 + $0x13] sm:$0x3] %vm216_vm0, %v908_v0  ;;  %s885_s17 = smul.u32 144, %s1159_s16  ;;  %v899_v2 = vld [vmem:[%s1155_s2] ss:$0 sm:$0xff]  ;;  %vm203_vm2 = vcmask 59392  }
   0xd   : > { %202 = vst.msk [vmem:[#allocation2] sm:$0xff] %vm201_vm1, %v908_v0  ;;  %vm355_vm3 = vcmask 130112   ;;  %vm491_vm4 = vcmask 1043456   ;;  %vm434_vm5 = vcmask 195712   ;;  %vm475_vm6 = vcmask 195584   ;;  %s886_s13 = smul.u32 80, %s1159_s16 }
   0xe   : > { %223 = vst.msk [vmem:[#allocation2 + $0x1d] sm:$0x3] %vm216_vm0, %v908_v0  ;;  %s956_s22 = scalar_lea.vmem %s1153_s0, %s885_s17 }
   0xf   : > { %229 = vst.msk [vmem:[#allocation2 + $0x27] sm:$0x3] %vm216_vm0, %v908_v0  ;;  %v205_v3 = vld [vmem:[%s956_s22] sm:$0xff]  ;;  %v218_v4 = vld [vmem:[%s956_s22 + $0x12] sm:$0xff]  ;;  %v236_v10 = vld [vmem:[%s956_s22 + $0x48] sm:$0xff]  ;;  %s1105_s18 = scalar_lea.vmem %s1157_s4, %s886_s13 }
  0x10   : > { %235 = vst.msk [vmem:[#allocation2 + $0x31] sm:$0x3] %vm216_vm0, %v908_v0  ;;  %v224_v5 = vld [vmem:[%s956_s22 + $0x24] sm:$0xff]  ;;  %v209_v6 = vmul.f32 %v898_v1, %v205_v3  ;;  %v219_v7 = vmul.f32 %v898_v1, %v218_v4  ;;  %v230_v9 = vld [vmem:[%s956_s22 + $0x36] sm:$0xff]  ;;  %v237_v13 = vmul.f32 %v898_v1, %v236_v10  ;;  %v248_v15 = vld [vmem:[%s956_s22 + $0x6c] sm:$0xff] }
  0x11   : > { %241 = vst.msk [vmem:[#allocation2 + $0x3b] sm:$0x3] %vm216_vm0, %v908_v0  ;;  %v225_v8 = vmul.f32 %v898_v1, %v224_v5  ;;  %v242_v11 = vld [vmem:[%s956_s22 + $0x5a] sm:$0xff]  ;;  %v231_v12 = vmul.f32 %v898_v1, %v230_v9  ;;  %v249_v19 = vmul.f32 %v898_v1, %v248_v15 }
  0x12   : > { %247 = vst.msk [vmem:[#allocation2 + $0x45] sm:$0x3] %vm216_vm0, %v908_v0  ;;  %v243_v14 = vmul.f32 %v898_v1, %v242_v11  ;;  %v213_v16 = vadd.f32 %v899_v2, %v209_v6  ;;  %v220_v17 = vadd.f32 %v899_v2, %v219_v7  ;;  %v238_v21 = vadd.f32 %v899_v2, %v237_v13  ;;  %v254_v34 = vld [vmem:[%s956_s22 + $0x7e] sm:$0xff]  ;;  %v852_v6 = vld [vmem:[%s1156_s3 + $0x14] sm:$0xf] }
  0x13   : > { %253 = vst.msk [vmem:[#allocation2 + $0x4f] sm:$0x3] %vm216_vm0, %v908_v0  ;;  %v226_v18 = vadd.f32 %v899_v2, %v225_v8  ;;  %v232_v20 = vadd.f32 %v899_v2, %v231_v12  ;;  %v250_v26 = vadd.f32 %v899_v2, %v249_v19  ;;  %v255_v35 = vmul.f32 %v898_v1, %v254_v34  ;;  %v876_v7 = vld [vmem:[%s1156_s3] sm:$0xff] }
  0x14   : > { %259 = vst.msk [vmem:[#allocation2 + $0x59] sm:$0x3] %vm216_vm0, %v908_v0  ;;  %v244_v22 = vadd.f32 %v899_v2, %v243_v14  ;;  %v214_v23 = vmax.f32 %v213_v16, 0.0  ;;  %v221_v24 = vmax.f32 %v220_v17, 0.0  ;;  %v239_v28 = vmax.f32 %v238_v21, 0.0  ;;  %v877_v14 = vld [vmem:[%s1156_s3 + $0xc] sm:$0xff] }
  0x15   : > { %260 = vst.msk [vmem:[#allocation2 + $0x5b] sm:$0xff] %vm201_vm1, %v908_v0  ;;  %v227_v25 = vmax.f32 %v226_v18, 0.0  ;;  %v233_v27 = vmax.f32 %v232_v20, 0.0  ;;  %v251_v30 = vmax.f32 %v250_v26, 0.0  ;;  %v256_v38 = vadd.f32 %v899_v2, %v255_v35  ;;  %v864_v15 = vld [vmem:[%s1156_s3 + $0x20] sm:$0xf] }
  0x16   : > { %261 = vst.msk [vmem:[#allocation2 + $0x63] sm:$0xff] %vm201_vm1, %v908_v0  ;;  %v245_v29 = vmax.f32 %v244_v22, 0.0  ;;  %v563_v8 = vunpack.c.l.b16 %v852_v6  ;;  %v673_v16 = vunpack.c.l.b16 %v864_v15  ;;  %v1044_v20 = vld [vmem:[%s1156_s3 + $0x18] sm:$0xff] }
  0x17   : > { %215 = vst.msk [vmem:[#allocation2 + $0xb] sm:$0xff] %vm201_vm1, %v214_v23  ;;  %v257_v40 = vmax.f32 %v256_v38, 0.0 }
  0x18   : > { %222 = vst.msk [vmem:[#allocation2 + $0x15] sm:$0xff] %vm201_vm1, %v221_v24  ;;  %v565_v11 = vpack.c.b16 %v563_v8, %v563_v8  ;;  %v675_v18 = vpack.c.b16 %v673_v16, %v673_v16 }
  0x19   : > { %228 = vst.msk [vmem:[#allocation2 + $0x1f] sm:$0xff] %vm201_vm1, %v227_v25  ;;  %v264_v25 = vld [vmem:[#allocation2] sm:$0xff] }
  0x1a   : > { %234 = vst.msk [vmem:[#allocation2 + $0x29] sm:$0xff] %vm201_vm1, %v233_v27  ;;  %v583_v12 = vsel %vm491_vm4, %v565_v11, 0  ;;  %v1038_v19 = vsel %vm491_vm4, %v675_v18, 0 }
  0x1b   : > { %240 = vst.msk [vmem:[#allocation2 + $0x33] sm:$0xff] %vm201_vm1, %v239_v28  ;;  %881 = vmatpush.bf16.msra.mxu1 %v583_v12  ;;  %883 = vmatpush.bf16.msra.mxu2 %v1038_v19 }
  0x1c   : > { %246 = vst.msk [vmem:[#allocation2 + $0x3d] sm:$0xff] %vm201_vm1, %v245_v29  ;;  %v301_v56 = vld [vmem:[#allocation2 + $0x59] sm:$0xff] }
  0x1d   : > { %252 = vst.msk [vmem:[#allocation2 + $0x47] sm:$0xff] %vm201_vm1, %v251_v30  ;;  %v380_v58 = vld [vmem:[#allocation2 + $0x5a] sm:$0xff]  ;;  %v381_v60 = vld [vmem:[#allocation2 + $0x62] sm:$0xff] }
  0x1e   : > { %204 = vst.msk [vmem:[#allocation2 + $0x8] sm:$0x7] %vm203_vm2, %v908_v0  ;;  %v302_v59 = vld [vmem:[#allocation2 + $0x61] sm:$0xff] }
  0x1f   : > { %v371_v31 = vld [vmem:[#allocation2 + $0x12] sm:$0xff]  ;;  %258 = vst.msk [vmem:[#allocation2 + $0x51] sm:$0xff] %vm201_vm1, %v257_v40  ;;  %v465_v0 = vld [vmem:[%s1156_s3 + $0x8] sm:$0xf]  ;;  %882 = vmatpush.bf16.msra.mxu1 %v877_v14  ;;  %884 = vmatpush.bf16.msra.mxu2 %v1044_v20 }
  0x20   : > { %v292_v32 = vld [vmem:[#allocation2 + $0x11] sm:$0xff]  ;;  %399 = vrot.lane.b32.xlu1 %v371_v31, %s909_s25  ;;  %v294_v33 = vld [vmem:[#allocation2 + $0x21] sm:$0xff]  ;;  %v293_v37 = vld [vmem:[#allocation2 + $0x19] sm:$0xff]  ;;  %v471_v1 = vunpack.c.l.b16 %v465_v0  ;;  %277 = vst.msk [vmem:[#allocation3] sm:$0xff] %vm201_vm1, %v264_v25 }
  0x21   : > { %320 = vrot.lane.b32.xlu0 %v292_v32, %s910_s26  ;;  %324 = vrot.lane.b32.xlu2 %v294_v33, %s910_s26  ;;  %v372_v36 = vld [vmem:[#allocation2 + $0x1a] sm:$0xff]  ;;  %v295_v39 = vld [vmem:[#allocation2 + $0x29] sm:$0xff] }
  0x22   : > { %v374_v41 = vld [vmem:[#allocation2 + $0x2a] sm:$0xff]  ;;  %v373_v42 = vld [vmem:[#allocation2 + $0x22] sm:$0xff]  ;;  %v375_v45 = vld [vmem:[#allocation2 + $0x32] sm:$0xff]  ;;  %v473_v4 = vpack.c.b16 %v471_v1, %v471_v1 }
  0x23   : > { %v296_v43 = vld [vmem:[#allocation2 + $0x31] sm:$0xff]  ;;  %v297_v44 = vld [vmem:[#allocation2 + $0x39] sm:$0xff]  ;;  %v269_v3 = vld [vmem:[#allocation2 + $0x28] sm:$0xff] }
  0x24   : > { %v376_v46 = vld [vmem:[#allocation2 + $0x3a] sm:$0xff]  ;;  %v377_v47 = vld [vmem:[#allocation2 + $0x42] sm:$0xff]  ;;  %v266_v61 = vld [vmem:[#allocation2 + $0x10] sm:$0xff]  ;;  %282 = vst.msk [vmem:[#allocation3 + $0x28] sm:$0xff] %vm201_vm1, %v269_v3  ;;  %v493_v5 = vsel %vm491_vm4, %v473_v4, 0 }
  0x25   : > { %v298_v48 = vld [vmem:[#allocation2 + $0x41] sm:$0xff]  ;;  %v291_v51 = vld [vmem:[#allocation2 + $0x9] sm:$0xff]  ;;  %279 = vst.msk [vmem:[#allocation3 + $0x10] sm:$0xff] %vm201_vm1, %v266_v61  ;;  %v267_v63 = vld [vmem:[#allocation2 + $0x18] sm:$0xff]  ;;  %879 = vmatpush.bf16.msra.mxu3 %v493_v5  ;;  %501 = vmatpush.bf16.msra.mxu0 %v493_v5 }
  0x26   : > { %v290_v49 = vld [vmem:[#allocation2 + $0x1] sm:$0xff]  ;;  %v370_v52 = vld [vmem:[#allocation2 + $0xa] sm:$0xff]  ;;  %v379_v57 = vld [vmem:[#allocation2 + $0x52] sm:$0xff]  ;;  %280 = vst.msk [vmem:[#allocation3 + $0x18] sm:$0xff] %vm201_vm1, %v267_v63 }
  0x27   : > { %v369_v50 = vld [vmem:[#allocation2 + $0x2] sm:$0xff]  ;;  %v378_v53 = vld [vmem:[#allocation2 + $0x4a] sm:$0xff]  ;;  %v271_v13 = vld [vmem:[#allocation2 + $0x38] sm:$0xff] }
  0x28   : > { %401 = vrot.lane.b32.xlu1 %v372_v36, %s909_s25  ;;  %v299_v54 = vld [vmem:[#allocation2 + $0x49] sm:$0xff]  ;;  %v300_v55 = vld [vmem:[#allocation2 + $0x51] sm:$0xff]  ;;  %v268_v62 = vld [vmem:[#allocation2 + $0x20] sm:$0xff]  ;;  %284 = vst.msk [vmem:[#allocation3 + $0x38] sm:$0xff] %vm201_vm1, %v271_v13 }
  0x29   : > { %322 = vrot.lane.b32.xlu0 %v293_v37, %s910_s26  ;;  %326 = vrot.lane.b32.xlu2 %v295_v39, %s910_s26  ;;  %281 = vst.msk [vmem:[#allocation3 + $0x20] sm:$0xff] %vm201_vm1, %v268_v62  ;;  %v270_v10 = vld [vmem:[#allocation2 + $0x30] sm:$0xff]  ;;  %v272_v23 = vld [vmem:[#allocation2 + $0x40] sm:$0xff]  ;;  %v265_v29 = vld [vmem:[#allocation2 + $0x8] sm:$0xff] }
  0x2a   : > { %880 = vmatpush.bf16.msra.mxu3 %v876_v7  ;;  %502 = vmatpush.bf16.msra.mxu0 %v876_v7  ;;  %283 = vst.msk [vmem:[#allocation3 + $0x30] sm:$0xff] %vm201_vm1, %v270_v10  ;;  %v273_v32 = vld [vmem:[#allocation2 + $0x48] sm:$0xff]  ;;  %v274_v37 = vld [vmem:[#allocation2 + $0x50] sm:$0xff]  ;;  %v275_v38 = vld [vmem:[#allocation2 + $0x58] sm:$0xff] }
  0x2b   : > { %285 = vst.msk [vmem:[#allocation3 + $0x40] sm:$0xff] %vm201_vm1, %v272_v23 }
  0x2c   : > { %278 = vst.msk [vmem:[#allocation3 + $0x8] sm:$0xff] %vm201_vm1, %v265_v29 }
  0x2d   : > { %286 = vst.msk [vmem:[#allocation3 + $0x48] sm:$0xff] %vm201_vm1, %v273_v32 }
  0x2e   : > { %591 = vmatpush.bf16.msrb.mxu0 %v583_v12  ;;  %287 = vst.msk [vmem:[#allocation3 + $0x50] sm:$0xff] %vm201_vm1, %v274_v37 }
  0x2f   : > { %288 = vst.msk [vmem:[#allocation3 + $0x58] sm:$0xff] %vm201_vm1, %v275_v38 }
  0x30   : > { %405 = vrot.lane.b32.xlu1 %v374_v41, %s909_s25 }
  0x31   : > { %403 = vrot.lane.b32.xlu0 %v373_v42, %s909_s25  ;;  %328 = vrot.lane.b32.xlu2 %v296_v43, %s910_s26 }
  0x32   : > { %592 = vmatpush.bf16.msrb.mxu0 %v877_v14 }
  0x38   : > { %330 = vrot.lane.b32.xlu1 %v297_v44, %s910_s26 }
  0x39   : > { %407 = vrot.lane.b32.xlu0 %v375_v45, %s909_s25  ;;  %409 = vrot.lane.b32.xlu2 %v376_v46, %s909_s25  ;;  %v276_v45 = vld [vmem:[#allocation2 + $0x60] sm:$0xff] }
  0x3a   : > { %289 = vst.msk [vmem:[#allocation3 + $0x60] sm:$0xff] %vm201_vm1, %v276_v45 }
  0x40   : > { %411 = vrot.lane.b32.xlu1 %v377_v47, %s909_s25 }
  0x41   : > { %332 = vrot.lane.b32.xlu0 %v298_v48, %s910_s26  ;;  %316 = vrot.lane.b32.xlu2 %v290_v49, %s910_s26 }
  0x48   : > { %395 = vrot.lane.b32.xlu1 %v369_v50, %s909_s25 }
  0x49   : > { %318 = vrot.lane.b32.xlu0 %v291_v51, %s910_s26  ;;  %397 = vrot.lane.b32.xlu2 %v370_v52, %s909_s25 }
  0x50   : > { %413 = vrot.lane.b32.xlu1 %v378_v53, %s909_s25 }
  0x51   : > { %334 = vrot.lane.b32.xlu0 %v299_v54, %s910_s26  ;;  %336 = vrot.lane.b32.xlu2 %v300_v55, %s910_s26 }
  0x58   : > { %338 = vrot.lane.b32.xlu1 %v301_v56, %s910_s26 }
  0x59   : > { %415 = vrot.lane.b32.xlu0 %v379_v57, %s909_s25  ;;  %417 = vrot.lane.b32.xlu2 %v380_v58, %s909_s25 }
  0x60   : > { %419 = vrot.lane.b32.xlu1 %v381_v60, %s909_s25 }
  0x61   : > { %340 = vrot.lane.b32.xlu0 %v302_v59, %s910_s26 }
  0x7b   : > { %v325_v2 = vpop.permute.xlu2 %324 }
  0x7c   : > { %360 = vst.msk [vmem:[#allocation3 + $0x20] sm:$0xff] %vm355_vm3, %v325_v2 }
  0x83   : > { %v327_v9 = vpop.permute.xlu2 %326 }
  0x84   : > { %361 = vst.msk [vmem:[#allocation3 + $0x28] sm:$0xff] %vm355_vm3, %v327_v9 }
  0x8b   : > { %v329_v17 = vpop.permute.xlu2 %328 }
  0x8c   : > { %362 = vst.msk [vmem:[#allocation3 + $0x30] sm:$0xff] %vm355_vm3, %v329_v17 }
  0x92   : > { %v400_v21 = vpop.permute.xlu1 %399 }
  0x93   : > { %v321_v22 = vpop.permute.xlu0 %320  ;;  %v410_v24 = vpop.permute.xlu2 %409 }
  0x94   : > { %358 = vst.msk [vmem:[#allocation3 + $0x10] sm:$0xff] %vm355_vm3, %v321_v22 }
  0x95   : > { %437 = vst.msk [vmem:[#allocation3 + $0x10] sm:$0xff] %vm434_vm5, %v400_v21 }
  0x9a   : > { %v402_v26 = vpop.permute.xlu1 %401 }
  0x9b   : > { %v323_v27 = vpop.permute.xlu0 %322  ;;  %v317_v28 = vpop.permute.xlu2 %316 }
  0x9c   : > { %359 = vst.msk [vmem:[#allocation3 + $0x18] sm:$0xff] %vm355_vm3, %v323_v27  ;;  %v450_v33 = vld [vmem:[#allocation3 + $0x10] sm:$0xff] }
  0x9d   : > { %438 = vst.msk [vmem:[#allocation3 + $0x18] sm:$0xff] %vm434_vm5, %v402_v26 }
  0x9e   : > { %356 = vst.msk [vmem:[#allocation3] sm:$0xff] %vm355_vm3, %v317_v28 }
  0xa2   : > { %v406_v30 = vpop.permute.xlu1 %405 }
  0xa3   : > { %v404_v31 = vpop.permute.xlu0 %403  ;;  %440 = vst.msk [vmem:[#allocation3 + $0x28] sm:$0xff] %vm434_vm5, %v406_v30  ;;  %v398_v35 = vpop.permute.xlu2 %397 }
  0xa4   : > { %v451_v34 = vld [vmem:[#allocation3 + $0x18] sm:$0xff]  ;;  %439 = vst.msk [vmem:[#allocation3 + $0x20] sm:$0xff] %vm434_vm5, %v404_v31 }
  0xa5   : > { %v459_v36 = vpack.c.bf16 %v451_v34, %v450_v33  ;;  %v540_v22 = vld [vmem:[#allocation3 + $0x12] sm:$0xff] }
  0xa6   : > { %v649_v30 = vld [vmem:[#allocation3 + $0x14] sm:$0xff] }
  0xa7   : > { %846 = vmatmul.msk.bf16.vlgmr.msra.gmra.mxu3 %vm475_vm6, %v459_v36 }
  0xaa   : > { %v331_v39 = vpop.permute.xlu1 %330  ;;  %v453_v47 = vld [vmem:[#allocation3 + $0x28] sm:$0xff] }
  0xab   : > { %v408_v40 = vpop.permute.xlu0 %407  ;;  %363 = vst.msk [vmem:[#allocation3 + $0x38] sm:$0xff] %vm355_vm3, %v331_v39  ;;  %v541_v41 = vld [vmem:[#allocation3 + $0x1a] sm:$0xff]  ;;  %v542_v42 = vld [vmem:[#allocation3 + $0x22] sm:$0xff]  ;;  %v337_v44 = vpop.permute.xlu2 %336 }
  0xac   : > { %441 = vst.msk [vmem:[#allocation3 + $0x30] sm:$0xff] %vm434_vm5, %v408_v40  ;;  %v550_v43 = vpack.c.bf16 %v542_v42, %v541_v41  ;;  %v452_v46 = vld [vmem:[#allocation3 + $0x20] sm:$0xff] }
  0xad   : > { %442 = vst.msk [vmem:[#allocation3 + $0x38] sm:$0xff] %vm434_vm5, %v410_v24  ;;  %v651_v50 = vld [vmem:[#allocation3 + $0x24] sm:$0xff]  ;;  %v460_v53 = vpack.c.bf16 %v453_v47, %v452_v46  ;;  %v650_v27 = vld [vmem:[#allocation3 + $0x1c] sm:$0xff] }
  0xae   : > { %858 = vmatmul.msk.bf16.vlgmr.msra.gmra.mxu1 %vm475_vm6, %v550_v43  ;;  %366 = vst.msk [vmem:[#allocation3 + $0x50] sm:$0xff] %vm355_vm3, %v337_v44  ;;  %v659_v31 = vpack.c.bf16 %v650_v27, %v649_v30 }
  0xb2   : > { %v412_v48 = vpop.permute.xlu1 %411 }
  0xb3   : > { %v333_v49 = vpop.permute.xlu0 %332  ;;  %v652_v51 = vld [vmem:[#allocation3 + $0x2c] sm:$0xff]  ;;  %v418_v6 = vpop.permute.xlu2 %417 }
  0xb4   : > { %364 = vst.msk [vmem:[#allocation3 + $0x40] sm:$0xff] %vm355_vm3, %v333_v49  ;;  %v660_v52 = vpack.c.bf16 %v652_v51, %v651_v50  ;;  %v543_v54 = vld [vmem:[#allocation3 + $0x2a] sm:$0xff]  ;;  %v544_v55 = vld [vmem:[#allocation3 + $0x32] sm:$0xff] }
  0xb5   : > { %443 = vst.msk [vmem:[#allocation3 + $0x40] sm:$0xff] %vm434_vm5, %v412_v48  ;;  %v551_v58 = vpack.c.bf16 %v544_v55, %v543_v54  ;;  %v454_v60 = vld [vmem:[#allocation3 + $0x30] sm:$0xff]  ;;  %v455_v61 = vld [vmem:[#allocation3 + $0x38] sm:$0xff] }
  0xb6   : > { %870 = vmatmul.msk.bf16.vlgmr.msra.gmra.mxu2 %vm475_vm6, %v660_v52  ;;  %v653_v1 = vld [vmem:[#allocation3 + $0x34] sm:$0xff]  ;;  %v461_v4 = vpack.c.bf16 %v455_v61, %v454_v60 }
  0xb7   : > { %847 = vmatmul.msk.bf16.gmra.mxu3 %vm475_vm6, %v460_v53 }
  0xba   : > { %v396_v56 = vpop.permute.xlu1 %395 }
  0xbb   : > { %v319_v57 = vpop.permute.xlu0 %318  ;;  %435 = vst.msk [vmem:[#allocation3] sm:$0xff] %vm434_vm5, %v396_v56 }
  0xbc   : > { %357 = vst.msk [vmem:[#allocation3 + $0x8] sm:$0xff] %vm355_vm3, %v319_v57  ;;  %v654_v59 = vld [vmem:[#allocation3 + $0x3c] sm:$0xff] }
  0xbd   : > { %436 = vst.msk [vmem:[#allocation3 + $0x8] sm:$0xff] %vm434_vm5, %v398_v35  ;;  %v661_v2 = vpack.c.bf16 %v654_v59, %v653_v1  ;;  %v545_v9 = vld [vmem:[#allocation3 + $0x3a] sm:$0xff] }
  0xbe   : > { %859 = vmatmul.msk.bf16.gmra.mxu1 %vm475_vm6, %v551_v58  ;;  %v456_v18 = vld [vmem:[#allocation3 + $0x40] sm:$0xff] }
  0xc2   : > { %v414_v62 = vpop.permute.xlu1 %413  ;;  %v448_v0 = vld [vmem:[#allocation3] sm:$0xff] }
  0xc3   : > { %v335_v63 = vpop.permute.xlu0 %334 }
  0xc4   : > { %365 = vst.msk [vmem:[#allocation3 + $0x48] sm:$0xff] %vm355_vm3, %v335_v63  ;;  %v449_v3 = vld [vmem:[#allocation3 + $0x8] sm:$0xff] }
  0xc5   : > { %444 = vst.msk [vmem:[#allocation3 + $0x48] sm:$0xff] %vm434_vm5, %v414_v62  ;;  %v458_v5 = vpack.c.bf16 %v449_v3, %v448_v0  ;;  %v539_v15 = vld [vmem:[#allocation3 + $0xa] sm:$0xff] }
  0xc6   : > { %871 = vmatmul.msk.bf16.gmra.mxu2 %vm475_vm6, %v661_v2  ;;  %v549_v23 = vpack.c.bf16 %v540_v22, %v539_v15 }
  0xc7   : > { %848 = vmatmul.msk.bf16.gmra.mxu3 %vm475_vm6, %v461_v4  ;;  %845 = vmatmul.msk.bf16.vlgmr.msra.gmra.mxu0 %vm475_vm6, %v458_v5 }
  0xc8   : > { %701 = vmatpush.bf16.msra.mxu0 %v1038_v19 }
  0xca   : > { %v339_v7 = vpop.permute.xlu1 %338 }
  0xcb   : > { %v416_v8 = vpop.permute.xlu0 %415  ;;  %367 = vst.msk [vmem:[#allocation3 + $0x58] sm:$0xff] %vm355_vm3, %v339_v7 }
  0xcc   : > { %v546_v10 = vld [vmem:[#allocation3 + $0x42] sm:$0xff]  ;;  %445 = vst.msk [vmem:[#allocation3 + $0x50] sm:$0xff] %vm434_vm5, %v416_v8  ;;  %702 = vmatpush.bf16.msra.mxu0 %v1044_v20 }
  0xcd   : > { %v552_v11 = vpack.c.bf16 %v546_v10, %v545_v9  ;;  %446 = vst.msk [vmem:[#allocation3 + $0x58] sm:$0xff] %vm434_vm5, %v418_v6  ;;  %v457_v12 = vld [vmem:[#allocation3 + $0x48] sm:$0xff] }
  0xce   : > { %v655_v16 = vld [vmem:[#allocation3 + $0x44] sm:$0xff]  ;;  %v462_v21 = vpack.c.bf16 %v457_v12, %v456_v18 }
  0xcf   : > { %860 = vmatmul.msk.bf16.gmra.mxu1 %vm475_vm6, %v552_v11 }
  0xd2   : > { %v420_v14 = vpop.permute.xlu1 %419 }
  0xd3   : > { %v341_v13 = vpop.permute.xlu0 %340  ;;  %v656_v17 = vld [vmem:[#allocation3 + $0x4c] sm:$0xff] }
  0xd4   : > { %368 = vst.msk [vmem:[#allocation3 + $0x60] sm:$0xff] %vm355_vm3, %v341_v13  ;;  %v662_v19 = vpack.c.bf16 %v656_v17, %v655_v16  ;;  %v547_v20 = vld [vmem:[#allocation3 + $0x4a] sm:$0xff]  ;;  %v548_v24 = vld [vmem:[#allocation3 + $0x52] sm:$0xff] }
  0xd5   : > { %447 = vst.msk [vmem:[#allocation3 + $0x60] sm:$0xff] %vm434_vm5, %v420_v14  ;;  %v553_v25 = vpack.c.bf16 %v548_v24, %v547_v20  ;;  %v657_v28 = vld [vmem:[#allocation3 + $0x54] sm:$0xff] }
  0xd6   : > { %872 = vmatmul.msk.bf16.gmra.mxu2 %vm475_vm6, %v662_v19 }
  0xd7   : > { %849 = vmatmul.msk.bf16.gmra.mxu3 %vm475_vm6, %v462_v21  ;;  %857 = vmatmul.msk.bf16.vlgmr.msrb.gmra.mxu0 %vm475_vm6, %v549_v23 }
  0xdc   : > { %v658_v26 = vld [vmem:[#allocation3 + $0x5c] sm:$0xff] }
  0xdd   : > { %v663_v29 = vpack.c.bf16 %v658_v26, %v657_v28 }
  0xdf   : > { %861 = vmatmul.msk.bf16.gmra.mxu1 %vm475_vm6, %v553_v25 }
  0xe6   : > { %873 = vmatmul.msk.bf16.gmra.mxu2 %vm475_vm6, %v663_v29 }
  0xe7   : > { %869 = vmatmul.msk.bf16.vlgmr.msra.gmra.mxu0 %vm475_vm6, %v659_v31 }
 0x12a   : > { %v509_v32 = vpop.f32.mrf.mxu3 }
 0x12b   : > { %531 = vst.msk [vmem:[#allocation4 + $0x10] sm:$0xff] %vm201_vm1, %v509_v32  ;;  %v599_v33 = vpop.f32.mrf.mxu1 }
 0x132   : > { %v621_v34 = vld [vmem:[#allocation4 + $0x10] sm:$0xff]  ;;  %v511_v35 = vpop.f32.mrf.mxu3 }
 0x133   : > { %v631_v36 = vadd.f32 %v621_v34, %v599_v33  ;;  %532 = vst.msk [vmem:[#allocation4 + $0x18] sm:$0xff] %vm201_vm1, %v511_v35  ;;  %v601_v37 = vpop.f32.mrf.mxu1 }
 0x135   : > { %641 = vst.msk [vmem:[#allocation4 + $0x10] sm:$0xff] %vm201_vm1, %v631_v36 }
 0x139   : > { %v709_v39 = vpop.f32.mrf.mxu2 }
 0x13a   : > { %v622_v38 = vld [vmem:[#allocation4 + $0x18] sm:$0xff]  ;;  %v514_v40 = vpop.f32.mrf.mxu3 }
 0x13b   : > { %v632_v41 = vadd.f32 %v622_v38, %v601_v37  ;;  %533 = vst.msk [vmem:[#allocation4 + $0x20] sm:$0xff] %vm201_vm1, %v514_v40  ;;  %v604_v43 = vpop.f32.mrf.mxu1 }
 0x13c   : > { %v731_v42 = vld [vmem:[#allocation4 + $0x10] sm:$0xff] }
 0x13d   : > { %642 = vst.msk [vmem:[#allocation4 + $0x18] sm:$0xff] %vm201_vm1, %v632_v41  ;;  %v741_v44 = vadd.f32 %v731_v42, %v709_v39 }
 0x13f   : > { %751 = vst.msk [vmem:[#allocation4 + $0x10] sm:$0xff] %vm201_vm1, %v741_v44 }
 0x141   : > { %v711_v46 = vpop.f32.mrf.mxu2 }
 0x142   : > { %v623_v45 = vld [vmem:[#allocation4 + $0x20] sm:$0xff]  ;;  %v516_v47 = vpop.f32.mrf.mxu3 }
 0x143   : > { %v633_v48 = vadd.f32 %v623_v45, %v604_v43  ;;  %534 = vst.msk [vmem:[#allocation4 + $0x28] sm:$0xff] %vm201_vm1, %v516_v47  ;;  %v606_v50 = vpop.f32.mrf.mxu1 }
 0x144   : > { %v732_v49 = vld [vmem:[#allocation4 + $0x18] sm:$0xff]  ;;  %v504_v52 = vpop.f32.mrf.mxu0 }
 0x145   : > { %643 = vst.msk [vmem:[#allocation4 + $0x20] sm:$0xff] %vm201_vm1, %v633_v48  ;;  %v742_v51 = vadd.f32 %v732_v49, %v711_v46 }
 0x146   : > { %v761_v53 = vld [vmem:[#allocation4 + $0x10] sm:$0xff]  ;;  %529 = vst.msk [vmem:[#allocation4] sm:$0xff] %vm201_vm1, %v504_v52 }
 0x147   : > { %771 = vst.msk [vmem:[%s1105_s18 + $0x10] sm:$0xff] %vm201_vm1, %v761_v53 }
 0x148   : > { %752 = vst.msk [vmem:[#allocation4 + $0x18] sm:$0xff] %vm201_vm1, %v742_v51 }
 0x149   : > { %v714_v55 = vpop.f32.mrf.mxu2 }
 0x14a   : > { %v624_v54 = vld [vmem:[#allocation4 + $0x28] sm:$0xff]  ;;  %v519_v56 = vpop.f32.mrf.mxu3 }
 0x14b   : > { %v634_v57 = vadd.f32 %v624_v54, %v606_v50  ;;  %535 = vst.msk [vmem:[#allocation4 + $0x30] sm:$0xff] %vm201_vm1, %v519_v56 }
 0x14c   : > { %v733_v58 = vld [vmem:[#allocation4 + $0x20] sm:$0xff]  ;;  %v609_v59 = vpop.f32.mrf.mxu1  ;;  %v506_v61 = vpop.f32.mrf.mxu0 }
 0x14d   : > { %644 = vst.msk [vmem:[#allocation4 + $0x28] sm:$0xff] %vm201_vm1, %v634_v57  ;;  %v743_v60 = vadd.f32 %v733_v58, %v714_v55  ;;  %v619_v6 = vld [vmem:[#allocation4] sm:$0xff] }
 0x14e   : > { %530 = vst.msk [vmem:[#allocation4 + $0x8] sm:$0xff] %vm201_vm1, %v506_v61 }
 0x14f   : > { %v762_v62 = vld [vmem:[#allocation4 + $0x18] sm:$0xff]  ;;  %753 = vst.msk [vmem:[#allocation4 + $0x20] sm:$0xff] %vm201_vm1, %v743_v60 }
 0x150   : > { %772 = vst.msk [vmem:[%s1105_s18 + $0x18] sm:$0xff] %vm201_vm1, %v762_v62 }
 0x151   : > { %v716_v0 = vpop.f32.mrf.mxu2 }
 0x152   : > { %v625_v63 = vld [vmem:[#allocation4 + $0x30] sm:$0xff]  ;;  %v521_v1 = vpop.f32.mrf.mxu3 }
 0x153   : > { %v635_v2 = vadd.f32 %v625_v63, %v609_v59  ;;  %536 = vst.msk [vmem:[#allocation4 + $0x38] sm:$0xff] %vm201_vm1, %v521_v1 }
 0x154   : > { %v734_v3 = vld [vmem:[#allocation4 + $0x28] sm:$0xff]  ;;  %v594_v5 = vpop.f32.mrf.mxu0  ;;  %v611_v9 = vpop.f32.mrf.mxu1 }
 0x155   : > { %645 = vst.msk [vmem:[#allocation4 + $0x30] sm:$0xff] %vm201_vm1, %v635_v2  ;;  %v744_v4 = vadd.f32 %v734_v3, %v716_v0  ;;  %v629_v8 = vadd.f32 %v619_v6, %v594_v5  ;;  %v620_v17 = vld [vmem:[#allocation4 + $0x8] sm:$0xff] }
 0x156   : > { %v763_v7 = vld [vmem:[#allocation4 + $0x20] sm:$0xff] }
 0x157   : > { %773 = vst.msk [vmem:[%s1105_s18 + $0x20] sm:$0xff] %vm201_vm1, %v763_v7 }
 0x158   : > { %754 = vst.msk [vmem:[#allocation4 + $0x28] sm:$0xff] %vm201_vm1, %v744_v4 }
 0x159   : > { %639 = vst.msk [vmem:[#allocation4] sm:$0xff] %vm201_vm1, %v629_v8  ;;  %v719_v11 = vpop.f32.mrf.mxu2 }
 0x15a   : > { %v626_v10 = vld [vmem:[#allocation4 + $0x38] sm:$0xff]  ;;  %v524_v12 = vpop.f32.mrf.mxu3 }
 0x15b   : > { %v636_v13 = vadd.f32 %v626_v10, %v611_v9  ;;  %537 = vst.msk [vmem:[#allocation4 + $0x40] sm:$0xff] %vm201_vm1, %v524_v12 }
 0x15c   : > { %v735_v14 = vld [vmem:[#allocation4 + $0x30] sm:$0xff]  ;;  %v596_v16 = vpop.f32.mrf.mxu0  ;;  %v614_v21 = vpop.f32.mrf.mxu1 }
 0x15d   : > { %646 = vst.msk [vmem:[#allocation4 + $0x38] sm:$0xff] %vm201_vm1, %v636_v13  ;;  %v745_v15 = vadd.f32 %v735_v14, %v719_v11  ;;  %v630_v18 = vadd.f32 %v620_v17, %v596_v16 }
 0x15f   : > { %v764_v19 = vld [vmem:[#allocation4 + $0x28] sm:$0xff]  ;;  %755 = vst.msk [vmem:[#allocation4 + $0x30] sm:$0xff] %vm201_vm1, %v745_v15 }
 0x160   : > { %774 = vst.msk [vmem:[%s1105_s18 + $0x28] sm:$0xff] %vm201_vm1, %v764_v19  ;;  %v729_v28 = vld [vmem:[#allocation4] sm:$0xff] }
 0x161   : > { %640 = vst.msk [vmem:[#allocation4 + $0x8] sm:$0xff] %vm201_vm1, %v630_v18  ;;  %v721_v23 = vpop.f32.mrf.mxu2 }
 0x162   : > { %v627_v22 = vld [vmem:[#allocation4 + $0x40] sm:$0xff]  ;;  %v526_v20 = vpop.f32.mrf.mxu3 }
 0x163   : > { %v637_v24 = vadd.f32 %v627_v22, %v614_v21  ;;  %538 = vst.msk [vmem:[#allocation4 + $0x48] sm:$0xff] %vm201_vm1, %v526_v20 }
 0x164   : > { %v736_v25 = vld [vmem:[#allocation4 + $0x38] sm:$0xff]  ;;  %v704_v27 = vpop.f32.mrf.mxu0  ;;  %v616_v31 = vpop.f32.mrf.mxu1 }
 0x165   : > { %647 = vst.msk [vmem:[#allocation4 + $0x40] sm:$0xff] %vm201_vm1, %v637_v24  ;;  %v746_v26 = vadd.f32 %v736_v25, %v721_v23  ;;  %v739_v30 = vadd.f32 %v729_v28, %v704_v27 }
 0x166   : > { %v765_v29 = vld [vmem:[#allocation4 + $0x30] sm:$0xff] }
 0x167   : > { %775 = vst.msk [vmem:[%s1105_s18 + $0x30] sm:$0xff] %vm201_vm1, %v765_v29 }
 0x168   : > { %756 = vst.msk [vmem:[#allocation4 + $0x38] sm:$0xff] %vm201_vm1, %v746_v26  ;;  %v730_v38 = vld [vmem:[#allocation4 + $0x8] sm:$0xff] }
 0x169   : > { %749 = vst.msk [vmem:[#allocation4] sm:$0xff] %vm201_vm1, %v739_v30  ;;  %v724_v33 = vpop.f32.mrf.mxu2 }
 0x16a   : > { %v628_v32 = vld [vmem:[#allocation4 + $0x48] sm:$0xff] }
 0x16b   : > { %v638_v34 = vadd.f32 %v628_v32, %v616_v31 }
 0x16c   : > { %v737_v35 = vld [vmem:[#allocation4 + $0x40] sm:$0xff]  ;;  %v706_v37 = vpop.f32.mrf.mxu0 }
 0x16d   : > { %648 = vst.msk [vmem:[#allocation4 + $0x48] sm:$0xff] %vm201_vm1, %v638_v34  ;;  %v747_v36 = vadd.f32 %v737_v35, %v724_v33  ;;  %v740_v39 = vadd.f32 %v730_v38, %v706_v37 }
 0x16f   : > { %v766_v40 = vld [vmem:[#allocation4 + $0x38] sm:$0xff]  ;;  %757 = vst.msk [vmem:[#allocation4 + $0x40] sm:$0xff] %vm201_vm1, %v747_v36 }
 0x170   : > { %776 = vst.msk [vmem:[%s1105_s18 + $0x38] sm:$0xff] %vm201_vm1, %v766_v40  ;;  %v759_v41 = vld [vmem:[#allocation4] sm:$0xff] }
 0x171   : > { %769 = vst.msk [vmem:[%s1105_s18] sm:$0xff] %vm201_vm1, %v759_v41  ;;  %v726_v42 = vpop.f32.mrf.mxu2 }
 0x172   : > { %750 = vst.msk [vmem:[#allocation4 + $0x8] sm:$0xff] %vm201_vm1, %v740_v39 }
 0x174   : > { %v738_v43 = vld [vmem:[#allocation4 + $0x48] sm:$0xff] }
 0x175   : > { %v748_v44 = vadd.f32 %v738_v43, %v726_v42 }
 0x176   : > { %v767_v45 = vld [vmem:[#allocation4 + $0x40] sm:$0xff] }
 0x177   : > { %777 = vst.msk [vmem:[%s1105_s18 + $0x40] sm:$0xff] %vm201_vm1, %v767_v45 }
 0x178   : > { %758 = vst.msk [vmem:[#allocation4 + $0x48] sm:$0xff] %vm201_vm1, %v748_v44 }
 0x179   : > { %v760_v46 = vld [vmem:[#allocation4 + $0x8] sm:$0xff] }
 0x17a   : > { %770 = vst.msk [vmem:[%s1105_s18 + $0x8] sm:$0xff] %vm201_vm1, %v760_v46 }
 0x17f   : > { %v768_v47 = vld [vmem:[#allocation4 + $0x48] sm:$0xff] }
 0x180   : > { %778 = vst.msk [vmem:[%s1105_s18 + $0x48] sm:$0xff] %vm201_vm1, %v768_v47 }
 0x181 PF: > { %s14_s15 = sadd.s32 1, %s906_s15  }
 0x182   : > { %p11_p4 = scmp.ge.s32.totalorder %s14_s15, 4  }
 0x184   :  { %13 = sbr.rel (!%p11_p4) target bundleno = 1 (0x1), region = 68 }

// kernel: basic_block.4
= control target key start
LH: loop header
LB: loop body
LE: loop exit
PB: predicated region body
PF: predicated region fallthrough
CT: control target
= control target key end

     0   :  { %s2369_s27 = smov 0   ;;  %s3111_s0 = inlined_call_operand.vmem [shape: f32[2,256,4], index: 0, kind: input, shape index: {}]   ;;  %s3112_s1 = inlined_call_operand.vmem [shape: f32[144,1], index: 1, kind: input, shape index: {}]   ;;  %s3113_s2 = inlined_call_operand.vmem [shape: f32[1,4], index: 2, kind: input, shape index: {}]   ;;  %s3114_s3 = inlined_call_operand.vmem [shape: f32[1,4], index: 3, kind: input, shape index: {}]   ;;  %s3115_s4 = inlined_call_operand.vmem [shape: bf16[3,12,8], index: 4, kind: input, shape index: {}]   ;;  %s3116_s5 = inlined_call_operand.vmem [shape: bf16[4,8], index: 5, kind: input, shape index: {}]   ;;  %s3117_s6 = inlined_call_operand.vmem [shape: f32[2,144,8], index: 6, kind: output, shape index: {0}]   ;;  %s3118_s7 = inlined_call_operand.vmem [shape: f32[2,2,8], index: 7, kind: output, shape index: {1}]   ;;  %s3119_s8 = inlined_call_operand.vmem [shape: f32[2,144,8], index: 8, kind: output, shape index: {2}]  }
   0x1 LB: > { %s2226_s28 = sadd.s32 4294967295, %s2318_s27   ;;  %p2230_p0 = scmp.ge.s32.totalorder %s2318_s27, 1  ;;  %s2318_s27 = sphi %s2369_s27, %s19_s27  }
   0x2   : > { %p267_p1 = scmp.lt.s32.totalorder %s2318_s27, 3 }
   0x4   : > { %p268_p2 = pnand %p2230_p0, %p267_p1 }
   0x5   : > { %p310_p3 = scmp.lt.s32.totalorder (!%p268_p2), %s2226_s28, 1  ;;  %s2321_s15 = smov (!%p268_p2), 4  }
   0x6   : > { %271 = sbr.rel (%p268_p2) target bundleno = 536 (0x218), region = 44  ;;  %s2322_s16 = smov (!%p268_p2), 8  }
   0xb   : > { %vm332_vm0 = vcmask 31744   ;;  %v2320_v0 = vmov 0.0   ;;  %s3121_s28 = smov (!%p310_p3, %s2226_s28), 1  ;;  %v2386_v1 = vld [vmem:[%s3113_s2] ss:$0 sm:$0xff]  ;;  %vm335_vm1 = vcmask 26624  }
   0xc   : > { %333 = vst.msk [vmem:[#allocation2] sm:$0xff] %vm332_vm0, %v2320_v0  ;;  %s2290_s9 = sshll.u32 %s3121_s28, 8  ;;  %v2401_v2 = vld [vmem:[%s3114_s3] ss:$0 sm:$0xff]  ;;  %vm353_vm2 = vcmask 25600   ;;  %vm812_vm3 = vcmask 64544  }
   0xd   : > { %334 = vst.msk [vmem:[#allocation2 + $0x8] sm:$0xff] %vm332_vm0, %v2320_v0  ;;  %s2396_s12 = scalar_lea.vmem %s3111_s0, %s2290_s9  ;;  %vm1059_vm4 = vcmask 97344   ;;  %vm1180_vm5 = vcmask 1045504   ;;  %vm1152_vm6 = vcmask 97280   ;;  %vm2031_vm7 = vcmask 1041408   ;;  %s2294_s21 = smul.u32 144, %s3121_s28 }
   0xe   : > { %520 = vst.msk [vmem:[#allocation2 + $0x133] sm:$0xff] %vm332_vm0, %v2320_v0  ;;  %v337_v3 = vld [vmem:[%s2396_s12] sm:$0xff]  ;;  %v338_v4 = vld [vmem:[%s2396_s12 + $0x8] sm:$0xff]  ;;  %v355_v5 = vld [vmem:[%s2396_s12 + $0x10] sm:$0xff]  ;;  %vm1238_vm8 = vcmask 64512   ;;  %s2234_s14 = sshll.u32 %s3121_s28, 1 }
   0xf   : > { %521 = vst.msk [vmem:[#allocation2 + $0x13b] sm:$0xff] %vm332_vm0, %v2320_v0  ;;  %v342_v6 = vmul.f32 %v2386_v1, %v337_v3  ;;  %v343_v7 = vmul.f32 %v2386_v1, %v338_v4  ;;  %v356_v8 = vld [vmem:[%s2396_s12 + $0x18] sm:$0xff]  ;;  %v357_v9 = vmul.f32 %v2386_v1, %v355_v5  ;;  %v366_v21 = vld [vmem:[%s2396_s12 + $0x20] sm:$0xff]  ;;  %v367_v22 = vld [vmem:[%s2396_s12 + $0x28] sm:$0xff]  ;;  %s2900_s24 = scalar_lea.vmem %s3117_s6, %s2294_s21  ;;  %s2943_s13 = scalar_lea.vmem %s3119_s8, %s2294_s21  ;;  %vm1860_vm9 = vcmask 57344  }
  0x10   : > { %522 = vst.msk [vmem:[#allocation2 + $0x143] sm:$0xff] %vm332_vm0, %v2320_v0  ;;  %v358_v10 = vmul.f32 %v2386_v1, %v356_v8  ;;  %v377_v25 = vld [vmem:[%s2396_s12 + $0x30] sm:$0xff]  ;;  %v368_v26 = vmul.f32 %v2386_v1, %v366_v21  ;;  %v369_v27 = vmul.f32 %v2386_v1, %v367_v22  ;;  %v378_v32 = vld [vmem:[%s2396_s12 + $0x38] sm:$0xff]  ;;  %v388_v43 = vld [vmem:[%s2396_s12 + $0x40] sm:$0xff]  ;;  %s323_s17 = scalar_lea.vmem %s3118_s7, %s2234_s14 }
  0x11   : > { %336 = vst.msk [vmem:[#allocation2 + $0x10] sm:$0x7] %vm335_vm1, %v2320_v0  ;;  %v347_v12 = vadd.f32 %v2401_v2, %v342_v6  ;;  %v348_v14 = vadd.f32 %v2401_v2, %v343_v7  ;;  %v359_v15 = vadd.f32 %v2401_v2, %v357_v9  ;;  %v379_v28 = vmul.f32 %v2386_v1, %v377_v25  ;;  %v399_v50 = vld [vmem:[%s2396_s12 + $0x50] sm:$0xff]  ;;  %v400_v51 = vld [vmem:[%s2396_s12 + $0x58] sm:$0xff]  ;;  %v389_v56 = vld [vmem:[%s2396_s12 + $0x48] sm:$0xff] }
  0x12   : > { %354 = vst.msk [vmem:[#allocation2 + $0x23] sm:$0x3] %vm353_vm2, %v2320_v0  ;;  %v360_v16 = vadd.f32 %v2401_v2, %v358_v10  ;;  %v370_v30 = vadd.f32 %v2401_v2, %v368_v26  ;;  %v371_v31 = vadd.f32 %v2401_v2, %v369_v27  ;;  %v380_v34 = vmul.f32 %v2386_v1, %v378_v32  ;;  %v410_v3 = vld [vmem:[%s2396_s12 + $0x60] sm:$0xff]  ;;  %v411_v10 = vld [vmem:[%s2396_s12 + $0x68] sm:$0xff]  ;;  %v422_v26 = vld [vmem:[%s2396_s12 + $0x78] sm:$0xff] }
  0x13   : > { %365 = vst.msk [vmem:[#allocation2 + $0x35] sm:$0x3] %vm353_vm2, %v2320_v0  ;;  %v349_v17 = vmax.f32 %v347_v12, 0.0  ;;  %v350_v18 = vmax.f32 %v348_v14, 0.0  ;;  %v361_v19 = vmax.f32 %v359_v15, 0.0  ;;  %v381_v33 = vadd.f32 %v2401_v2, %v379_v28 }
  0x14   : > { %v607_v11 = vld [vmem:[#allocation2 + $0x1] sm:$0xff]  ;;  %376 = vst.msk [vmem:[#allocation2 + $0x47] sm:$0x3] %vm353_vm2, %v2320_v0  ;;  %v362_v20 = vmax.f32 %v360_v16, 0.0  ;;  %v372_v37 = vmax.f32 %v370_v30, 0.0  ;;  %v382_v38 = vadd.f32 %v2401_v2, %v380_v34  ;;  %v373_v39 = vmax.f32 %v371_v31, 0.0 }
  0x15   : > { %v854_v13 = vld [vmem:[#allocation2 + $0x2] sm:$0xff]  ;;  %689 = vrot.lane.b32.xlu0 %v607_v11, %s2321_s15  ;;  %387 = vst.msk [vmem:[#allocation2 + $0x59] sm:$0x3] %vm353_vm2, %v2320_v0  ;;  %v383_v41 = vmax.f32 %v381_v33, 0.0  ;;  %v390_v44 = vmul.f32 %v2386_v1, %v388_v43  ;;  %v401_v52 = vmul.f32 %v2386_v1, %v399_v50  ;;  %v402_v55 = vmul.f32 %v2386_v1, %v400_v51  ;;  %v444_v50 = vld [vmem:[%s2396_s12 + $0x98] sm:$0xff] }
  0x16   : > { %936 = vrot.lane.b32.xlu2 %v854_v13, %s2322_s16  ;;  %398 = vst.msk [vmem:[#allocation2 + $0x6b] sm:$0x3] %vm353_vm2, %v2320_v0  ;;  %v384_v42 = vmax.f32 %v382_v38, 0.0  ;;  %v391_v58 = vmul.f32 %v2386_v1, %v389_v56  ;;  %v412_v4 = vmul.f32 %v2386_v1, %v410_v3  ;;  %v413_v11 = vmul.f32 %v2386_v1, %v411_v10 }
  0x17   : > { %351 = vst.msk [vmem:[#allocation2 + $0x13] sm:$0xff] %vm332_vm0, %v349_v17  ;;  %v392_v47 = vadd.f32 %v2401_v2, %v390_v44  ;;  %v403_v57 = vadd.f32 %v2401_v2, %v401_v52  ;;  %v404_v59 = vadd.f32 %v2401_v2, %v402_v55  ;;  %v421_v17 = vld [vmem:[%s2396_s12 + $0x70] sm:$0xff]  ;;  %v446_v51 = vmul.f32 %v2386_v1, %v444_v50 }
  0x18   : > { %352 = vst.msk [vmem:[#allocation2 + $0x1b] sm:$0xff] %vm332_vm0, %v350_v18  ;;  %v608_v23 = vld [vmem:[#allocation2 + $0x9] sm:$0xff]  ;;  %v393_v62 = vadd.f32 %v2401_v2, %v391_v58  ;;  %v414_v7 = vadd.f32 %v2401_v2, %v412_v4  ;;  %v415_v14 = vadd.f32 %v2401_v2, %v413_v11  ;;  %v423_v18 = vmul.f32 %v2386_v1, %v421_v17 }
  0x19   : > { %363 = vst.msk [vmem:[#allocation2 + $0x25] sm:$0xff] %vm332_vm0, %v361_v19  ;;  %v855_v24 = vld [vmem:[#allocation2 + $0xa] sm:$0xff]  ;;  %v394_v49 = vmax.f32 %v392_v47, 0.0  ;;  %v405_v61 = vmax.f32 %v403_v57, 0.0  ;;  %v406_v63 = vmax.f32 %v404_v59, 0.0 }
  0x1a   : > { %364 = vst.msk [vmem:[#allocation2 + $0x2d] sm:$0xff] %vm332_vm0, %v362_v20  ;;  %v416_v9 = vmax.f32 %v414_v7, 0.0  ;;  %v417_v16 = vmax.f32 %v415_v14, 0.0  ;;  %v425_v21 = vadd.f32 %v2401_v2, %v423_v18  ;;  %v526_v58 = vld [vmem:[#allocation2 + $0x8] sm:$0xff]  ;;  %v465_v11 = vld [vmem:[%s2396_s12 + $0xb0] sm:$0xff] }
  0x1b   : > { %409 = vst.msk [vmem:[#allocation2 + $0x7d] sm:$0x3] %vm353_vm2, %v2320_v0  ;;  %v455_v59 = vld [vmem:[%s2396_s12 + $0xa8] sm:$0xff] }
  0x1c   : > { %420 = vst.msk [vmem:[#allocation2 + $0x8f] sm:$0x3] %vm353_vm2, %v2320_v0 }
  0x1d   : > { %691 = vrot.lane.b32.xlu0 %v608_v23, %s2321_s15  ;;  %431 = vst.msk [vmem:[#allocation2 + $0xa1] sm:$0x3] %vm353_vm2, %v2320_v0  ;;  %v427_v23 = vmax.f32 %v425_v21, 0.0 }
  0x1e   : > { %938 = vrot.lane.b32.xlu2 %v855_v24, %s2322_s16  ;;  %v609_v29 = vld [vmem:[#allocation2 + $0x11] sm:$0xff]  ;;  %442 = vst.msk [vmem:[#allocation2 + $0xb3] sm:$0x3] %vm353_vm2, %v2320_v0  ;;  %v432_v24 = vld [vmem:[%s2396_s12 + $0x80] sm:$0xff] }
  0x1f   : > { %693 = vrot.lane.b32.xlu1 %v609_v29, %s2321_s15  ;;  %453 = vst.msk [vmem:[#allocation2 + $0xc5] sm:$0x3] %vm353_vm2, %v2320_v0  ;;  %v856_v35 = vld [vmem:[#allocation2 + $0x12] sm:$0xff]  ;;  %v857_v48 = vld [vmem:[#allocation2 + $0x1a] sm:$0xff]  ;;  %v434_v25 = vmul.f32 %v2386_v1, %v432_v24  ;;  %v424_v29 = vmul.f32 %v2386_v1, %v422_v26 }
  0x20   : > { %464 = vst.msk [vmem:[#allocation2 + $0xd7] sm:$0x3] %vm353_vm2, %v2320_v0  ;;  %v611_v36 = vld [vmem:[#allocation2 + $0x21] sm:$0xff]  ;;  %v610_v40 = vld [vmem:[#allocation2 + $0x19] sm:$0xff] }
  0x21   : > { %475 = vst.msk [vmem:[#allocation2 + $0xe9] sm:$0x3] %vm353_vm2, %v2320_v0  ;;  %v612_v45 = vld [vmem:[#allocation2 + $0x29] sm:$0xff]  ;;  %v436_v30 = vadd.f32 %v2401_v2, %v434_v25  ;;  %v426_v31 = vadd.f32 %v2401_v2, %v424_v29  ;;  %v2291_v29 = vld [vmem:[%s3115_s4] sm:$0x30] }
  0x22   : > { %486 = vst.msk [vmem:[#allocation2 + $0xfb] sm:$0x3] %vm353_vm2, %v2320_v0  ;;  %v858_v46 = vld [vmem:[#allocation2 + $0x22] sm:$0xff]  ;;  %v859_v53 = vld [vmem:[#allocation2 + $0x2a] sm:$0xff] }
  0x23   : > { %497 = vst.msk [vmem:[#allocation2 + $0x10d] sm:$0x3] %vm353_vm2, %v2320_v0  ;;  %v438_v33 = vmax.f32 %v436_v30, 0.0  ;;  %v428_v34 = vmax.f32 %v426_v31, 0.0 }
  0x24   : > { %508 = vst.msk [vmem:[#allocation2 + $0x11f] sm:$0x3] %vm353_vm2, %v2320_v0 }
  0x25   : > { %940 = vrot.lane.b32.xlu0 %v856_v35, %s2322_s16  ;;  %519 = vst.msk [vmem:[#allocation2 + $0x131] sm:$0x3] %vm353_vm2, %v2320_v0  ;;  %v395_v0 = vmax.f32 %v393_v62, 0.0  ;;  %v433_v35 = vld [vmem:[%s2396_s12 + $0x88] sm:$0xff]  ;;  %v457_v62 = vmul.f32 %v2386_v1, %v455_v59 }
  0x26   : > { %697 = vrot.lane.b32.xlu2 %v611_v36, %s2321_s15  ;;  %374 = vst.msk [vmem:[#allocation2 + $0x37] sm:$0xff] %vm332_vm0, %v372_v37  ;;  %v435_v36 = vmul.f32 %v2386_v1, %v433_v35  ;;  %v2292_v59 = vld [vmem:[%s3115_s4 + $0x8] sm:$0x30] }
  0x27   : > { %695 = vrot.lane.b32.xlu1 %v610_v40, %s2321_s15  ;;  %375 = vst.msk [vmem:[#allocation2 + $0x3f] sm:$0xff] %vm332_vm0, %v373_v39 }
  0x28   : > { %385 = vst.msk [vmem:[#allocation2 + $0x49] sm:$0xff] %vm332_vm0, %v383_v41  ;;  %v437_v39 = vadd.f32 %v2401_v2, %v435_v36  ;;  %v476_v36 = vld [vmem:[%s2396_s12 + $0xc0] sm:$0xff] }
  0x29   : > { %386 = vst.msk [vmem:[#allocation2 + $0x51] sm:$0xff] %vm332_vm0, %v384_v42  ;;  %v443_v42 = vld [vmem:[%s2396_s12 + $0x90] sm:$0xff] }
  0x2a   : > { %396 = vst.msk [vmem:[#allocation2 + $0x5b] sm:$0xff] %vm332_vm0, %v394_v49  ;;  %v439_v41 = vmax.f32 %v437_v39, 0.0  ;;  %v445_v43 = vmul.f32 %v2386_v1, %v443_v42  ;;  %v525_v49 = vld [vmem:[#allocation2] sm:$0xff]  ;;  %v478_v39 = vmul.f32 %v2386_v1, %v476_v36 }
  0x2b   : > { %407 = vst.msk [vmem:[#allocation2 + $0x6d] sm:$0xff] %vm332_vm0, %v405_v61  ;;  %v527_v61 = vld [vmem:[#allocation2 + $0x10] sm:$0xff] }
  0x2c   : > { %408 = vst.msk [vmem:[#allocation2 + $0x75] sm:$0xff] %vm332_vm0, %v406_v63  ;;  %v454_v63 = vld [vmem:[%s2396_s12 + $0xa0] sm:$0xff] }
  0x2d   : > { %699 = vrot.lane.b32.xlu0 %v612_v45, %s2321_s15  ;;  %v613_v60 = vld [vmem:[#allocation2 + $0x31] sm:$0xff]  ;;  %397 = vst.msk [vmem:[#allocation2 + $0x63] sm:$0xff] %vm332_vm0, %v395_v0  ;;  %v456_v4 = vmul.f32 %v2386_v1, %v454_v63 }
  0x2e   : > { %944 = vrot.lane.b32.xlu2 %v858_v46, %s2322_s16  ;;  %v614_v54 = vld [vmem:[#allocation2 + $0x39] sm:$0xff]  ;;  %v615_v5 = vld [vmem:[#allocation2 + $0x41] sm:$0xff]  ;;  %418 = vst.msk [vmem:[#allocation2 + $0x7f] sm:$0xff] %vm332_vm0, %v416_v9  ;;  %v447_v46 = vadd.f32 %v2401_v2, %v445_v43 }
  0x2f   : > { %942 = vrot.lane.b32.xlu1 %v857_v48, %s2322_s16  ;;  %v862_v6 = vld [vmem:[#allocation2 + $0x42] sm:$0xff]  ;;  %v860_v8 = vld [vmem:[#allocation2 + $0x32] sm:$0xff]  ;;  %v861_v15 = vld [vmem:[#allocation2 + $0x3a] sm:$0xff]  ;;  %419 = vst.msk [vmem:[#allocation2 + $0x87] sm:$0xff] %vm332_vm0, %v417_v16 }
  0x30   : > { %v616_v12 = vld [vmem:[#allocation2 + $0x49] sm:$0xff]  ;;  %v864_v19 = vld [vmem:[#allocation2 + $0x52] sm:$0xff]  ;;  %429 = vst.msk [vmem:[#allocation2 + $0x91] sm:$0xff] %vm332_vm0, %v427_v23  ;;  %v449_v48 = vmax.f32 %v447_v46, 0.0 }
  0x31   : > { %v863_v13 = vld [vmem:[#allocation2 + $0x4a] sm:$0xff]  ;;  %v865_v27 = vld [vmem:[#allocation2 + $0x5a] sm:$0xff]  ;;  %440 = vst.msk [vmem:[#allocation2 + $0xa3] sm:$0xff] %vm332_vm0, %v438_v33 }
  0x32   : > { %v617_v22 = vld [vmem:[#allocation2 + $0x51] sm:$0xff]  ;;  %v618_v32 = vld [vmem:[#allocation2 + $0x59] sm:$0xff]  ;;  %430 = vst.msk [vmem:[#allocation2 + $0x99] sm:$0xff] %vm332_vm0, %v428_v34  ;;  %v477_v46 = vld [vmem:[%s2396_s12 + $0xc8] sm:$0xff] }
  0x33   : > { %v621_v37 = vld [vmem:[#allocation2 + $0x71] sm:$0xff]  ;;  %441 = vst.msk [vmem:[#allocation2 + $0xab] sm:$0xff] %vm332_vm0, %v439_v41  ;;  %v480_v41 = vadd.f32 %v2401_v2, %v478_v39 }
  0x34   : > { %v619_v20 = vld [vmem:[#allocation2 + $0x61] sm:$0xff]  ;;  %v620_v28 = vld [vmem:[#allocation2 + $0x69] sm:$0xff]  ;;  %v868_v38 = vld [vmem:[#allocation2 + $0x72] sm:$0xff]  ;;  %451 = vst.msk [vmem:[#allocation2 + $0xb5] sm:$0xff] %vm332_vm0, %v449_v48 }
  0x35   : > { %946 = vrot.lane.b32.xlu0 %v859_v53, %s2322_s16  ;;  %v866_v40 = vld [vmem:[#allocation2 + $0x62] sm:$0xff]  ;;  %v622_v44 = vld [vmem:[#allocation2 + $0x79] sm:$0xff]  ;;  %v867_v47 = vld [vmem:[#allocation2 + $0x6a] sm:$0xff]  ;;  %566 = vst.msk [vmem:[#allocation3] sm:$0xff] %vm332_vm0, %v525_v49 }
  0x36   : > { %703 = vrot.lane.b32.xlu2 %v614_v54, %s2321_s15  ;;  %v869_v45 = vld [vmem:[#allocation2 + $0x7a] sm:$0xff]  ;;  %v870_v52 = vld [vmem:[#allocation2 + $0x82] sm:$0xff]  ;;  %v448_v54 = vadd.f32 %v2401_v2, %v446_v51  ;;  %567 = vst.msk [vmem:[#allocation3 + $0x8] sm:$0xff] %vm332_vm0, %v526_v58  ;;  %v531_v33 = vld [vmem:[#allocation2 + $0x30] sm:$0xff] }
  0x37   : > { %701 = vrot.lane.b32.xlu1 %v613_v60, %s2321_s15  ;;  %v625_v53 = vld [vmem:[#allocation2 + $0x91] sm:$0xff]  ;;  %v623_v55 = vld [vmem:[#allocation2 + $0x81] sm:$0xff]  ;;  %568 = vst.msk [vmem:[#allocation3 + $0x10] sm:$0xff] %vm332_vm0, %v527_v61  ;;  %v624_v7 = vld [vmem:[#allocation2 + $0x89] sm:$0xff] }
  0x38   : > { %v450_v56 = vmax.f32 %v448_v54, 0.0  ;;  %v529_v60 = vld [vmem:[#allocation2 + $0x20] sm:$0xff]  ;;  %v871_v0 = vld [vmem:[#allocation2 + $0x8a] sm:$0xff]  ;;  %v532_v21 = vld [vmem:[#allocation2 + $0x38] sm:$0xff]  ;;  %572 = vst.msk [vmem:[#allocation3 + $0x30] sm:$0xff] %vm332_vm0, %v531_v33 }
  0x39   : > { %v626_v3 = vld [vmem:[#allocation2 + $0x99] sm:$0xff]  ;;  %570 = vst.msk [vmem:[#allocation3 + $0x20] sm:$0xff] %vm332_vm0, %v529_v60  ;;  %v627_v14 = vld [vmem:[#allocation2 + $0xa1] sm:$0xff] }
  0x3a   : > { %452 = vst.msk [vmem:[#allocation2 + $0xbd] sm:$0xff] %vm332_vm0, %v450_v56  ;;  %v872_v17 = vld [vmem:[#allocation2 + $0x92] sm:$0xff]  ;;  %v628_v23 = vld [vmem:[#allocation2 + $0xa9] sm:$0xff] }
  0x3b   : > { %v875_v24 = vld [vmem:[#allocation2 + $0xaa] sm:$0xff]  ;;  %573 = vst.msk [vmem:[#allocation3 + $0x38] sm:$0xff] %vm332_vm0, %v532_v21  ;;  %v488_v48 = vld [vmem:[%s2396_s12 + $0xd8] sm:$0xff] }
  0x3c   : > { %v490_v54 = vmul.f32 %v2386_v1, %v488_v48  ;;  %v2253_v58 = vld [vmem:[%s3115_s4 + $0x8] sm:$0xf]  ;;  %v535_v21 = vld [vmem:[#allocation2 + $0x50] sm:$0xff]  ;;  %v536_v33 = vld [vmem:[#allocation2 + $0x58] sm:$0xff] }
  0x3d   : > { %705 = vrot.lane.b32.xlu0 %v615_v5, %s2321_s15  ;;  %v459_v5 = vadd.f32 %v2401_v2, %v457_v62  ;;  %v2254_v63 = vor.u32 %v2292_v59, %v2253_v58  ;;  %576 = vst.msk [vmem:[#allocation3 + $0x50] sm:$0xff] %vm332_vm0, %v535_v21  ;;  %v543_v58 = vld [vmem:[#allocation2 + $0x90] sm:$0xff] }
  0x3e   : > { %952 = vrot.lane.b32.xlu2 %v862_v6, %s2322_s16  ;;  %v458_v6 = vadd.f32 %v2401_v2, %v456_v4  ;;  %v492_v60 = vadd.f32 %v2401_v2, %v490_v54  ;;  %577 = vst.msk [vmem:[#allocation3 + $0x58] sm:$0xff] %vm332_vm0, %v536_v33 }
  0x3f   : > { %948 = vrot.lane.b32.xlu1 %v860_v8, %s2322_s16  ;;  %v461_v8 = vmax.f32 %v459_v5, 0.0  ;;  %v1338_v4 = vsel %vm1180_vm5, %v2254_v63, 0  ;;  %v537_v5 = vld [vmem:[#allocation2 + $0x60] sm:$0xff]  ;;  %584 = vst.msk [vmem:[#allocation3 + $0x90] sm:$0xff] %vm332_vm0, %v543_v58 }
  0x40   : > { %v460_v9 = vmax.f32 %v458_v6, 0.0  ;;  %1347 = vmatpush.bf16.msra.mxu1 %v1338_v4  ;;  %578 = vst.msk [vmem:[#allocation3 + $0x60] sm:$0xff] %vm332_vm0, %v537_v5 }
  0x41   : > { %463 = vst.msk [vmem:[#allocation2 + $0xcf] sm:$0xff] %vm332_vm0, %v461_v8  ;;  %v877_v50 = vld [vmem:[#allocation2 + $0xba] sm:$0xff] }
  0x42   : > { %462 = vst.msk [vmem:[#allocation2 + $0xc7] sm:$0xff] %vm332_vm0, %v460_v9  ;;  %v630_v56 = vld [vmem:[#allocation2 + $0xb9] sm:$0xff] }
  0x45   : > { %707 = vrot.lane.b32.xlu0 %v616_v12, %s2321_s15  ;;  %v528_v12 = vld [vmem:[#allocation2 + $0x18] sm:$0xff] }
  0x46   : > { %954 = vrot.lane.b32.xlu2 %v863_v13, %s2322_s16  ;;  %v467_v13 = vmul.f32 %v2386_v1, %v465_v11  ;;  %569 = vst.msk [vmem:[#allocation3 + $0x18] sm:$0xff] %vm332_vm0, %v528_v12  ;;  %v494_v11 = vmax.f32 %v492_v60, 0.0 }
  0x47   : > { %950 = vrot.lane.b32.xlu1 %v861_v15, %s2322_s16  ;;  %v874_v15 = vld [vmem:[#allocation2 + $0xa2] sm:$0xff] }
  0x48   : > { %v469_v16 = vadd.f32 %v2401_v2, %v467_v13  ;;  %v633_v9 = vld [vmem:[#allocation2 + $0xd1] sm:$0xff]  ;;  %496 = vst.msk [vmem:[#allocation2 + $0x105] sm:$0xff] %vm332_vm0, %v494_v11 }
  0x49   : > { %v632_v51 = vld [vmem:[#allocation2 + $0xc9] sm:$0xff] }
  0x4a   : > { %v471_v18 = vmax.f32 %v469_v16, 0.0  ;;  %v2293_v16 = vld [vmem:[%s3115_s4 + $0x10] sm:$0x30] }
  0x4c   : > { %473 = vst.msk [vmem:[#allocation2 + $0xd9] sm:$0xff] %vm332_vm0, %v471_v18 }
  0x4d   : > { %956 = vrot.lane.b32.xlu0 %v864_v19, %s2322_s16 }
  0x4e   : > { %713 = vrot.lane.b32.xlu2 %v619_v20, %s2321_s15  ;;  %v530_v20 = vld [vmem:[#allocation2 + $0x28] sm:$0xff] }
  0x4f   : > { %709 = vrot.lane.b32.xlu1 %v617_v22, %s2321_s15  ;;  %571 = vst.msk [vmem:[#allocation3 + $0x28] sm:$0xff] %vm332_vm0, %v530_v20  ;;  %v466_v22 = vld [vmem:[%s2396_s12 + $0xb8] sm:$0xff]  ;;  %v538_v20 = vld [vmem:[#allocation2 + $0x68] sm:$0xff] }
  0x50   : > { %v468_v25 = vmul.f32 %v2386_v1, %v466_v22  ;;  %579 = vst.msk [vmem:[#allocation3 + $0x68] sm:$0xff] %vm332_vm0, %v538_v20  ;;  %v542_v20 = vld [vmem:[#allocation2 + $0x88] sm:$0xff] }
  0x51   : > { %583 = vst.msk [vmem:[#allocation3 + $0x88] sm:$0xff] %vm332_vm0, %v542_v20 }
  0x52   : > { %v470_v26 = vadd.f32 %v2401_v2, %v468_v25 }
  0x54   : > { %v472_v34 = vmax.f32 %v470_v26, 0.0  ;;  %v634_v26 = vld [vmem:[#allocation2 + $0xd9] sm:$0xff] }
  0x55   : > { %958 = vrot.lane.b32.xlu0 %v865_v27, %s2322_s16  ;;  %v873_v27 = vld [vmem:[#allocation2 + $0x9a] sm:$0xff] }
  0x56   : > { %715 = vrot.lane.b32.xlu2 %v620_v28, %s2321_s15  ;;  %v2238_v28 = vld [vmem:[%s3115_s4] sm:$0xf]  ;;  %474 = vst.msk [vmem:[#allocation2 + $0xe1] sm:$0xff] %vm332_vm0, %v472_v34 }
  0x57   : > { %711 = vrot.lane.b32.xlu1 %v618_v32, %s2321_s15  ;;  %v2239_v32 = vor.u32 %v2291_v29, %v2238_v28 }
  0x59   : > { %v1182_v35 = vsel %vm1180_vm5, %v2239_v32, 0 }
  0x5a   : > { %1191 = vmatpush.bf16.msra.mxu0 %v1182_v35  ;;  %v509_v35 = vld [vmem:[%s2396_s12 + $0xf0] sm:$0xff] }
  0x5d   : > { %717 = vrot.lane.b32.xlu0 %v621_v37, %s2321_s15  ;;  %v876_v37 = vld [vmem:[#allocation2 + $0xb2] sm:$0xff]  ;;  %v882_v39 = vld [vmem:[#allocation2 + $0xe2] sm:$0xff] }
  0x5e   : > { %964 = vrot.lane.b32.xlu2 %v868_v38, %s2322_s16  ;;  %v631_v38 = vld [vmem:[#allocation2 + $0xc1] sm:$0xff] }
  0x5f   : > { %960 = vrot.lane.b32.xlu1 %v866_v40, %s2322_s16  ;;  %v629_v40 = vld [vmem:[#allocation2 + $0xb1] sm:$0xff] }
  0x65   : > { %719 = vrot.lane.b32.xlu0 %v622_v44, %s2321_s15  ;;  %v533_v44 = vld [vmem:[#allocation2 + $0x40] sm:$0xff] }
  0x66   : > { %966 = vrot.lane.b32.xlu2 %v869_v45, %s2322_s16  ;;  %v482_v45 = vmax.f32 %v480_v41, 0.0  ;;  %574 = vst.msk [vmem:[#allocation3 + $0x40] sm:$0xff] %vm332_vm0, %v533_v44 }
  0x67   : > { %962 = vrot.lane.b32.xlu1 %v867_v47, %s2322_s16  ;;  %v487_v47 = vld [vmem:[%s2396_s12 + $0xd0] sm:$0xff] }
  0x68   : > { %484 = vst.msk [vmem:[#allocation2 + $0xeb] sm:$0xff] %vm332_vm0, %v482_v45 }
  0x6d   : > { %968 = vrot.lane.b32.xlu0 %v870_v52, %s2322_s16  ;;  %v479_v52 = vmul.f32 %v2386_v1, %v477_v46 }
  0x6e   : > { %725 = vrot.lane.b32.xlu2 %v625_v53, %s2321_s15  ;;  %v489_v53 = vmul.f32 %v2386_v1, %v487_v47  ;;  %v539_v47 = vld [vmem:[#allocation2 + $0x70] sm:$0xff] }
  0x6f   : > { %721 = vrot.lane.b32.xlu1 %v623_v55, %s2321_s15  ;;  %v481_v55 = vadd.f32 %v2401_v2, %v479_v52  ;;  %580 = vst.msk [vmem:[#allocation3 + $0x70] sm:$0xff] %vm332_vm0, %v539_v47  ;;  %v636_v54 = vld [vmem:[#allocation2 + $0xe9] sm:$0xff]  ;;  %v645_v47 = vld [vmem:[#allocation2 + $0x131] sm:$0xff] }
  0x70   : > { %v2552_v57 = vpop.permute.xlu2 %936 }
  0x75   : > { %970 = vrot.lane.b32.xlu0 %v871_v0, %s2322_s16  ;;  %v534_v0 = vld [vmem:[#allocation2 + $0x48] sm:$0xff] }
  0x76   : > { %727 = vrot.lane.b32.xlu2 %v626_v3, %s2321_s15  ;;  %v483_v3 = vmax.f32 %v481_v55, 0.0  ;;  %575 = vst.msk [vmem:[#allocation3 + $0x48] sm:$0xff] %vm332_vm0, %v534_v0 }
  0x77   : > { %723 = vrot.lane.b32.xlu1 %v624_v7, %s2321_s15  ;;  %v498_v7 = vld [vmem:[%s2396_s12 + $0xe0] sm:$0xff] }
  0x78   : > { %v939_v10 = vpop.permute.xlu2 %938  ;;  %v500_v12 = vmul.f32 %v2386_v1, %v498_v7  ;;  %485 = vst.msk [vmem:[#allocation2 + $0xf3] sm:$0xff] %vm332_vm0, %v483_v3 }
  0x7a   : > { %v502_v13 = vadd.f32 %v2401_v2, %v500_v12  ;;  %v541_v12 = vld [vmem:[#allocation2 + $0x80] sm:$0xff] }
  0x7b   : > { %582 = vst.msk [vmem:[#allocation3 + $0x80] sm:$0xff] %vm332_vm0, %v541_v12 }
  0x7c   : > { %v504_v22 = vmax.f32 %v502_v13, 0.0 }
  0x7d   : > { %729 = vrot.lane.b32.xlu0 %v627_v14, %s2321_s15  ;;  %v878_v14 = vld [vmem:[#allocation2 + $0xc2] sm:$0xff] }
  0x7e   : > { %976 = vrot.lane.b32.xlu2 %v874_v15, %s2322_s16  ;;  %v2268_v15 = vld [vmem:[%s3115_s4 + $0x10] sm:$0xf]  ;;  %506 = vst.msk [vmem:[#allocation2 + $0x10f] sm:$0xff] %vm332_vm0, %v504_v22 }
  0x7f   : > { %972 = vrot.lane.b32.xlu1 %v872_v17, %s2322_s16  ;;  %v884_v3 = vld [vmem:[#allocation2 + $0xf2] sm:$0xff] }
  0x80   : > { %v698_v19 = vpop.permute.xlu2 %697 }
  0x81   : > { %817 = vst.msk [vmem:[#allocation3 + $0x20] sm:$0xff] %vm812_vm3, %v698_v19  ;;  %v2269_v19 = vor.u32 %v2293_v16, %v2268_v15 }
  0x85   : > { %731 = vrot.lane.b32.xlu0 %v628_v23, %s2321_s15  ;;  %v1529_v23 = vsel %vm1180_vm5, %v2269_v19, 0  ;;  %v640_v15 = vld [vmem:[#allocation2 + $0x109] sm:$0xff] }
  0x86   : > { %978 = vrot.lane.b32.xlu2 %v875_v24, %s2322_s16  ;;  %v499_v24 = vld [vmem:[%s2396_s12 + $0xe8] sm:$0xff]  ;;  %1538 = vmatpush.bf16.msra.mxu2 %v1529_v23 }
  0x87   : > { %v690_v30 = vpop.permute.xlu0 %689  ;;  %974 = vrot.lane.b32.xlu1 %v873_v27, %s2322_s16  ;;  %v881_v27 = vld [vmem:[#allocation2 + $0xda] sm:$0xff]  ;;  %v501_v28 = vmul.f32 %v2386_v1, %v499_v24  ;;  %v887_v16 = vld [vmem:[#allocation2 + $0x10a] sm:$0xff] }
  0x88   : > { %v945_v31 = vpop.permute.xlu2 %944  ;;  %813 = vst.msk [vmem:[#allocation3] sm:$0xff] %vm812_vm3, %v690_v30  ;;  %v879_v30 = vld [vmem:[#allocation2 + $0xca] sm:$0xff] }
  0x89   : > { %1060 = vst.msk [vmem:[#allocation3] sm:$0xff] %vm1059_vm4, %v2552_v57  ;;  %v491_v57 = vadd.f32 %v2401_v2, %v489_v53  ;;  %v503_v29 = vadd.f32 %v2401_v2, %v501_v28 }
  0x8a   : > { %1064 = vst.msk [vmem:[#allocation3 + $0x20] sm:$0xff] %vm1059_vm4, %v945_v31 }
  0x8b   : > { %v493_v6 = vmax.f32 %v491_v57, 0.0  ;;  %v505_v34 = vmax.f32 %v503_v29, 0.0 }
  0x8d   : > { %980 = vrot.lane.b32.xlu0 %v876_v37, %s2322_s16  ;;  %495 = vst.msk [vmem:[#allocation2 + $0xfd] sm:$0xff] %vm332_vm0, %v493_v6  ;;  %v544_v6 = vld [vmem:[#allocation2 + $0x98] sm:$0xff] }
  0x8e   : > { %737 = vrot.lane.b32.xlu2 %v631_v38, %s2321_s15  ;;  %507 = vst.msk [vmem:[#allocation2 + $0x117] sm:$0xff] %vm332_vm0, %v505_v34 }
  0x8f   : > { %v692_v42 = vpop.permute.xlu0 %691  ;;  %733 = vrot.lane.b32.xlu1 %v629_v40, %s2321_s15  ;;  %v511_v40 = vmul.f32 %v2386_v1, %v509_v35  ;;  %585 = vst.msk [vmem:[#allocation3 + $0x98] sm:$0xff] %vm332_vm0, %v544_v6 }
  0x90   : > { %v704_v43 = vpop.permute.xlu2 %703  ;;  %814 = vst.msk [vmem:[#allocation3 + $0x8] sm:$0xff] %vm812_vm3, %v692_v42  ;;  %v637_v42 = vld [vmem:[#allocation2 + $0xf1] sm:$0xff] }
  0x91   : > { %1061 = vst.msk [vmem:[#allocation3 + $0x8] sm:$0xff] %vm1059_vm4, %v939_v10  ;;  %v694_v49 = vpop.permute.xlu1 %693  ;;  %v880_v10 = vld [vmem:[#allocation2 + $0xd2] sm:$0xff]  ;;  %v513_v44 = vadd.f32 %v2401_v2, %v511_v40 }
  0x92   : > { %820 = vst.msk [vmem:[#allocation3 + $0x38] sm:$0xff] %vm812_vm3, %v704_v43  ;;  %v635_v43 = vld [vmem:[#allocation2 + $0xe1] sm:$0xff] }
  0x93   : > { %815 = vst.msk [vmem:[#allocation3 + $0x10] sm:$0xff] %vm812_vm3, %v694_v49  ;;  %v515_v48 = vmax.f32 %v513_v44, 0.0  ;;  %v510_v49 = vld [vmem:[%s2396_s12 + $0xf8] sm:$0xff] }
  0x94   : > { %v512_v52 = vmul.f32 %v2386_v1, %v510_v49  ;;  %v638_v53 = vld [vmem:[#allocation2 + $0xf9] sm:$0xff]  ;;  %v639_v63 = vld [vmem:[#allocation2 + $0x101] sm:$0xff] }
  0x95   : > { %982 = vrot.lane.b32.xlu0 %v877_v50, %s2322_s16  ;;  %517 = vst.msk [vmem:[#allocation2 + $0x121] sm:$0xff] %vm332_vm0, %v515_v48  ;;  %v540_v1 = vld [vmem:[#allocation2 + $0x78] sm:$0xff]  ;;  %v886_v0 = vld [vmem:[#allocation2 + $0x102] sm:$0xff] }
  0x96   : > { %739 = vrot.lane.b32.xlu2 %v632_v51, %s2321_s15  ;;  %v883_v51 = vld [vmem:[#allocation2 + $0xea] sm:$0xff]  ;;  %v514_v55 = vadd.f32 %v2401_v2, %v512_v52  ;;  %581 = vst.msk [vmem:[#allocation3 + $0x78] sm:$0xff] %vm332_vm0, %v540_v1  ;;  %v888_v24 = vld [vmem:[#allocation2 + $0x112] sm:$0xff] }
  0x97   : > { %v941_v61 = vpop.permute.xlu0 %940  ;;  %735 = vrot.lane.b32.xlu1 %v630_v56, %s2321_s15  ;;  %v892_v48 = vld [vmem:[#allocation2 + $0x132] sm:$0xff]  ;;  %v1961_v1 = vld [vmem:[#allocation2 + $0x23] ss:$2 sm:$0xff] }
  0x98   : > { %v2629_v62 = vpop.permute.xlu2 %952  ;;  %1062 = vst.msk [vmem:[#allocation3 + $0x10] sm:$0xff] %vm1059_vm4, %v941_v61  ;;  %v1101_v37 = vld [vmem:[#allocation3] ss:$2 sm:$0xff]  ;;  %v516_v59 = vmax.f32 %v514_v55, 0.0 }
  0x99   : > { %v696_v8 = vpop.permute.xlu1 %695 }
  0x9a   : > { %816 = vst.msk [vmem:[#allocation3 + $0x18] sm:$0xff] %vm812_vm3, %v696_v8 }
  0x9b   : > { %518 = vst.msk [vmem:[#allocation2 + $0x129] sm:$0xff] %vm332_vm0, %v516_v59 }
  0x9d   : > { %741 = vrot.lane.b32.xlu0 %v633_v9, %s2321_s15 }
  0x9e   : > { %988 = vrot.lane.b32.xlu2 %v880_v10, %s2322_s16 }
  0x9f   : > { %v700_v17 = vpop.permute.xlu0 %699  ;;  %984 = vrot.lane.b32.xlu1 %v878_v14, %s2322_s16 }
  0xa0   : > { %v2651_v18 = vpop.permute.xlu2 %954  ;;  %818 = vst.msk [vmem:[#allocation3 + $0x28] sm:$0xff] %vm812_vm3, %v700_v17  ;;  %v885_v17 = vld [vmem:[#allocation2 + $0xfa] sm:$0xff] }
  0xa1   : > { %v943_v25 = vpop.permute.xlu1 %942 }
  0xa2   : > { %1063 = vst.msk [vmem:[#allocation3 + $0x18] sm:$0xff] %vm1059_vm4, %v943_v25  ;;  %v890_v49 = vld [vmem:[#allocation2 + $0x122] sm:$0xff] }
  0xa5   : > { %743 = vrot.lane.b32.xlu0 %v634_v26, %s2321_s15  ;;  %v643_v26 = vld [vmem:[#allocation2 + $0x121] sm:$0xff] }
  0xa6   : > { %990 = vrot.lane.b32.xlu2 %v881_v27, %s2322_s16  ;;  %v641_v27 = vld [vmem:[#allocation2 + $0x111] sm:$0xff] }
  0xa7   : > { %v947_v31 = vpop.permute.xlu0 %946  ;;  %986 = vrot.lane.b32.xlu1 %v879_v30, %s2322_s16  ;;  %v545_v30 = vld [vmem:[#allocation2 + $0xa0] sm:$0xff] }
  0xa8   : > { %v714_v32 = vpop.permute.xlu2 %713  ;;  %1065 = vst.msk [vmem:[#allocation3 + $0x28] sm:$0xff] %vm1059_vm4, %v947_v31 }
  0xa9   : > { %825 = vst.msk [vmem:[#allocation3 + $0x60] sm:$0xff] %vm812_vm3, %v714_v32  ;;  %v702_v36 = vpop.permute.xlu1 %701  ;;  %v1103_v38 = vld [vmem:[#allocation3 + $0x10] ss:$2 sm:$0xff] }
  0xaa   : > { %819 = vst.msk [vmem:[#allocation3 + $0x30] sm:$0xff] %vm812_vm3, %v702_v36  ;;  %v1136_v41 = vpack.c.bf16 %v1103_v38, %v1101_v37  ;;  %v1258_v61 = vld [vmem:[#allocation3 + $0x12] ss:$2 sm:$0xff]  ;;  %v889_v32 = vld [vmem:[#allocation2 + $0x11a] sm:$0xff]  ;;  %v2323_v37 = vmov 0  }
  0xab   : > { %v644_v36 = vld [vmem:[#allocation2 + $0x129] sm:$0xff]  ;;  %586 = vst.msk [vmem:[#allocation3 + $0xa0] sm:$0xff] %vm332_vm0, %v545_v30  ;;  %2309 = vset.pattern.permute.xlu0 %v2323_v37  ;;  %2307 = vset.pattern.permute.xlu1 %v2323_v37  ;;  %v642_v38 = vld [vmem:[#allocation2 + $0x119] sm:$0xff] }
  0xac   : > { %2240 = vmatmul.msk.bf16.vlgmr.msra.gmra.mxu0 %vm1152_vm6, %v1136_v41  ;;  %2308 = vset.pattern.permute.xlu2 %v2323_v37  ;;  %v546_v41 = vld [vmem:[#allocation2 + $0xa8] sm:$0xff]  ;;  %v553_v37 = vld [vmem:[#allocation2 + $0xe0] sm:$0xff] }
  0xad   : > { %992 = vrot.lane.b32.xlu0 %v882_v39, %s2322_s16  ;;  %587 = vst.msk [vmem:[#allocation3 + $0xa8] sm:$0xff] %vm332_vm0, %v546_v41 }
  0xae   : > { %749 = vrot.lane.b32.xlu2 %v637_v42, %s2321_s15  ;;  %v549_v42 = vld [vmem:[#allocation2 + $0xc0] sm:$0xff]  ;;  %594 = vst.msk [vmem:[#allocation3 + $0xe0] sm:$0xff] %vm332_vm0, %v553_v37 }
  0xaf   : > { %v706_v45 = vpop.permute.xlu0 %705  ;;  %745 = vrot.lane.b32.xlu1 %v635_v43, %s2321_s15  ;;  %v1105_v7 = vld [vmem:[#allocation3 + $0x20] ss:$2 sm:$0xff]  ;;  %590 = vst.msk [vmem:[#allocation3 + $0xc0] sm:$0xff] %vm332_vm0, %v549_v42 }
  0xb0   : > { %v716_v46 = vpop.permute.xlu2 %715  ;;  %821 = vst.msk [vmem:[#allocation3 + $0x40] sm:$0xff] %vm812_vm3, %v706_v45 }
  0xb1   : > { %1068 = vst.msk [vmem:[#allocation3 + $0x40] sm:$0xff] %vm1059_vm4, %v2629_v62  ;;  %v949_v50 = vpop.permute.xlu1 %948 }
  0xb2   : > { %826 = vst.msk [vmem:[#allocation3 + $0x68] sm:$0xff] %vm812_vm3, %v716_v46 }
  0xb3   : > { %1066 = vst.msk [vmem:[#allocation3 + $0x30] sm:$0xff] %vm1059_vm4, %v949_v50  ;;  %v2003_v50 = vld [vmem:[%s3116_s5] sm:$0x3] }
  0xb5   : > { %994 = vrot.lane.b32.xlu0 %v883_v51, %s2322_s16  ;;  %v2033_v51 = vsel %vm2031_vm7, %v2003_v50, 0 }
  0xb6   : > { %751 = vrot.lane.b32.xlu2 %v638_v53, %s2321_s15  ;;  %2042 = vmatpush.bf16.msra.mxu3 %v2033_v51  ;;  %v554_v51 = vld [vmem:[#allocation2 + $0xe8] sm:$0xff] }
  0xb7   : > { %v708_v56 = vpop.permute.xlu0 %707  ;;  %747 = vrot.lane.b32.xlu1 %v636_v54, %s2321_s15  ;;  %595 = vst.msk [vmem:[#allocation3 + $0xe8] sm:$0xff] %vm332_vm0, %v554_v51  ;;  %v1684_v51 = vld [vmem:[%s3112_s1 + $0x48] sm:$0xff] }
  0xb8   : > { %v2690_v57 = vpop.permute.xlu2 %964  ;;  %822 = vst.msk [vmem:[#allocation3 + $0x48] sm:$0xff] %vm812_vm3, %v708_v56  ;;  %v550_v56 = vld [vmem:[#allocation2 + $0xc8] sm:$0xff] }
  0xb9   : > { %1069 = vst.msk [vmem:[#allocation3 + $0x48] sm:$0xff] %vm1059_vm4, %v2651_v18  ;;  %v951_v60 = vpop.permute.xlu1 %950 }
  0xba   : > { %v1260_v62 = vld [vmem:[#allocation3 + $0x22] ss:$2 sm:$0xff]  ;;  %1067 = vst.msk [vmem:[#allocation3 + $0x38] sm:$0xff] %vm1059_vm4, %v951_v60 }
  0xbb   : > { %v1293_v2 = vpack.c.bf16 %v1260_v62, %v1258_v61  ;;  %v1449_v8 = vld [vmem:[#allocation3 + $0x24] ss:$2 sm:$0xff]  ;;  %591 = vst.msk [vmem:[#allocation3 + $0xc8] sm:$0xff] %vm332_vm0, %v550_v56 }
  0xbc   : > { %v547_v61 = vld [vmem:[#allocation2 + $0xb0] sm:$0xff] }
  0xbd   : > { %2255 = vmatmul.msk.bf16.vlgmr.msra.gmra.mxu1 %vm1152_vm6, %v1293_v2  ;;  %753 = vrot.lane.b32.xlu0 %v639_v63, %s2321_s15  ;;  %588 = vst.msk [vmem:[#allocation3 + $0xb0] sm:$0xff] %vm332_vm0, %v547_v61  ;;  %v1973_v61 = vld [vmem:[#allocation2 + $0x83] ss:$2 sm:$0xff] }
  0xbe   : > { %1000 = vrot.lane.b32.xlu2 %v886_v0, %s2322_s16  ;;  %v646_v0 = vld [vmem:[#allocation2 + $0x139] sm:$0xff] }
  0xbf   : > { %v957_v4 = vpop.permute.xlu0 %956  ;;  %996 = vrot.lane.b32.xlu1 %v884_v3, %s2322_s16  ;;  %v893_v3 = vld [vmem:[#allocation2 + $0x13a] sm:$0xff] }
  0xc0   : > { %v2703_v5 = vpop.permute.xlu2 %966  ;;  %v1109_v33 = vld [vmem:[#allocation3 + $0x40] ss:$2 sm:$0xff] }
  0xc1   : > { %v710_v9 = vpop.permute.xlu1 %709  ;;  %v1107_v10 = vld [vmem:[#allocation3 + $0x30] ss:$2 sm:$0xff] }
  0xc2   : > { %v1451_v11 = vld [vmem:[#allocation3 + $0x34] ss:$2 sm:$0xff]  ;;  %823 = vst.msk [vmem:[#allocation3 + $0x50] sm:$0xff] %vm812_vm3, %v710_v9  ;;  %v1137_v13 = vpack.c.bf16 %v1107_v10, %v1105_v7  ;;  %v548_v7 = vld [vmem:[#allocation2 + $0xb8] sm:$0xff] }
  0xc3   : > { %v1484_v14 = vpack.c.bf16 %v1451_v11, %v1449_v8  ;;  %1070 = vst.msk [vmem:[#allocation3 + $0x50] sm:$0xff] %vm1059_vm4, %v957_v4  ;;  %v1262_v22 = vld [vmem:[#allocation3 + $0x32] ss:$2 sm:$0xff] }
  0xc4   : > { %2241 = vmatmul.msk.bf16.gmra.mxu0 %vm1152_vm6, %v1137_v13  ;;  %v891_v4 = vld [vmem:[#allocation2 + $0x12a] sm:$0xff]  ;;  %589 = vst.msk [vmem:[#allocation3 + $0xb8] sm:$0xff] %vm332_vm0, %v548_v7  ;;  %v894_v11 = vld [vmem:[#allocation2 + $0x142] sm:$0xff] }
  0xc5   : > { %2270 = vmatmul.msk.bf16.vlgmr.msra.gmra.mxu2 %vm1152_vm6, %v1484_v14  ;;  %755 = vrot.lane.b32.xlu0 %v640_v15, %s2321_s15  ;;  %v1676_v13 = vld [vmem:[%s3112_s1 + $0x8] sm:$0xff]  ;;  %v551_v15 = vld [vmem:[#allocation2 + $0xd0] sm:$0xff] }
  0xc6   : > { %1002 = vrot.lane.b32.xlu2 %v887_v16, %s2322_s16  ;;  %v647_v14 = vld [vmem:[#allocation2 + $0x141] sm:$0xff]  ;;  %592 = vst.msk [vmem:[#allocation3 + $0xd0] sm:$0xff] %vm332_vm0, %v551_v15 }
  0xc7   : > { %v959_v18 = vpop.permute.xlu0 %958  ;;  %998 = vrot.lane.b32.xlu1 %v885_v17, %s2322_s16 }
  0xc8   : > { %v726_v19 = vpop.permute.xlu2 %725 }
  0xc9   : > { %831 = vst.msk [vmem:[#allocation3 + $0x90] sm:$0xff] %vm812_vm3, %v726_v19  ;;  %v712_v21 = vpop.permute.xlu1 %711  ;;  %v1965_v19 = vld [vmem:[#allocation2 + $0x43] ss:$2 sm:$0xff] }
  0xca   : > { %824 = vst.msk [vmem:[#allocation3 + $0x58] sm:$0xff] %vm812_vm3, %v712_v21  ;;  %v1264_v23 = vld [vmem:[#allocation3 + $0x42] ss:$2 sm:$0xff] }
  0xcb   : > { %1071 = vst.msk [vmem:[#allocation3 + $0x58] sm:$0xff] %vm1059_vm4, %v959_v18  ;;  %v1294_v25 = vpack.c.bf16 %v1264_v23, %v1262_v22  ;;  %v1453_v44 = vld [vmem:[#allocation3 + $0x44] ss:$2 sm:$0xff]  ;;  %v1963_v18 = vld [vmem:[#allocation2 + $0x33] ss:$2 sm:$0xff] }
  0xcc   : > { %v1995_v20 = vpack.c.bf16 %v1965_v19, %v1963_v18  ;;  %v1677_v22 = vld [vmem:[%s3112_s1 + $0x10] sm:$0xff]  ;;  %v1675_v23 = vld [vmem:[%s3112_s1] sm:$0xff] }
  0xcd   : > { %2256 = vmatmul.msk.bf16.gmra.mxu1 %vm1152_vm6, %v1294_v25  ;;  %1004 = vrot.lane.b32.xlu0 %v888_v24, %s2322_s16  ;;  %v552_v24 = vld [vmem:[#allocation2 + $0xd8] sm:$0xff] }
  0xce   : > { %761 = vrot.lane.b32.xlu2 %v643_v26, %s2321_s15  ;;  %593 = vst.msk [vmem:[#allocation3 + $0xd8] sm:$0xff] %vm332_vm0, %v552_v24  ;;  %v1975_v24 = vld [vmem:[#allocation2 + $0x93] ss:$2 sm:$0xff] }
  0xcf   : > { %v718_v28 = vpop.permute.xlu0 %717  ;;  %757 = vrot.lane.b32.xlu1 %v641_v27, %s2321_s15  ;;  %v555_v27 = vld [vmem:[#allocation2 + $0xf0] sm:$0xff] }
  0xd0   : > { %v728_v29 = vpop.permute.xlu2 %727  ;;  %827 = vst.msk [vmem:[#allocation3 + $0x70] sm:$0xff] %vm812_vm3, %v718_v28 }
  0xd1   : > { %1074 = vst.msk [vmem:[#allocation3 + $0x70] sm:$0xff] %vm1059_vm4, %v2690_v57  ;;  %v961_v31 = vpop.permute.xlu1 %960  ;;  %v1959_v57 = vld [vmem:[#allocation2 + $0x13] ss:$2 sm:$0xff] }
  0xd2   : > { %832 = vst.msk [vmem:[#allocation3 + $0x98] sm:$0xff] %vm812_vm3, %v728_v29  ;;  %v1111_v34 = vld [vmem:[#allocation3 + $0x50] ss:$2 sm:$0xff]  ;;  %v1994_v62 = vpack.c.bf16 %v1961_v1, %v1959_v57 }
  0xd3   : > { %1072 = vst.msk [vmem:[#allocation3 + $0x60] sm:$0xff] %vm1059_vm4, %v961_v31  ;;  %v1138_v35 = vpack.c.bf16 %v1111_v34, %v1109_v33  ;;  %v1679_v33 = vld [vmem:[%s3112_s1 + $0x20] sm:$0xff]  ;;  %v556_v34 = vld [vmem:[#allocation2 + $0xf8] sm:$0xff] }
  0xd4   : > { %2279 = vmatmul.msk.bf16.vlgmr.msra.gmra.mxu3 %vm332_vm0, %v1994_v62  ;;  %596 = vst.msk [vmem:[#allocation3 + $0xf0] sm:$0xff] %vm332_vm0, %v555_v27  ;;  %v557_v57 = vld [vmem:[#allocation2 + $0x100] sm:$0xff] }
  0xd5   : > { %2242 = vmatmul.msk.bf16.gmra.mxu0 %vm1152_vm6, %v1138_v35  ;;  %1006 = vrot.lane.b32.xlu0 %v889_v32, %s2322_s16  ;;  %v1678_v32 = vld [vmem:[%s3112_s1 + $0x18] sm:$0xff]  ;;  %597 = vst.msk [vmem:[#allocation3 + $0xf8] sm:$0xff] %vm332_vm0, %v556_v34 }
  0xd6   : > { %763 = vrot.lane.b32.xlu2 %v644_v36, %s2321_s15  ;;  %598 = vst.msk [vmem:[#allocation3 + $0x100] sm:$0xff] %vm332_vm0, %v557_v57  ;;  %v560_v34 = vld [vmem:[#allocation2 + $0x118] sm:$0xff] }
  0xd7   : > { %v720_v39 = vpop.permute.xlu0 %719  ;;  %759 = vrot.lane.b32.xlu1 %v642_v38, %s2321_s15  ;;  %v1967_v38 = vld [vmem:[#allocation2 + $0x53] ss:$2 sm:$0xff]  ;;  %601 = vst.msk [vmem:[#allocation3 + $0x118] sm:$0xff] %vm332_vm0, %v560_v34 }
  0xd8   : > { %v2732_v40 = vpop.permute.xlu2 %976  ;;  %828 = vst.msk [vmem:[#allocation3 + $0x78] sm:$0xff] %vm812_vm3, %v720_v39 }
  0xd9   : > { %1075 = vst.msk [vmem:[#allocation3 + $0x78] sm:$0xff] %vm1059_vm4, %v2703_v5  ;;  %v963_v43 = vpop.permute.xlu1 %962 }
  0xda   : > { %v1455_v45 = vld [vmem:[#allocation3 + $0x54] ss:$2 sm:$0xff]  ;;  %1073 = vst.msk [vmem:[#allocation3 + $0x68] sm:$0xff] %vm1059_vm4, %v963_v43 }
  0xdb   : > { %v1485_v46 = vpack.c.bf16 %v1455_v45, %v1453_v44  ;;  %v1266_v54 = vld [vmem:[#allocation3 + $0x52] ss:$2 sm:$0xff] }
  0xdd   : > { %2271 = vmatmul.msk.bf16.gmra.mxu2 %vm1152_vm6, %v1485_v46  ;;  %765 = vrot.lane.b32.xlu0 %v645_v47, %s2321_s15 }
  0xde   : > { %1012 = vrot.lane.b32.xlu2 %v892_v48, %s2322_s16  ;;  %v1680_v48 = vld [vmem:[%s3112_s1 + $0x28] sm:$0xff] }
  0xdf   : > { %v969_v52 = vpop.permute.xlu0 %968  ;;  %1008 = vrot.lane.b32.xlu1 %v890_v49, %s2322_s16  ;;  %v1682_v49 = vld [vmem:[%s3112_s1 + $0x38] sm:$0xff] }
  0xe0   : > { %v2747_v53 = vpop.permute.xlu2 %978  ;;  %v1115_v55 = vld [vmem:[#allocation3 + $0x70] ss:$2 sm:$0xff] }
  0xe1   : > { %v722_v58 = vpop.permute.xlu1 %721  ;;  %v1268_v59 = vld [vmem:[#allocation3 + $0x62] ss:$2 sm:$0xff] }
  0xe2   : > { %v1113_v60 = vld [vmem:[#allocation3 + $0x60] ss:$2 sm:$0xff]  ;;  %829 = vst.msk [vmem:[#allocation3 + $0x80] sm:$0xff] %vm812_vm3, %v722_v58  ;;  %v1295_v63 = vpack.c.bf16 %v1268_v59, %v1266_v54 }
  0xe3   : > { %v1139_v2 = vpack.c.bf16 %v1115_v55, %v1113_v60  ;;  %1076 = vst.msk [vmem:[#allocation3 + $0x80] sm:$0xff] %vm1059_vm4, %v969_v52  ;;  %v1457_v9 = vld [vmem:[#allocation3 + $0x64] ss:$2 sm:$0xff]  ;;  %v1971_v60 = vld [vmem:[#allocation2 + $0x73] ss:$2 sm:$0xff] }
  0xe4   : > { %2257 = vmatmul.msk.bf16.gmra.mxu1 %vm1152_vm6, %v1295_v63  ;;  %2280 = vmatmul.msk.bf16.gmra.mxu3 %vm332_vm0, %v1995_v20 }
  0xe5   : > { %2243 = vmatmul.msk.bf16.gmra.mxu0 %vm1152_vm6, %v1139_v2  ;;  %767 = vrot.lane.b32.xlu0 %v646_v0, %s2321_s15  ;;  %v1997_v2 = vpack.c.bf16 %v1973_v61, %v1971_v60 }
  0xe6   : > { %1014 = vrot.lane.b32.xlu2 %v893_v3, %s2322_s16  ;;  %v1681_v3 = vld [vmem:[%s3112_s1 + $0x30] sm:$0xff] }
  0xe7   : > { %v971_v5 = vpop.permute.xlu0 %970  ;;  %1010 = vrot.lane.b32.xlu1 %v891_v4, %s2322_s16  ;;  %v1683_v4 = vld [vmem:[%s3112_s1 + $0x40] sm:$0xff] }
  0xe8   : > { %v738_v6 = vpop.permute.xlu2 %737 }
  0xe9   : > { %837 = vst.msk [vmem:[#allocation3 + $0xc0] sm:$0xff] %vm812_vm3, %v738_v6  ;;  %v724_v8 = vpop.permute.xlu1 %723  ;;  %v558_v6 = vld [vmem:[#allocation2 + $0x108] sm:$0xff] }
  0xea   : > { %830 = vst.msk [vmem:[#allocation3 + $0x88] sm:$0xff] %vm812_vm3, %v724_v8  ;;  %v1459_v10 = vld [vmem:[#allocation3 + $0x74] ss:$2 sm:$0xff] }
  0xeb   : > { %1077 = vst.msk [vmem:[#allocation3 + $0x88] sm:$0xff] %vm1059_vm4, %v971_v5  ;;  %v1486_v12 = vpack.c.bf16 %v1459_v10, %v1457_v9  ;;  %v1270_v29 = vld [vmem:[#allocation3 + $0x72] ss:$2 sm:$0xff] }
  0xec   : > { %v561_v5 = vld [vmem:[#allocation2 + $0x120] sm:$0xff]  ;;  %599 = vst.msk [vmem:[#allocation3 + $0x108] sm:$0xff] %vm332_vm0, %v558_v6 }
  0xed   : > { %2272 = vmatmul.msk.bf16.gmra.mxu2 %vm1152_vm6, %v1486_v12  ;;  %1016 = vrot.lane.b32.xlu0 %v894_v11, %s2322_s16  ;;  %602 = vst.msk [vmem:[#allocation3 + $0x120] sm:$0xff] %vm332_vm0, %v561_v5  ;;  %v1985_v5 = vld [vmem:[#allocation2 + $0xe3] ss:$2 sm:$0xff] }
  0xee   : > { %1718 = vperm.xlu2 %2308, %v1676_v13   ;;  %v562_v13 = vld [vmem:[#allocation2 + $0x128] sm:$0xff] }
  0xef   : > { %v730_v16 = vpop.permute.xlu0 %729  ;;  %769 = vrot.lane.b32.xlu1 %v647_v14, %s2321_s15  ;;  %603 = vst.msk [vmem:[#allocation3 + $0x128] sm:$0xff] %vm332_vm0, %v562_v13  ;;  %v1688_v13 = vld [vmem:[%s3112_s1 + $0x68] sm:$0xff] }
  0xf0   : > { %v740_v17 = vpop.permute.xlu2 %739  ;;  %833 = vst.msk [vmem:[#allocation3 + $0xa0] sm:$0xff] %vm812_vm3, %v730_v16 }
  0xf1   : > { %1080 = vst.msk [vmem:[#allocation3 + $0xa0] sm:$0xff] %vm1059_vm4, %v2732_v40  ;;  %v973_v21 = vpop.permute.xlu1 %972  ;;  %v1969_v40 = vld [vmem:[#allocation2 + $0x63] ss:$2 sm:$0xff] }
  0xf2   : > { %838 = vst.msk [vmem:[#allocation3 + $0xc8] sm:$0xff] %vm812_vm3, %v740_v17  ;;  %v1117_v39 = vld [vmem:[#allocation3 + $0x80] ss:$2 sm:$0xff]  ;;  %v1996_v45 = vpack.c.bf16 %v1969_v40, %v1967_v38 }
  0xf3   : > { %1078 = vst.msk [vmem:[#allocation3 + $0x90] sm:$0xff] %vm1059_vm4, %v973_v21  ;;  %v559_v17 = vld [vmem:[#allocation2 + $0x110] sm:$0xff]  ;;  %v1686_v40 = vld [vmem:[%s3112_s1 + $0x58] sm:$0xff] }
  0xf4   : > { %2281 = vmatmul.msk.bf16.gmra.mxu3 %vm332_vm0, %v1996_v45  ;;  %600 = vst.msk [vmem:[#allocation3 + $0x110] sm:$0xff] %vm332_vm0, %v559_v17 }
  0xf5   : > { %1723 = vperm.xlu0 %2309, %v1677_v22  }
  0xf6   : > { %1733 = vperm.xlu2 %2308, %v1679_v33  }
  0xf7   : > { %v732_v25 = vpop.permute.xlu0 %731  ;;  %1713 = vperm.xlu1 %2307, %v1675_v23  }
  0xf8   : > { %v989_v26 = vpop.permute.xlu2 %988  ;;  %834 = vst.msk [vmem:[#allocation3 + $0xa8] sm:$0xff] %vm812_vm3, %v732_v25  ;;  %v1977_v25 = vld [vmem:[#allocation2 + $0xa3] ss:$2 sm:$0xff] }
  0xf9   : > { %1081 = vst.msk [vmem:[#allocation3 + $0xa8] sm:$0xff] %vm1059_vm4, %v2747_v53  ;;  %v975_v28 = vpop.permute.xlu1 %974 }
  0xfa   : > { %v1272_v30 = vld [vmem:[#allocation3 + $0x82] ss:$2 sm:$0xff]  ;;  %1079 = vst.msk [vmem:[#allocation3 + $0x98] sm:$0xff] %vm1059_vm4, %v975_v28 }
  0xfb   : > { %v1296_v31 = vpack.c.bf16 %v1272_v30, %v1270_v29  ;;  %v1461_v43 = vld [vmem:[#allocation3 + $0x84] ss:$2 sm:$0xff] }
  0xfd   : > { %2258 = vmatmul.msk.bf16.gmra.mxu1 %vm1152_vm6, %v1296_v31  ;;  %1748 = vperm.xlu0 %2309, %v1682_v49   ;;  %v1685_v31 = vld [vmem:[%s3112_s1 + $0x50] sm:$0xff] }
  0xfe   : > { %1743 = vperm.xlu2 %2308, %v1681_v3   ;;  %v1692_v3 = vld [vmem:[%s3112_s1 + $0x88] sm:$0xff] }
  0xff   : > { %v981_v35 = vpop.permute.xlu0 %980  ;;  %1728 = vperm.xlu1 %2307, %v1678_v32  }
 0x100   : > { %v2797_v36 = vpop.permute.xlu2 %990  ;;  %v1121_v62 = vld [vmem:[#allocation3 + $0xa0] ss:$2 sm:$0xff] }
 0x101   : > { %v734_v41 = vpop.permute.xlu1 %733  ;;  %v1119_v42 = vld [vmem:[#allocation3 + $0x90] ss:$2 sm:$0xff] }
 0x102   : > { %v1463_v44 = vld [vmem:[#allocation3 + $0x94] ss:$2 sm:$0xff]  ;;  %835 = vst.msk [vmem:[#allocation3 + $0xb0] sm:$0xff] %vm812_vm3, %v734_v41  ;;  %v1140_v46 = vpack.c.bf16 %v1119_v42, %v1117_v39  ;;  %v1979_v41 = vld [vmem:[#allocation2 + $0xb3] ss:$2 sm:$0xff] }
 0x103   : > { %v1487_v47 = vpack.c.bf16 %v1463_v44, %v1461_v43  ;;  %1082 = vst.msk [vmem:[#allocation3 + $0xb0] sm:$0xff] %vm1059_vm4, %v981_v35  ;;  %v1274_v54 = vld [vmem:[#allocation3 + $0x92] ss:$2 sm:$0xff]  ;;  %v1981_v42 = vld [vmem:[#allocation2 + $0xc3] ss:$2 sm:$0xff] }
 0x104   : > { %2244 = vmatmul.msk.bf16.gmra.mxu0 %vm1152_vm6, %v1140_v46  ;;  %2282 = vmatmul.msk.bf16.gmra.mxu3 %vm332_vm0, %v1997_v2  ;;  %v563_v43 = vld [vmem:[#allocation2 + $0x130] sm:$0xff]  ;;  %v1999_v44 = vpack.c.bf16 %v1981_v42, %v1979_v41 }
 0x105   : > { %2273 = vmatmul.msk.bf16.gmra.mxu2 %vm1152_vm6, %v1487_v47  ;;  %1763 = vperm.xlu0 %2309, %v1685_v31   ;;  %604 = vst.msk [vmem:[#allocation3 + $0x130] sm:$0xff] %vm332_vm0, %v563_v43 }
 0x106   : > { %1758 = vperm.xlu2 %2308, %v1684_v51  }
 0x107   : > { %v983_v50 = vpop.permute.xlu0 %982  ;;  %1738 = vperm.xlu1 %2307, %v1680_v48  }
 0x108   : > { %v750_v52 = vpop.permute.xlu2 %749 }
 0x109   : > { %843 = vst.msk [vmem:[#allocation3 + $0xf0] sm:$0xff] %vm812_vm3, %v750_v52  ;;  %v736_v53 = vpop.permute.xlu1 %735 }
 0x10a   : > { %836 = vst.msk [vmem:[#allocation3 + $0xb8] sm:$0xff] %vm812_vm3, %v736_v53  ;;  %v1276_v55 = vld [vmem:[#allocation3 + $0xa2] ss:$2 sm:$0xff] }
 0x10b   : > { %1083 = vst.msk [vmem:[#allocation3 + $0xb8] sm:$0xff] %vm1059_vm4, %v983_v50  ;;  %v1297_v56 = vpack.c.bf16 %v1276_v55, %v1274_v54  ;;  %v1465_v10 = vld [vmem:[#allocation3 + $0xa4] ss:$2 sm:$0xff] }
 0x10c   : > { %v1689_v54 = vld [vmem:[%s3112_s1 + $0x70] sm:$0xff]  ;;  %v564_v55 = vld [vmem:[#allocation2 + $0x138] sm:$0xff] }
 0x10d   : > { %2259 = vmatmul.msk.bf16.gmra.mxu1 %vm1152_vm6, %v1297_v56  ;;  %605 = vst.msk [vmem:[#allocation3 + $0x138] sm:$0xff] %vm332_vm0, %v564_v55  ;;  %1778 = vperm.xlu0 %2309, %v1688_v13  }
 0x10f   : > { %v742_v1 = vpop.permute.xlu0 %741  ;;  %1753 = vperm.xlu1 %2307, %v1683_v4   ;;  %v1983_v4 = vld [vmem:[#allocation2 + $0xd3] ss:$2 sm:$0xff] }
 0x110   : > { %839 = vst.msk [vmem:[#allocation3 + $0xd0] sm:$0xff] %vm812_vm3, %v742_v1  ;;  %v752_v58 = vpop.permute.xlu2 %751 }
 0x111   : > { %1086 = vst.msk [vmem:[#allocation3 + $0xd0] sm:$0xff] %vm1059_vm4, %v989_v26  ;;  %v985_v59 = vpop.permute.xlu1 %984  ;;  %v1998_v26 = vpack.c.bf16 %v1977_v25, %v1975_v24 }
 0x112   : > { %844 = vst.msk [vmem:[#allocation3 + $0xf8] sm:$0xff] %vm812_vm3, %v752_v58  ;;  %v1123_v63 = vld [vmem:[#allocation3 + $0xb0] ss:$2 sm:$0xff] }
 0x113   : > { %1084 = vst.msk [vmem:[#allocation3 + $0xc0] sm:$0xff] %vm1059_vm4, %v985_v59  ;;  %v1141_v0 = vpack.c.bf16 %v1123_v63, %v1121_v62 }
 0x114   : > { %2283 = vmatmul.msk.bf16.gmra.mxu3 %vm332_vm0, %v1998_v26 }
 0x115   : > { %2245 = vmatmul.msk.bf16.gmra.mxu0 %vm1152_vm6, %v1141_v0 }
 0x117   : > { %v744_v7 = vpop.permute.xlu0 %743  ;;  %1768 = vperm.xlu1 %2307, %v1686_v40   ;;  %v1687_v40 = vld [vmem:[%s3112_s1 + $0x60] sm:$0xff] }
 0x118   : > { %840 = vst.msk [vmem:[#allocation3 + $0xd8] sm:$0xff] %vm812_vm3, %v744_v7  ;;  %v1001_v8 = vpop.permute.xlu2 %1000  ;;  %v565_v7 = vld [vmem:[#allocation2 + $0x140] sm:$0xff]  ;;  %1773 = vperm.xlu2 %2308, %v1687_v40  }
 0x119   : > { %1087 = vst.msk [vmem:[#allocation3 + $0xd8] sm:$0xff] %vm1059_vm4, %v2797_v36  ;;  %v987_v9 = vpop.permute.xlu1 %986 }
 0x11a   : > { %v1467_v11 = vld [vmem:[#allocation3 + $0xb4] ss:$2 sm:$0xff]  ;;  %1085 = vst.msk [vmem:[#allocation3 + $0xc8] sm:$0xff] %vm1059_vm4, %v987_v9 }
 0x11b   : > { %v1488_v12 = vpack.c.bf16 %v1467_v11, %v1465_v10  ;;  %v1278_v19 = vld [vmem:[#allocation3 + $0xb2] ss:$2 sm:$0xff]  ;;  %606 = vst.msk [vmem:[#allocation3 + $0x140] sm:$0xff] %vm332_vm0, %v565_v7 }
 0x11d   : > { %2274 = vmatmul.msk.bf16.gmra.mxu2 %vm1152_vm6, %v1488_v12 }
 0x11f   : > { %v993_v14 = vpop.permute.xlu0 %992  ;;  %1783 = vperm.xlu1 %2307, %v1689_v54  }
 0x120   : > { %v1127_v15 = vld [vmem:[#allocation3 + $0xd0] ss:$2 sm:$0xff]  ;;  %v1003_v16 = vpop.permute.xlu2 %1002 }
 0x121   : > { %v746_v18 = vpop.permute.xlu1 %745  ;;  %v1280_v20 = vld [vmem:[#allocation3 + $0xc2] ss:$2 sm:$0xff] }
 0x122   : > { %v1125_v21 = vld [vmem:[#allocation3 + $0xc0] ss:$2 sm:$0xff]  ;;  %841 = vst.msk [vmem:[#allocation3 + $0xe0] sm:$0xff] %vm812_vm3, %v746_v18  ;;  %v1298_v22 = vpack.c.bf16 %v1280_v20, %v1278_v19 }
 0x123   : > { %v1142_v23 = vpack.c.bf16 %v1127_v15, %v1125_v21  ;;  %1088 = vst.msk [vmem:[#allocation3 + $0xe0] sm:$0xff] %vm1059_vm4, %v993_v14  ;;  %v1469_v32 = vld [vmem:[#allocation3 + $0xc4] ss:$2 sm:$0xff] }
 0x124   : > { %2260 = vmatmul.msk.bf16.gmra.mxu1 %vm1152_vm6, %v1298_v22  ;;  %2284 = vmatmul.msk.bf16.gmra.mxu3 %vm332_vm0, %v1999_v44 }
 0x125   : > { %2246 = vmatmul.msk.bf16.gmra.mxu0 %vm1152_vm6, %v1142_v23 }
 0x127   : > { %v995_v27 = vpop.permute.xlu0 %994  ;;  %1798 = vperm.xlu1 %2307, %v1692_v3  }
 0x128   : > { %v762_v28 = vpop.permute.xlu2 %761 }
 0x129   : > { %v748_v29 = vpop.permute.xlu1 %747  ;;  %v1193_v30 = vpop.f32.mrf.mxu0  ;;  %849 = vst.msk [vmem:[#allocation3 + $0x120] sm:$0xff] %vm812_vm3, %v762_v28 }
 0x12a   : > { %842 = vst.msk [vmem:[#allocation3 + $0xe8] sm:$0xff] %vm812_vm3, %v748_v29  ;;  %v1471_v33 = vld [vmem:[#allocation3 + $0xd4] ss:$2 sm:$0xff] }
 0x12b   : > { %1089 = vst.msk [vmem:[#allocation3 + $0xe8] sm:$0xff] %vm1059_vm4, %v995_v27  ;;  %v1489_v35 = vpack.c.bf16 %v1471_v33, %v1469_v32  ;;  %v1282_v46 = vld [vmem:[#allocation3 + $0xd2] ss:$2 sm:$0xff]  ;;  %v1987_v32 = vld [vmem:[#allocation2 + $0xf3] ss:$2 sm:$0xff] }
 0x12c   : > { %1239 = vst.msk [vmem:[#allocation4] sm:$0xff] %vm1238_vm8, %v1193_v30  ;;  %v1691_v27 = vld [vmem:[%s3112_s1 + $0x80] sm:$0xff] }
 0x12d   : > { %2275 = vmatmul.msk.bf16.gmra.mxu2 %vm1152_vm6, %v1489_v35  ;;  %1793 = vperm.xlu0 %2309, %v1691_v27   ;;  %v1989_v33 = vld [vmem:[#allocation2 + $0x103] ss:$2 sm:$0xff] }
 0x12f   : > { %v754_v36 = vpop.permute.xlu0 %753 }
 0x130   : > { %845 = vst.msk [vmem:[#allocation3 + $0x100] sm:$0xff] %vm812_vm3, %v754_v36  ;;  %v764_v37 = vpop.permute.xlu2 %763  ;;  %v2001_v36 = vpack.c.bf16 %v1989_v33, %v1987_v32 }
 0x131   : > { %1092 = vst.msk [vmem:[#allocation3 + $0x100] sm:$0xff] %vm1059_vm4, %v1001_v8  ;;  %v997_v38 = vpop.permute.xlu1 %996  ;;  %v1195_v39 = vpop.f32.mrf.mxu0  ;;  %v2000_v8 = vpack.c.bf16 %v1985_v5, %v1983_v4 }
 0x132   : > { %850 = vst.msk [vmem:[#allocation3 + $0x128] sm:$0xff] %vm812_vm3, %v764_v37  ;;  %v1129_v57 = vld [vmem:[#allocation3 + $0xe0] ss:$2 sm:$0xff] }
 0x133   : > { %1090 = vst.msk [vmem:[#allocation3 + $0xf0] sm:$0xff] %vm1059_vm4, %v997_v38  ;;  %v1394_v49 = vld [vmem:[#allocation4] sm:$0xff] }
 0x134   : > { %1240 = vst.msk [vmem:[#allocation4 + $0x8] sm:$0xff] %vm1238_vm8, %v1195_v39  ;;  %2285 = vmatmul.msk.bf16.gmra.mxu3 %vm332_vm0, %v2000_v8 }
 0x137   : > { %v756_v45 = vpop.permute.xlu0 %755 }
 0x138   : > { %846 = vst.msk [vmem:[#allocation3 + $0x108] sm:$0xff] %vm812_vm3, %v756_v45  ;;  %v1013_v22 = vpop.permute.xlu2 %1012 }
 0x139   : > { %1093 = vst.msk [vmem:[#allocation3 + $0x108] sm:$0xff] %vm1059_vm4, %v1003_v16  ;;  %v999_v47 = vpop.permute.xlu1 %998 }
 0x13a   : > { %v1349_v48 = vpop.f32.mrf.mxu1  ;;  %v1284_v50 = vld [vmem:[#allocation3 + $0xe2] ss:$2 sm:$0xff]  ;;  %1091 = vst.msk [vmem:[#allocation3 + $0xf8] sm:$0xff] %vm1059_vm4, %v999_v47 }
 0x13b   : > { %v1412_v52 = vadd.f32 %v1394_v49, %v1349_v48  ;;  %v1299_v53 = vpack.c.bf16 %v1284_v50, %v1282_v46  ;;  %v1473_v1 = vld [vmem:[#allocation3 + $0xe4] ss:$2 sm:$0xff] }
 0x13c   : > { %v1395_v60 = vld [vmem:[#allocation4 + $0x8] sm:$0xff]  ;;  %v1690_v49 = vld [vmem:[%s3112_s1 + $0x78] sm:$0xff] }
 0x13d   : > { %1430 = vst.msk [vmem:[#allocation4] sm:$0xff] %vm1238_vm8, %v1412_v52  ;;  %2261 = vmatmul.msk.bf16.gmra.mxu1 %vm1152_vm6, %v1299_v53  ;;  %1788 = vperm.xlu2 %2308, %v1690_v49  }
 0x13f   : > { %v1005_v56 = vpop.permute.xlu0 %1004 }
 0x140   : > { %v1133_v34 = vld [vmem:[#allocation3 + $0x100] ss:$2 sm:$0xff]  ;;  %v1015_v42 = vpop.permute.xlu2 %1014 }
 0x141   : > { %v758_v58 = vpop.permute.xlu1 %757  ;;  %v1198_v59 = vpop.f32.mrf.mxu0  ;;  %v1131_v61 = vld [vmem:[#allocation3 + $0xf0] ss:$2 sm:$0xff] }
 0x142   : > { %v1475_v62 = vld [vmem:[#allocation3 + $0xf4] ss:$2 sm:$0xff]  ;;  %847 = vst.msk [vmem:[#allocation3 + $0x110] sm:$0xff] %vm812_vm3, %v758_v58  ;;  %v1351_v63 = vpop.f32.mrf.mxu1  ;;  %v1143_v2 = vpack.c.bf16 %v1131_v61, %v1129_v57 }
 0x143   : > { %v1490_v0 = vpack.c.bf16 %v1475_v62, %v1473_v1  ;;  %1094 = vst.msk [vmem:[#allocation3 + $0x110] sm:$0xff] %vm1059_vm4, %v1005_v56  ;;  %v1413_v6 = vadd.f32 %v1395_v60, %v1351_v63  ;;  %v1286_v17 = vld [vmem:[#allocation3 + $0xf2] ss:$2 sm:$0xff]  ;;  %v1991_v62 = vld [vmem:[#allocation2 + $0x113] ss:$2 sm:$0xff] }
 0x144   : > { %1241 = vst.msk [vmem:[#allocation4 + $0x10] sm:$0xff] %vm1238_vm8, %v1198_v59  ;;  %2247 = vmatmul.msk.bf16.gmra.mxu0 %vm1152_vm6, %v1143_v2  ;;  %v1585_v10 = vld [vmem:[#allocation4] sm:$0xff]  ;;  %2286 = vmatmul.msk.bf16.gmra.mxu3 %vm332_vm0, %v2001_v36  ;;  %v1993_v63 = vld [vmem:[#allocation2 + $0x123] ss:$2 sm:$0xff] }
 0x145   : > { %2276 = vmatmul.msk.bf16.gmra.mxu2 %vm1152_vm6, %v1490_v0  ;;  %1431 = vst.msk [vmem:[#allocation4 + $0x8] sm:$0xff] %vm1238_vm8, %v1413_v6  ;;  %v2002_v2 = vpack.c.bf16 %v1993_v63, %v1991_v62 }
 0x147   : > { %v1007_v11 = vpop.permute.xlu0 %1006 }
 0x148   : > { %v1540_v9 = vpop.f32.mrf.mxu2  ;;  %v1719_v58 = vpop.permute.xlu2 %1718 }
 0x149   : > { %v1603_v12 = vadd.f32 %v1585_v10, %v1540_v9  ;;  %v760_v14 = vpop.permute.xlu1 %759  ;;  %v1200_v15 = vpop.f32.mrf.mxu0 }
 0x14a   : > { %v1354_v16 = vpop.f32.mrf.mxu1  ;;  %v1288_v18 = vld [vmem:[#allocation3 + $0x102] ss:$2 sm:$0xff]  ;;  %848 = vst.msk [vmem:[#allocation3 + $0x118] sm:$0xff] %vm812_vm3, %v760_v14 }
 0x14b   : > { %1621 = vst.msk [vmem:[#allocation4] sm:$0xff] %vm1238_vm8, %v1603_v12  ;;  %v1396_v19 = vld [vmem:[#allocation4 + $0x10] sm:$0xff]  ;;  %v1300_v20 = vpack.c.bf16 %v1288_v18, %v1286_v17  ;;  %v1477_v46 = vld [vmem:[#allocation3 + $0x104] ss:$2 sm:$0xff] }
 0x14c   : > { %1095 = vst.msk [vmem:[#allocation3 + $0x118] sm:$0xff] %vm1059_vm4, %v1007_v11  ;;  %v1414_v21 = vadd.f32 %v1396_v19, %v1354_v16  ;;  %v1586_v24 = vld [vmem:[#allocation4 + $0x8] sm:$0xff] }
 0x14d   : > { %1242 = vst.msk [vmem:[#allocation4 + $0x18] sm:$0xff] %vm1238_vm8, %v1200_v15  ;;  %2262 = vmatmul.msk.bf16.gmra.mxu1 %vm1152_vm6, %v1300_v20 }
 0x14e   : > { %1432 = vst.msk [vmem:[#allocation4 + $0x10] sm:$0xff] %vm1238_vm8, %v1414_v21 }
 0x14f   : > { %v766_v25 = vpop.permute.xlu0 %765 }
 0x150   : > { %v1542_v23 = vpop.f32.mrf.mxu2  ;;  %851 = vst.msk [vmem:[#allocation3 + $0x130] sm:$0xff] %vm812_vm3, %v766_v25 }
 0x151   : > { %v1604_v26 = vadd.f32 %v1586_v24, %v1542_v23  ;;  %1098 = vst.msk [vmem:[#allocation3 + $0x130] sm:$0xff] %vm1059_vm4, %v1013_v22  ;;  %v1009_v29 = vpop.permute.xlu1 %1008 }
 0x152   : > { %v2906_v28 = vld [vmem:[#allocation4] sm:$0xff]  ;;  %v1203_v30 = vpop.f32.mrf.mxu0  ;;  %v1356_v31 = vpop.f32.mrf.mxu1  ;;  %1096 = vst.msk [vmem:[#allocation3 + $0x120] sm:$0xff] %vm1059_vm4, %v1009_v29 }
 0x153   : > { %1657 = vst.msk [vmem:[%s2900_s24] sm:$0xff] %vm1238_vm8, %v2906_v28  ;;  %v1135_v35 = vld [vmem:[#allocation3 + $0x110] ss:$2 sm:$0xff] }
 0x154   : > { %1622 = vst.msk [vmem:[#allocation4 + $0x8] sm:$0xff] %vm1238_vm8, %v1604_v26  ;;  %v1397_v37 = vld [vmem:[#allocation4 + $0x18] sm:$0xff]  ;;  %v1144_v38 = vpack.c.bf16 %v1135_v35, %v1133_v34  ;;  %2287 = vmatmul.msk.bf16.gmra.mxu3 %vm332_vm0, %v2002_v2 }
 0x155   : > { %1243 = vst.msk [vmem:[#allocation4 + $0x20] sm:$0xff] %vm1238_vm8, %v1203_v30  ;;  %v1415_v39 = vadd.f32 %v1397_v37, %v1356_v31  ;;  %v1587_v51 = vld [vmem:[#allocation4 + $0x10] sm:$0xff] }
 0x156   : > { %2248 = vmatmul.msk.bf16.gmra.mxu0 %vm1152_vm6, %v1144_v38 }
 0x157   : > { %1433 = vst.msk [vmem:[#allocation4 + $0x18] sm:$0xff] %vm1238_vm8, %v1415_v39  ;;  %v768_v41 = vpop.permute.xlu0 %767  ;;  %v2044_v7 = vpop.f32.mrf.mxu3 }
 0x158   : > { %852 = vst.msk [vmem:[#allocation3 + $0x138] sm:$0xff] %vm812_vm3, %v768_v41 }
 0x159   : > { %1099 = vst.msk [vmem:[#allocation3 + $0x138] sm:$0xff] %vm1059_vm4, %v1015_v42  ;;  %v1011_v43 = vpop.permute.xlu1 %1010  ;;  %v1479_v47 = vld [vmem:[#allocation3 + $0x114] ss:$2 sm:$0xff] }
 0x15a   : > { %1097 = vst.msk [vmem:[#allocation3 + $0x128] sm:$0xff] %vm1059_vm4, %v1011_v43  ;;  %v1205_v45 = vpop.f32.mrf.mxu0  ;;  %v1491_v48 = vpack.c.bf16 %v1479_v47, %v1477_v46  ;;  %v1290_v57 = vld [vmem:[#allocation3 + $0x112] ss:$2 sm:$0xff] }
 0x15b   : > { %v1640_v44 = vld [vmem:[#allocation4 + $0x8] sm:$0xff]  ;;  %1244 = vst.msk [vmem:[#allocation4 + $0x28] sm:$0xff] %vm1238_vm8, %v1205_v45 }
 0x15c   : > { %1658 = vst.msk [vmem:[%s2900_s24 + $0x8] sm:$0xff] %vm1238_vm8, %v1640_v44  ;;  %2277 = vmatmul.msk.bf16.gmra.mxu2 %vm1152_vm6, %v1491_v48  ;;  %v1398_v56 = vld [vmem:[#allocation4 + $0x20] sm:$0xff]  ;;  %v1881_v0 = vmul.f32 %v1719_v58, %v1640_v44 }
 0x15d   : > { %2089 = vst.msk [vmem:[%s2943_s13] sm:$0xff] %vm1238_vm8, %v2044_v7 }
 0x15e   : > { %v1588_v4 = vld [vmem:[#allocation4 + $0x18] sm:$0xff]  ;;  %v1899_v8 = vmul.f32 %v1881_v0, %v1881_v0  ;;  %v1820_v18 = vsel %vm1238_vm8, %v1881_v0, 0.0 }
 0x15f   : > { %v1017_v52 = vpop.permute.xlu0 %1016  ;;  %v2046_v33 = vpop.f32.mrf.mxu3 }
 0x160   : > { %v1545_v50 = vpop.f32.mrf.mxu2  ;;  %v1917_v25 = vsel %vm1238_vm8, %v1899_v8, 0.0  ;;  %2090 = vst.msk [vmem:[%s2943_s13 + $0x8] sm:$0xff] %vm1238_vm8, %v2046_v33 }
 0x161   : > { %v1605_v53 = vadd.f32 %v1587_v51, %v1545_v50  ;;  %v770_v54 = vpop.permute.xlu1 %769  ;;  %v1359_v55 = vpop.f32.mrf.mxu1  ;;  %v1292_v1 = vld [vmem:[#allocation3 + $0x122] ss:$2 sm:$0xff] }
 0x162   : > { %v1416_v59 = vadd.f32 %v1398_v56, %v1359_v55  ;;  %v1208_v60 = vpop.f32.mrf.mxu0  ;;  %v1301_v61 = vpack.c.bf16 %v1292_v1, %v1290_v57  ;;  %853 = vst.msk [vmem:[#allocation3 + $0x140] sm:$0xff] %vm812_vm3, %v770_v54  ;;  %v1399_v14 = vld [vmem:[#allocation4 + $0x28] sm:$0xff]  ;;  %v1734_v50 = vpop.permute.xlu2 %1733 }
 0x163   : > { %1623 = vst.msk [vmem:[#allocation4 + $0x10] sm:$0xff] %vm1238_vm8, %v1605_v53  ;;  %v1481_v22 = vld [vmem:[#allocation3 + $0x124] ss:$2 sm:$0xff] }
 0x164   : > { %1100 = vst.msk [vmem:[#allocation3 + $0x140] sm:$0xff] %vm1059_vm4, %v1017_v52  ;;  %2263 = vmatmul.msk.bf16.gmra.mxu1 %vm1152_vm6, %v1301_v61 }
 0x165   : > { %1434 = vst.msk [vmem:[#allocation4 + $0x20] sm:$0xff] %vm1238_vm8, %v1416_v59 }
 0x166   : > { %1245 = vst.msk [vmem:[#allocation4 + $0x30] sm:$0xff] %vm1238_vm8, %v1208_v60 }
 0x167   : > { %v1724_v5 = vpop.permute.xlu0 %1723  ;;  %v2049_v46 = vpop.f32.mrf.mxu3 }
 0x168   : > { %v1547_v3 = vpop.f32.mrf.mxu2  ;;  %2091 = vst.msk [vmem:[%s2943_s13 + $0x10] sm:$0xff] %vm1238_vm8, %v2049_v46 }
 0x169   : > { %v1606_v6 = vadd.f32 %v1588_v4, %v1547_v3  ;;  %v1714_v10 = vpop.permute.xlu1 %1713  ;;  %v1361_v11 = vpop.f32.mrf.mxu1 }
 0x16a   : > { %v1641_v9 = vld [vmem:[#allocation4 + $0x10] sm:$0xff]  ;;  %v1801_v13 = vmul.f32 %v1714_v10, %v2906_v28  ;;  %v1210_v15 = vpop.f32.mrf.mxu0  ;;  %v1417_v16 = vadd.f32 %v1399_v14, %v1361_v11 }
 0x16b   : > { %1659 = vst.msk [vmem:[%s2900_s24 + $0x10] sm:$0xff] %vm1238_vm8, %v1641_v9  ;;  %v1803_v12 = vmul.f32 %v1724_v5, %v1641_v9  ;;  %v1483_v17 = vld [vmem:[#allocation3 + $0x134] ss:$2 sm:$0xff] }
 0x16c   : > { %1624 = vst.msk [vmem:[#allocation4 + $0x18] sm:$0xff] %vm1238_vm8, %v1606_v6  ;;  %v1819_v20 = vsel %vm1238_vm8, %v1801_v13, 0.0  ;;  %v1898_v21 = vmul.f32 %v1801_v13, %v1801_v13  ;;  %v1492_v24 = vpack.c.bf16 %v1483_v17, %v1481_v22  ;;  %v1589_v32 = vld [vmem:[#allocation4 + $0x20] sm:$0xff] }
 0x16d   : > { %v1900_v19 = vmul.f32 %v1803_v12, %v1803_v12  ;;  %1246 = vst.msk [vmem:[#allocation4 + $0x38] sm:$0xff] %vm1238_vm8, %v1210_v15  ;;  %v1821_v23 = vadd.f32 %v1820_v18, %v1819_v20  ;;  %v1822_v26 = vsel %vm1238_vm8, %v1803_v12, 0.0  ;;  %v1400_v49 = vld [vmem:[#allocation4 + $0x30] sm:$0xff]  ;;  %v1744_v18 = vpop.permute.xlu2 %1743 }
 0x16e   : > { %1435 = vst.msk [vmem:[#allocation4 + $0x28] sm:$0xff] %vm1238_vm8, %v1417_v16  ;;  %v1916_v27 = vsel %vm1238_vm8, %v1898_v21, 0.0  ;;  %2278 = vmatmul.msk.bf16.gmra.mxu2 %vm1152_vm6, %v1492_v24 }
 0x16f   : > { %v1918_v28 = vadd.f32 %v1917_v25, %v1916_v27  ;;  %v1823_v29 = vadd.f32 %v1822_v26, %v1821_v23  ;;  %v1919_v30 = vsel %vm1238_vm8, %v1900_v19, 0.0  ;;  %v2051_v58 = vpop.f32.mrf.mxu3 }
 0x170   : > { %v1550_v31 = vpop.f32.mrf.mxu2  ;;  %2092 = vst.msk [vmem:[%s2943_s13 + $0x18] sm:$0xff] %vm1238_vm8, %v2051_v58 }
 0x171   : > { %v1607_v34 = vadd.f32 %v1589_v32, %v1550_v31  ;;  %v1729_v35 = vpop.permute.xlu1 %1728  ;;  %v1920_v36 = vadd.f32 %v1919_v30, %v1918_v28  ;;  %v1749_v32 = vpop.permute.xlu0 %1748 }
 0x173   : > { %v1642_v37 = vld [vmem:[#allocation4 + $0x18] sm:$0xff]  ;;  %1625 = vst.msk [vmem:[#allocation4 + $0x20] sm:$0xff] %vm1238_vm8, %v1607_v34 }
 0x174   : > { %1660 = vst.msk [vmem:[%s2900_s24 + $0x18] sm:$0xff] %vm1238_vm8, %v1642_v37  ;;  %v1804_v38 = vmul.f32 %v1729_v35, %v1642_v37  ;;  %v1401_v62 = vld [vmem:[#allocation4 + $0x38] sm:$0xff] }
 0x175   : > { %v1590_v45 = vld [vmem:[#allocation4 + $0x28] sm:$0xff] }
 0x176   : > { %v1824_v39 = vsel %vm1238_vm8, %v1804_v38, 0.0  ;;  %v1901_v40 = vmul.f32 %v1804_v38, %v1804_v38 }
 0x177   : > { %v1825_v41 = vadd.f32 %v1824_v39, %v1823_v29  ;;  %v2054_v11 = vpop.f32.mrf.mxu3 }
 0x178   : > { %v1921_v42 = vsel %vm1238_vm8, %v1901_v40, 0.0  ;;  %v1552_v44 = vpop.f32.mrf.mxu2  ;;  %2093 = vst.msk [vmem:[%s2943_s13 + $0x20] sm:$0xff] %vm1238_vm8, %v2054_v11 }
 0x179   : > { %v1922_v43 = vadd.f32 %v1921_v42, %v1920_v36  ;;  %v1608_v47 = vadd.f32 %v1590_v45, %v1552_v44  ;;  %v1739_v1 = vpop.permute.xlu1 %1738 }
 0x17a   : > { %v1364_v48 = vpop.f32.mrf.mxu1  ;;  %v1643_v52 = vld [vmem:[#allocation4 + $0x20] sm:$0xff] }
 0x17b   : > { %v1418_v51 = vadd.f32 %v1400_v49, %v1364_v48  ;;  %1626 = vst.msk [vmem:[#allocation4 + $0x28] sm:$0xff] %vm1238_vm8, %v1608_v47  ;;  %v1805_v53 = vmul.f32 %v1734_v50, %v1643_v52 }
 0x17c   : > { %1661 = vst.msk [vmem:[%s2900_s24 + $0x20] sm:$0xff] %vm1238_vm8, %v1643_v52 }
 0x17d   : > { %1436 = vst.msk [vmem:[#allocation4 + $0x30] sm:$0xff] %vm1238_vm8, %v1418_v51  ;;  %v1826_v54 = vsel %vm1238_vm8, %v1805_v53, 0.0  ;;  %v1902_v55 = vmul.f32 %v1805_v53, %v1805_v53 }
 0x17e   : > { %v1827_v56 = vadd.f32 %v1826_v54, %v1825_v41 }
 0x17f   : > { %v1923_v57 = vsel %vm1238_vm8, %v1902_v55, 0.0  ;;  %v2056_v20 = vpop.f32.mrf.mxu3 }
 0x180   : > { %v1924_v59 = vadd.f32 %v1923_v57, %v1922_v43  ;;  %2094 = vst.msk [vmem:[%s2943_s13 + $0x28] sm:$0xff] %vm1238_vm8, %v2056_v20 }
 0x181   : > { %v1213_v60 = vpop.f32.mrf.mxu0  ;;  %v1754_v52 = vpop.permute.xlu1 %1753 }
 0x182   : > { %v1366_v61 = vpop.f32.mrf.mxu1  ;;  %v1644_v63 = vld [vmem:[#allocation4 + $0x28] sm:$0xff]  ;;  %1247 = vst.msk [vmem:[#allocation4 + $0x40] sm:$0xff] %vm1238_vm8, %v1213_v60 }
 0x183   : > { %v1419_v2 = vadd.f32 %v1401_v62, %v1366_v61  ;;  %1662 = vst.msk [vmem:[%s2900_s24 + $0x28] sm:$0xff] %vm1238_vm8, %v1644_v63  ;;  %v1806_v0 = vmul.f32 %v1739_v1, %v1644_v63 }
 0x184   : > { %v1591_v8 = vld [vmem:[#allocation4 + $0x30] sm:$0xff] }
 0x185   : > { %1437 = vst.msk [vmem:[#allocation4 + $0x38] sm:$0xff] %vm1238_vm8, %v1419_v2  ;;  %v1828_v3 = vsel %vm1238_vm8, %v1806_v0, 0.0  ;;  %v1903_v4 = vmul.f32 %v1806_v0, %v1806_v0  ;;  %v1759_v0 = vpop.permute.xlu2 %1758 }
 0x186   : > { %v1829_v5 = vadd.f32 %v1828_v3, %v1827_v56 }
 0x187   : > { %v1925_v6 = vsel %vm1238_vm8, %v1903_v4, 0.0  ;;  %v2059_v33 = vpop.f32.mrf.mxu3 }
 0x188   : > { %v1555_v7 = vpop.f32.mrf.mxu2  ;;  %v1926_v9 = vadd.f32 %v1925_v6, %v1924_v59  ;;  %2095 = vst.msk [vmem:[%s2943_s13 + $0x30] sm:$0xff] %vm1238_vm8, %v2059_v33 }
 0x189   : > { %v1609_v10 = vadd.f32 %v1591_v8, %v1555_v7  ;;  %v1215_v12 = vpop.f32.mrf.mxu0  ;;  %v1402_v13 = vld [vmem:[#allocation4 + $0x40] sm:$0xff] }
 0x18a   : > { %v1369_v14 = vpop.f32.mrf.mxu1  ;;  %1248 = vst.msk [vmem:[#allocation4 + $0x48] sm:$0xff] %vm1238_vm8, %v1215_v12 }
 0x18b   : > { %1627 = vst.msk [vmem:[#allocation4 + $0x30] sm:$0xff] %vm1238_vm8, %v1609_v10  ;;  %v1420_v15 = vadd.f32 %v1402_v13, %v1369_v14 }
 0x18c   : > { %v1592_v17 = vld [vmem:[#allocation4 + $0x38] sm:$0xff] }
 0x18d   : > { %1438 = vst.msk [vmem:[#allocation4 + $0x40] sm:$0xff] %vm1238_vm8, %v1420_v15 }
 0x18f   : > { %v2061_v45 = vpop.f32.mrf.mxu3 }
 0x190   : > { %v1557_v16 = vpop.f32.mrf.mxu2  ;;  %2096 = vst.msk [vmem:[%s2943_s13 + $0x38] sm:$0xff] %vm1238_vm8, %v2061_v45 }
 0x191   : > { %v1610_v19 = vadd.f32 %v1592_v17, %v1557_v16  ;;  %v1403_v25 = vld [vmem:[#allocation4 + $0x48] sm:$0xff] }
 0x192   : > { %v1645_v21 = vld [vmem:[#allocation4 + $0x30] sm:$0xff]  ;;  %v1218_v23 = vpop.f32.mrf.mxu0  ;;  %v1371_v24 = vpop.f32.mrf.mxu1 }
 0x193   : > { %1663 = vst.msk [vmem:[%s2900_s24 + $0x30] sm:$0xff] %vm1238_vm8, %v1645_v21  ;;  %v1807_v22 = vmul.f32 %v1744_v18, %v1645_v21  ;;  %v1421_v26 = vadd.f32 %v1403_v25, %v1371_v24 }
 0x194   : > { %1628 = vst.msk [vmem:[#allocation4 + $0x38] sm:$0xff] %vm1238_vm8, %v1610_v19  ;;  %v1593_v42 = vld [vmem:[#allocation4 + $0x40] sm:$0xff] }
 0x195   : > { %v1830_v27 = vsel %vm1238_vm8, %v1807_v22, 0.0  ;;  %v1904_v28 = vmul.f32 %v1807_v22, %v1807_v22  ;;  %1249 = vst.msk [vmem:[#allocation4 + $0x50] sm:$0xff] %vm1238_vm8, %v1218_v23 }
 0x196   : > { %v1831_v29 = vadd.f32 %v1830_v27, %v1829_v5  ;;  %1439 = vst.msk [vmem:[#allocation4 + $0x48] sm:$0xff] %vm1238_vm8, %v1421_v26 }
 0x197   : > { %v1927_v30 = vsel %vm1238_vm8, %v1904_v28, 0.0  ;;  %v2064_v54 = vpop.f32.mrf.mxu3 }
 0x198   : > { %v1928_v31 = vadd.f32 %v1927_v30, %v1926_v9  ;;  %2097 = vst.msk [vmem:[%s2943_s13 + $0x40] sm:$0xff] %vm1238_vm8, %v2064_v54 }
 0x19a   : > { %v1220_v35 = vpop.f32.mrf.mxu0 }
 0x19b   : > { %v1646_v34 = vld [vmem:[#allocation4 + $0x38] sm:$0xff]  ;;  %1250 = vst.msk [vmem:[#allocation4 + $0x58] sm:$0xff] %vm1238_vm8, %v1220_v35 }
 0x19c   : > { %1664 = vst.msk [vmem:[%s2900_s24 + $0x38] sm:$0xff] %vm1238_vm8, %v1646_v34  ;;  %v1808_v36 = vmul.f32 %v1749_v32, %v1646_v34  ;;  %v1404_v47 = vld [vmem:[#allocation4 + $0x50] sm:$0xff] }
 0x19d   : > { %v1594_v51 = vld [vmem:[#allocation4 + $0x48] sm:$0xff] }
 0x19e   : > { %v1832_v37 = vsel %vm1238_vm8, %v1808_v36, 0.0  ;;  %v1905_v38 = vmul.f32 %v1808_v36, %v1808_v36 }
 0x19f   : > { %v1833_v39 = vadd.f32 %v1832_v37, %v1831_v29  ;;  %v2066_v5 = vpop.f32.mrf.mxu3 }
 0x1a0   : > { %v1929_v40 = vsel %vm1238_vm8, %v1905_v38, 0.0  ;;  %v1560_v41 = vpop.f32.mrf.mxu2  ;;  %2098 = vst.msk [vmem:[%s2943_s13 + $0x48] sm:$0xff] %vm1238_vm8, %v2066_v5 }
 0x1a1   : > { %v1930_v43 = vadd.f32 %v1929_v40, %v1928_v31  ;;  %v1611_v44 = vadd.f32 %v1593_v42, %v1560_v41  ;;  %v1374_v46 = vpop.f32.mrf.mxu1 }
 0x1a2   : > { %v1422_v48 = vadd.f32 %v1404_v47, %v1374_v46  ;;  %v1223_v49 = vpop.f32.mrf.mxu0  ;;  %v1405_v57 = vld [vmem:[#allocation4 + $0x58] sm:$0xff] }
 0x1a3   : > { %1629 = vst.msk [vmem:[#allocation4 + $0x40] sm:$0xff] %vm1238_vm8, %v1611_v44 }
 0x1a4   : > { %1251 = vst.msk [vmem:[#allocation4 + $0x60] sm:$0xff] %vm1238_vm8, %v1223_v49 }
 0x1a5   : > { %1440 = vst.msk [vmem:[#allocation4 + $0x50] sm:$0xff] %vm1238_vm8, %v1422_v48 }
 0x1a7   : > { %v2069_v19 = vpop.f32.mrf.mxu3 }
 0x1a8   : > { %v1562_v50 = vpop.f32.mrf.mxu2  ;;  %2099 = vst.msk [vmem:[%s2943_s13 + $0x50] sm:$0xff] %vm1238_vm8, %v2069_v19 }
 0x1a9   : > { %v1612_v53 = vadd.f32 %v1594_v51, %v1562_v50  ;;  %v1376_v56 = vpop.f32.mrf.mxu1 }
 0x1aa   : > { %v1647_v55 = vld [vmem:[#allocation4 + $0x40] sm:$0xff]  ;;  %v1423_v58 = vadd.f32 %v1405_v57, %v1376_v56  ;;  %v1225_v59 = vpop.f32.mrf.mxu0 }
 0x1ab   : > { %1665 = vst.msk [vmem:[%s2900_s24 + $0x40] sm:$0xff] %vm1238_vm8, %v1647_v55  ;;  %v1809_v1 = vmul.f32 %v1754_v52, %v1647_v55  ;;  %v1406_v18 = vld [vmem:[#allocation4 + $0x60] sm:$0xff] }
 0x1ac   : > { %1630 = vst.msk [vmem:[#allocation4 + $0x48] sm:$0xff] %vm1238_vm8, %v1612_v53  ;;  %v1595_v4 = vld [vmem:[#allocation4 + $0x50] sm:$0xff] }
 0x1ad   : > { %v1834_v60 = vsel %vm1238_vm8, %v1809_v1, 0.0  ;;  %v1906_v61 = vmul.f32 %v1809_v1, %v1809_v1  ;;  %1441 = vst.msk [vmem:[#allocation4 + $0x58] sm:$0xff] %vm1238_vm8, %v1423_v58 }
 0x1ae   : > { %v1835_v62 = vadd.f32 %v1834_v60, %v1833_v39  ;;  %1252 = vst.msk [vmem:[#allocation4 + $0x68] sm:$0xff] %vm1238_vm8, %v1225_v59 }
 0x1af   : > { %v1931_v63 = vsel %vm1238_vm8, %v1906_v61, 0.0  ;;  %v2071_v27 = vpop.f32.mrf.mxu3  ;;  %v1764_v61 = vpop.permute.xlu0 %1763 }
 0x1b0   : > { %v1932_v2 = vadd.f32 %v1931_v63, %v1930_v43  ;;  %v1565_v3 = vpop.f32.mrf.mxu2  ;;  %2100 = vst.msk [vmem:[%s2943_s13 + $0x58] sm:$0xff] %vm1238_vm8, %v2071_v27  ;;  %v1769_v63 = vpop.permute.xlu1 %1768 }
 0x1b1   : > { %v1613_v6 = vadd.f32 %v1595_v4, %v1565_v3 }
 0x1b3   : > { %v1648_v7 = vld [vmem:[#allocation4 + $0x48] sm:$0xff]  ;;  %1631 = vst.msk [vmem:[#allocation4 + $0x50] sm:$0xff] %vm1238_vm8, %v1613_v6 }
 0x1b4   : > { %1666 = vst.msk [vmem:[%s2900_s24 + $0x48] sm:$0xff] %vm1238_vm8, %v1648_v7  ;;  %v1810_v8 = vmul.f32 %v1759_v0, %v1648_v7  ;;  %v1596_v15 = vld [vmem:[#allocation4 + $0x58] sm:$0xff]  ;;  %v1774_v0 = vpop.permute.xlu2 %1773 }
 0x1b5   : > { %v1407_v24 = vld [vmem:[#allocation4 + $0x68] sm:$0xff] }
 0x1b6   : > { %v1836_v9 = vsel %vm1238_vm8, %v1810_v8, 0.0  ;;  %v1907_v10 = vmul.f32 %v1810_v8, %v1810_v8 }
 0x1b7   : > { %v3024_v11 = vadd.f32 %v1836_v9, %v1835_v62  ;;  %v2074_v34 = vpop.f32.mrf.mxu3  ;;  %v1779_v7 = vpop.permute.xlu0 %1778 }
 0x1b8   : > { %v1933_v12 = vsel %vm1238_vm8, %v1907_v10, 0.0  ;;  %v1567_v14 = vpop.f32.mrf.mxu2  ;;  %2101 = vst.msk [vmem:[%s2943_s13 + $0x60] sm:$0xff] %vm1238_vm8, %v2074_v34 }
 0x1b9   : > { %v3027_v13 = vadd.f32 %v1933_v12, %v1932_v2  ;;  %v1614_v16 = vadd.f32 %v1596_v15, %v1567_v14 }
 0x1ba   : > { %v1379_v17 = vpop.f32.mrf.mxu1  ;;  %v3031_v21 = vld [vmem:[#allocation4 + $0x50] sm:$0xff] }
 0x1bb   : > { %v1424_v20 = vadd.f32 %v1406_v18, %v1379_v17  ;;  %1632 = vst.msk [vmem:[#allocation4 + $0x58] sm:$0xff] %vm1238_vm8, %v1614_v16  ;;  %v1890_v2 = vmul.f32 %v1764_v61, %v3031_v21  ;;  %v1784_v18 = vpop.permute.xlu1 %1783 }
 0x1bc   : > { %1667 = vst.msk [vmem:[%s2900_s24 + $0x50] sm:$0xff] %vm1238_vm8, %v3031_v21 }
 0x1bd   : > { %1442 = vst.msk [vmem:[#allocation4 + $0x60] sm:$0xff] %vm1238_vm8, %v1424_v20  ;;  %v1908_v9 = vmul.f32 %v1890_v2, %v1890_v2  ;;  %v1838_v15 = vsel %vm1238_vm8, %v1890_v2, 0.0 }
 0x1bf   : > { %v2076_v42 = vpop.f32.mrf.mxu3  ;;  %v1935_v17 = vsel %vm1238_vm8, %v1908_v9, 0.0 }
 0x1c0   : > { %2102 = vst.msk [vmem:[%s2943_s13 + $0x68] sm:$0xff] %vm1238_vm8, %v2076_v42 }
 0x1c1   : > { %v1228_v22 = vpop.f32.mrf.mxu0 }
 0x1c2   : > { %v1381_v23 = vpop.f32.mrf.mxu1  ;;  %v3038_v25 = vld [vmem:[#allocation4 + $0x58] sm:$0xff]  ;;  %1253 = vst.msk [vmem:[#allocation4 + $0x70] sm:$0xff] %vm1238_vm8, %v1228_v22  ;;  %v1839_v22 = vadd.f32 %v1838_v15, %v3024_v11  ;;  %v1794_v11 = vpop.permute.xlu0 %1793 }
 0x1c3   : > { %v1425_v26 = vadd.f32 %v1407_v24, %v1381_v23  ;;  %1668 = vst.msk [vmem:[%s2900_s24 + $0x58] sm:$0xff] %vm1238_vm8, %v3038_v25  ;;  %v1891_v3 = vmul.f32 %v1769_v63, %v3038_v25  ;;  %v1789_v25 = vpop.permute.xlu2 %1788 }
 0x1c4   : > { %v1597_v29 = vld [vmem:[#allocation4 + $0x60] sm:$0xff] }
 0x1c5   : > { %1443 = vst.msk [vmem:[#allocation4 + $0x68] sm:$0xff] %vm1238_vm8, %v1425_v26  ;;  %v1909_v14 = vmul.f32 %v1891_v3, %v1891_v3  ;;  %v1840_v19 = vsel %vm1238_vm8, %v1891_v3, 0.0 }
 0x1c7   : > { %v2079_v46 = vpop.f32.mrf.mxu3  ;;  %v1937_v23 = vsel %vm1238_vm8, %v1909_v14, 0.0 }
 0x1c8   : > { %v1570_v28 = vpop.f32.mrf.mxu2  ;;  %2103 = vst.msk [vmem:[%s2943_s13 + $0x70] sm:$0xff] %vm1238_vm8, %v2079_v46 }
 0x1c9   : > { %v1615_v30 = vadd.f32 %v1597_v29, %v1570_v28  ;;  %v1230_v31 = vpop.f32.mrf.mxu0  ;;  %v1408_v32 = vld [vmem:[#allocation4 + $0x70] sm:$0xff] }
 0x1ca   : > { %v1384_v33 = vpop.f32.mrf.mxu1  ;;  %1254 = vst.msk [vmem:[#allocation4 + $0x78] sm:$0xff] %vm1238_vm8, %v1230_v31  ;;  %v1936_v31 = vadd.f32 %v1935_v17, %v3027_v13 }
 0x1cb   : > { %1633 = vst.msk [vmem:[#allocation4 + $0x60] sm:$0xff] %vm1238_vm8, %v1615_v30  ;;  %v1426_v35 = vadd.f32 %v1408_v32, %v1384_v33  ;;  %v1841_v32 = vadd.f32 %v1840_v19, %v1839_v22 }
 0x1cc   : > { %v1598_v37 = vld [vmem:[#allocation4 + $0x68] sm:$0xff] }
 0x1cd   : > { %1444 = vst.msk [vmem:[#allocation4 + $0x70] sm:$0xff] %vm1238_vm8, %v1426_v35 }
 0x1cf   : > { %v2081_v54 = vpop.f32.mrf.mxu3 }
 0x1d0   : > { %v1572_v36 = vpop.f32.mrf.mxu2  ;;  %2104 = vst.msk [vmem:[%s2943_s13 + $0x78] sm:$0xff] %vm1238_vm8, %v2081_v54 }
 0x1d1   : > { %v1616_v38 = vadd.f32 %v1598_v37, %v1572_v36  ;;  %v1409_v41 = vld [vmem:[#allocation4 + $0x78] sm:$0xff]  ;;  %v1938_v37 = vadd.f32 %v1937_v23, %v1936_v31 }
 0x1d2   : > { %v1651_v39 = vld [vmem:[#allocation4 + $0x60] sm:$0xff]  ;;  %v1386_v40 = vpop.f32.mrf.mxu1 }
 0x1d3   : > { %1669 = vst.msk [vmem:[%s2900_s24 + $0x60] sm:$0xff] %vm1238_vm8, %v1651_v39  ;;  %v1233_v43 = vpop.f32.mrf.mxu0  ;;  %v1427_v44 = vadd.f32 %v1409_v41, %v1386_v40  ;;  %v1892_v12 = vmul.f32 %v1774_v0, %v1651_v39 }
 0x1d4   : > { %1634 = vst.msk [vmem:[#allocation4 + $0x68] sm:$0xff] %vm1238_vm8, %v1616_v38  ;;  %v1599_v49 = vld [vmem:[#allocation4 + $0x70] sm:$0xff] }
 0x1d5   : > { %1255 = vst.msk [vmem:[#allocation4 + $0x80] sm:$0xff] %vm1238_vm8, %v1233_v43  ;;  %v1910_v20 = vmul.f32 %v1892_v12, %v1892_v12  ;;  %v1842_v24 = vsel %vm1238_vm8, %v1892_v12, 0.0 }
 0x1d6   : > { %1445 = vst.msk [vmem:[#allocation4 + $0x78] sm:$0xff] %vm1238_vm8, %v1427_v44  ;;  %v1843_v38 = vadd.f32 %v1842_v24, %v1841_v32 }
 0x1d7   : > { %v2084_v60 = vpop.f32.mrf.mxu3  ;;  %v1939_v33 = vsel %vm1238_vm8, %v1910_v20, 0.0 }
 0x1d8   : > { %2105 = vst.msk [vmem:[%s2943_s13 + $0x80] sm:$0xff] %vm1238_vm8, %v2084_v60  ;;  %v1940_v42 = vadd.f32 %v1939_v33, %v1938_v37 }
 0x1db   : > { %v1652_v45 = vld [vmem:[#allocation4 + $0x68] sm:$0xff]  ;;  %v1235_v47 = vpop.f32.mrf.mxu0 }
 0x1dc   : > { %1670 = vst.msk [vmem:[%s2900_s24 + $0x68] sm:$0xff] %vm1238_vm8, %v1652_v45  ;;  %v1410_v51 = vld [vmem:[#allocation4 + $0x80] sm:$0xff]  ;;  %v1893_v16 = vmul.f32 %v1779_v7, %v1652_v45 }
 0x1dd   : > { %1256 = vst.msk [vmem:[#allocation4 + $0x88] sm:$0xff] %vm1238_vm8, %v1235_v47  ;;  %v1600_v56 = vld [vmem:[#allocation4 + $0x78] sm:$0xff] }
 0x1de   : > { %v1911_v28 = vmul.f32 %v1893_v16, %v1893_v16  ;;  %v1844_v34 = vsel %vm1238_vm8, %v1893_v16, 0.0 }
 0x1df   : > { %v1575_v48 = vpop.f32.mrf.mxu2  ;;  %v2086_v6 = vpop.f32.mrf.mxu3  ;;  %v1845_v43 = vadd.f32 %v1844_v34, %v1843_v38 }
 0x1e0   : > { %v1617_v52 = vadd.f32 %v1599_v49, %v1575_v48  ;;  %2106 = vst.msk [vmem:[%s2943_s13 + $0x88] sm:$0xff] %vm1238_vm8, %v2086_v6  ;;  %v1941_v40 = vsel %vm1238_vm8, %v1911_v28, 0.0 }
 0x1e1   : > { %v1389_v50 = vpop.f32.mrf.mxu1  ;;  %v1942_v47 = vadd.f32 %v1941_v40, %v1940_v42 }
 0x1e2   : > { %v1428_v53 = vadd.f32 %v1410_v51, %v1389_v50  ;;  %1635 = vst.msk [vmem:[#allocation4 + $0x70] sm:$0xff] %vm1238_vm8, %v1617_v52  ;;  %v1799_v51 = vpop.permute.xlu1 %1798 }
 0x1e4   : > { %1446 = vst.msk [vmem:[#allocation4 + $0x80] sm:$0xff] %vm1238_vm8, %v1428_v53  ;;  %v1411_v1 = vld [vmem:[#allocation4 + $0x88] sm:$0xff] }
 0x1e7   : > { %v1577_v55 = vpop.f32.mrf.mxu2 }
 0x1e8   : > { %v1618_v58 = vadd.f32 %v1600_v56, %v1577_v55 }
 0x1e9   : > { %v1391_v57 = vpop.f32.mrf.mxu1  ;;  %v1653_v62 = vld [vmem:[#allocation4 + $0x70] sm:$0xff] }
 0x1ea   : > { %v1429_v59 = vadd.f32 %v1411_v1, %v1391_v57  ;;  %1671 = vst.msk [vmem:[%s2900_s24 + $0x70] sm:$0xff] %vm1238_vm8, %v1653_v62  ;;  %v1894_v21 = vmul.f32 %v1784_v18, %v1653_v62 }
 0x1eb   : > { %1636 = vst.msk [vmem:[#allocation4 + $0x78] sm:$0xff] %vm1238_vm8, %v1618_v58  ;;  %v1601_v5 = vld [vmem:[#allocation4 + $0x80] sm:$0xff] }
 0x1ec   : > { %1447 = vst.msk [vmem:[#allocation4 + $0x88] sm:$0xff] %vm1238_vm8, %v1429_v59  ;;  %v1912_v35 = vmul.f32 %v1894_v21, %v1894_v21  ;;  %v1846_v41 = vsel %vm1238_vm8, %v1894_v21, 0.0 }
 0x1ed   : > { %v1847_v48 = vadd.f32 %v1846_v41, %v1845_v43 }
 0x1ee   : > { %v1943_v44 = vsel %vm1238_vm8, %v1912_v35, 0.0 }
 0x1ef   : > { %v1944_v52 = vadd.f32 %v1943_v44, %v1942_v47 }
 0x1f1   : > { %v1580_v4 = vpop.f32.mrf.mxu2 }
 0x1f2   : > { %v1619_v8 = vadd.f32 %v1601_v5, %v1580_v4  ;;  %v1654_v10 = vld [vmem:[#allocation4 + $0x78] sm:$0xff] }
 0x1f3   : > { %1672 = vst.msk [vmem:[%s2900_s24 + $0x78] sm:$0xff] %vm1238_vm8, %v1654_v10  ;;  %v1602_v27 = vld [vmem:[#allocation4 + $0x88] sm:$0xff]  ;;  %v1895_v29 = vmul.f32 %v1789_v25, %v1654_v10 }
 0x1f4   : > { %1637 = vst.msk [vmem:[#allocation4 + $0x80] sm:$0xff] %vm1238_vm8, %v1619_v8 }
 0x1f5   : > { %v1913_v13 = vmul.f32 %v1895_v29, %v1895_v29  ;;  %v1848_v45 = vsel %vm1238_vm8, %v1895_v29, 0.0 }
 0x1f6   : > { %v1849_v53 = vadd.f32 %v1848_v45, %v1847_v48 }
 0x1f7   : > { %v1945_v49 = vsel %vm1238_vm8, %v1913_v13, 0.0 }
 0x1f8   : > { %v1946_v57 = vadd.f32 %v1945_v49, %v1944_v52 }
 0x1f9   : > { %v1582_v26 = vpop.f32.mrf.mxu2 }
 0x1fa   : > { %v1620_v30 = vadd.f32 %v1602_v27, %v1582_v26 }
 0x1fb   : > { %v1655_v36 = vld [vmem:[#allocation4 + $0x80] sm:$0xff] }
 0x1fc   : > { %1638 = vst.msk [vmem:[#allocation4 + $0x88] sm:$0xff] %vm1238_vm8, %v1620_v30  ;;  %v1896_v39 = vmul.f32 %v1794_v11, %v1655_v36 }
 0x1fd   : > { %1673 = vst.msk [vmem:[%s2900_s24 + $0x80] sm:$0xff] %vm1238_vm8, %v1655_v36 }
 0x1fe   : > { %v1914_v46 = vmul.f32 %v1896_v39, %v1896_v39  ;;  %v1850_v50 = vsel %vm1238_vm8, %v1896_v39, 0.0 }
 0x1ff   : > { %v1851_v1 = vadd.f32 %v1850_v50, %v1849_v53 }
 0x200   : > { %v1947_v55 = vsel %vm1238_vm8, %v1914_v46, 0.0 }
 0x201   : > { %v1948_v60 = vadd.f32 %v1947_v55, %v1946_v57 }
 0x203   : > { %v1656_v54 = vld [vmem:[#allocation4 + $0x88] sm:$0xff] }
 0x204   : > { %1674 = vst.msk [vmem:[%s2900_s24 + $0x88] sm:$0xff] %vm1238_vm8, %v1656_v54  ;;  %v1818_v56 = vmul.f32 %v1799_v51, %v1656_v54 }
 0x206   : > { %v1852_v58 = vsel %vm1238_vm8, %v1818_v56, 0.0  ;;  %v1915_v59 = vmul.f32 %v1818_v56, %v1818_v56 }
 0x207   : > { %v1853_v61 = vadd.f32 %v1852_v58, %v1851_v1 }
 0x208   : > { %v1949_v62 = vsel %vm1238_vm8, %v1915_v59, 0.0 }
 0x209   : > { %v1854_v63 = vrot.slane %v1853_v61, 4  ;;  %v1950_v2 = vadd.f32 %v1949_v62, %v1948_v60 }
 0x20b   : > { %v1855_v0 = vadd.f32 %v1854_v63, %v1853_v61  ;;  %v1951_v3 = vrot.slane %v1950_v2, 4 }
 0x20d   : > { %v1856_v4 = vrot.slane %v1855_v0, 2  ;;  %v1952_v5 = vadd.f32 %v1951_v3, %v1950_v2 }
 0x20f   : > { %v1857_v6 = vadd.f32 %v1856_v4, %v1855_v0  ;;  %v1953_v7 = vrot.slane %v1952_v5, 2 }
 0x211   : > { %v1858_v8 = vrot.slane %v1857_v6, 1  ;;  %v1954_v9 = vadd.f32 %v1953_v7, %v1952_v5 }
 0x213   : > { %v1859_v10 = vadd.f32 %v1858_v8, %v1857_v6  ;;  %v1955_v12 = vrot.slane %v1954_v9, 1 }
 0x215   : > { %1861 = vst.msk [vmem:[%s323_s17] sm:$0x1] %vm1860_vm9, %v1859_v10  ;;  %v1956_v14 = vadd.f32 %v1955_v12, %v1954_v9 }
 0x217   : > { %1957 = vst.msk [vmem:[%s323_s17 + $0x1] sm:$0x1] %vm1860_vm9, %v1956_v14 }
 0x218 PF: > { %s19_s27 = sadd.s32 1, %s2318_s27  }
 0x219   : > { %p16_p4 = scmp.ge.s32.totalorder %s19_s27, 4  }
 0x21b   :  { %18 = sbr.rel (!%p16_p4) target bundleno = 1 (0x1), region = 171 }

</bundles_post_ra>
